<compile_context>
chip_gen: v6e
topology: v6e:2x2x1
jax: 0.10.0
libtpu: 0.0.40
codegen_flags: <defaults>
</compile_context>

<pallas_src>
import functools
import math

import jax
import jax.numpy as jnp
import numpy as np
from jax.experimental import pallas as pl
from jax.experimental.pallas import tpu as pltpu


_VMEM_LIMIT = 48 * 1024 * 1024   # under v7x's 64 MiB per-TC VMEM, raises v5e/v6e default


# ----------------------------------------------------------------------------
# Pallas kernels
# ----------------------------------------------------------------------------
def _layernorm(v, w, b, eps=1e-5):
    mu = jnp.mean(v, axis=-1, keepdims=True)
    var = jnp.mean(jnp.square(v - mu), axis=-1, keepdims=True)
    return (v - mu) * jax.lax.rsqrt(var + eps) * w + b


def fused_transformer_kernel(stream_ref, mask_ref,
                             ln0_w_ref, ln0_b_ref,
                             wqkv_ref, bqkv_ref,
                             wout_ref, bout_ref,
                             ln1_w_ref, ln1_b_ref,
                             wff1_ref, bff1_ref,
                             wff2_ref, bff2_ref,
                             out_ref, *, heads, d_kq, d_v):
    """One grid step = one (batch-tile, layer).  out_ref carries the residual
    stream across the (innermost, arbitrary) layer axis in VMEM."""
    li = pl.program_id(1)

    @pl.when(li == 0)
    def _():
        out_ref[...] = stream_ref[...]          # initialise resident residual stream

    x = out_ref[...]                            # (Bt, N, D) f32
    Bt, N, D = x.shape
    Hq = heads * d_kq
    Hv = heads * d_v
    M = Bt * N
    mask = mask_ref[...]                        # (N, N) additive mask, f32

    def mm(a_bf16, w_ref_, b_ref_):
        # bf16 operands, f32 accumulation on the MXU; bias added in f32.
        return jnp.dot(a_bf16, w_ref_[0], preferred_element_type=jnp.float32) + b_ref_[0]

    xf = x.reshape(M, D)

    # ---------------- attention sub-layer ----------------
    h = _layernorm(xf, ln0_w_ref[0], ln0_b_ref[0]).astype(jnp.bfloat16)   # single cast
    qkv = mm(h, wqkv_ref, bqkv_ref)             # (M, 2*Hq+Hv), one packed MXU push
    q = qkv[:, :Hq]                             # 128-aligned lane slices
    k = qkv[:, Hq:2 * Hq]
    v = qkv[:, 2 * Hq:]

    def to_heads(t, dh):
        t = t.reshape(Bt, N, heads, dh)
        return jnp.transpose(t, (0, 2, 1, 3)).reshape(Bt * heads, N, dh)

    qh = to_heads(q, d_kq).astype(jnp.bfloat16)
    kh = to_heads(k, d_kq).astype(jnp.bfloat16)
    vh = to_heads(v, d_v).astype(jnp.bfloat16)

    scale = 1.0 / math.sqrt(d_kq)
    logits = jnp.einsum('gnd,gmd->gnm', qh, kh,
                        preferred_element_type=jnp.float32) * scale
    logits = logits + mask[None, :, :]
    mmax = jnp.max(logits, axis=-1, keepdims=True)
    p = jnp.exp(logits - mmax)
    denom = jnp.sum(p, axis=-1, keepdims=True)
    wgt = p * pl.reciprocal(denom, approx=True)                 # EUP, off the VALU path
    ctx = jnp.einsum('gnm,gmd->gnd', wgt.astype(jnp.bfloat16), vh,
                     preferred_element_type=jnp.float32)        # (Bt*H, N, dv)
    ctx = jnp.transpose(ctx.reshape(Bt, heads, N, d_v), (0, 2, 1, 3)).reshape(M, Hv)
    att = mm(ctx.astype(jnp.bfloat16), wout_ref, bout_ref)      # (M, D)
    x1 = xf + att

    # ---------------- feed-forward sub-layer ----------------
    h = _layernorm(x1, ln1_w_ref[0], ln1_b_ref[0]).astype(jnp.bfloat16)
    h1 = jnp.maximum(mm(h, wff1_ref, bff1_ref), 0.0).astype(jnp.bfloat16)
    h2 = mm(h1, wff2_ref, bff2_ref)

    out_ref[...] = (x1 + h2).reshape(Bt, N, D)


def unembed_kernel(stream_ref, w_ref, b_ref, out_ref):
    B, N, D = stream_ref.shape
    x = stream_ref[...].reshape(B * N, D).astype(jnp.bfloat16)
    y = jnp.dot(x, w_ref[...], preferred_element_type=jnp.float32) + b_ref[...]
    out_ref[...] = y.reshape(out_ref.shape)


# ----------------------------------------------------------------------------
# pallas_call wrappers
# ----------------------------------------------------------------------------
def _pick_batch_tile(B, N, target_rows=256):
    """Smallest divisor of B whose tile still feeds >= target_rows MXU rows;
    otherwise fold the whole batch (maximise M)."""
    for cand in range(1, B + 1):
        if B % cand == 0 and cand * N >= target_rows:
            return cand
    return B


def run_transformer_stack(stream, mask, kp, *, heads, d_kq, d_v):
    B, N, D = stream.shape
    depth = kp['wqkv'].shape[0]
    FF = kp['wff1'].shape[2]
    Hq = heads * d_kq
    Hv = heads * d_v
    Bt = _pick_batch_tile(B, N)
    nb = B // Bt

    def wspec(shape):
        nd = len(shape)
        # per-layer tile, streamed along the (innermost) depth axis
        return pl.BlockSpec((1,) + tuple(shape),
                            lambda bi, li, nd=nd: (li,) + (0,) * nd)

    in_specs = [
        pl.BlockSpec((Bt, N, D), lambda bi, li: (bi, 0, 0)),    # stream tile (init only)
        pl.BlockSpec((N, N), lambda bi, li: (0, 0)),            # mask, VMEM-resident
        wspec((1, D)), wspec((1, D)),                           # ln0 w/b
        wspec((D, 2 * Hq + Hv)), wspec((1, 2 * Hq + Hv)),       # packed wqkv / bqkv
        wspec((Hv, D)), wspec((1, D)),                          # wout / bout
        wspec((1, D)), wspec((1, D)),                           # ln1 w/b
        wspec((D, FF)), wspec((1, FF)),                         # wff1 / bff1
        wspec((FF, D)), wspec((1, D)),                          # wff2 / bff2
    ]
    # constant in the layer index -> residual stream stays VMEM-resident across depth
    out_spec = pl.BlockSpec((Bt, N, D), lambda bi, li: (bi, 0, 0))

    flops_layer = (2 * B * N * (D * (2 * Hq + Hv) + Hv * D + 2 * D * FF)
                   + 2 * B * heads * N * N * (d_kq + d_v))
    flops = depth * flops_layer
    transcendentals = depth * (B * heads * N * N + 4 * B * N)
    weight_bytes = depth * 2 * (D * (2 * Hq + Hv) + Hv * D + 2 * D * FF)
    bytes_accessed = 2 * 4 * B * N * D + 4 * N * N + weight_bytes

    return pl.pallas_call(
        functools.partial(fused_transformer_kernel,
                          heads=heads, d_kq=d_kq, d_v=d_v),
        out_shape=jax.ShapeDtypeStruct(stream.shape, stream.dtype),
        grid=(nb, depth),
        in_specs=in_specs,
        out_specs=out_spec,
        compiler_params=pltpu.CompilerParams(
            dimension_semantics=("parallel", "arbitrary"),
            vmem_limit_bytes=_VMEM_LIMIT),
        cost_estimate=pl.CostEstimate(flops=int(flops),
                                      transcendentals=int(transcendentals),
                                      bytes_accessed=int(bytes_accessed)),
    )(stream, mask,
      kp['ln0_w'], kp['ln0_b'],
      kp['wqkv'], kp['bqkv'],
      kp['wout'], kp['bout'],
      kp['ln1_w'], kp['ln1_b'],
      kp['wff1'], kp['bff1'],
      kp['wff2'], kp['bff2'])


def run_unembed(stream, w_bf16, b):
    B, N, D = stream.shape
    V = w_bf16.shape[1]
    # Lane-dense vocab tile; the weight streams from HBM exactly once.
    TV = 1024 if (V % 128 == 0 and V > 1024) else V
    grid = (pl.cdiv(V, TV),)

    flops = 2 * B * N * D * V
    bytes_accessed = 4 * B * N * D + 2 * D * V + 4 * V + 4 * B * N * V

    return pl.pallas_call(
        unembed_kernel,
        out_shape=jax.ShapeDtypeStruct((B, N, V), jnp.float32),
        grid=grid,
        in_specs=[
            pl.BlockSpec((B, N, D), lambda vi: (0, 0, 0)),      # whole stream resident
            pl.BlockSpec((D, TV), lambda vi: (0, vi)),          # vocab-tile weight stream
            pl.BlockSpec((1, TV), lambda vi: (0, vi)),
        ],
        out_specs=pl.BlockSpec((B, N, TV), lambda vi: (0, 0, vi)),
        compiler_params=pltpu.CompilerParams(
            dimension_semantics=("parallel",),
            vmem_limit_bytes=_VMEM_LIMIT),
        cost_estimate=pl.CostEstimate(flops=int(flops), transcendentals=0,
                                      bytes_accessed=int(bytes_accessed)),
    )(stream, w_bf16, b)


# ----------------------------------------------------------------------------
# One-time weight preparation (hoisted out of the forward path)
# ----------------------------------------------------------------------------
def prepare_kernel_params(params, *, heads, d_kq, d_v):
    """Stack per-layer weights along a leading depth axis, re-pack QKV so the
    lane layout is [Q_all | K_all | V_all] (128-aligned slices), and cast all
    matmul weights to bf16 once."""
    blocks = params['blocks']
    D = blocks[0]['wqkv'].shape[0]
    Hq = heads * d_kq
    Hv = heads * d_v
    group = 2 * d_kq + d_v
    bf = jnp.bfloat16

    def repack_w(w):
        w3 = w.reshape(D, heads, group)
        return jnp.concatenate([w3[:, :, :d_kq].reshape(D, Hq),
                                w3[:, :, d_kq:2 * d_kq].reshape(D, Hq),
                                w3[:, :, 2 * d_kq:].reshape(D, Hv)], axis=1)

    def repack_b(b):
        b3 = b.reshape(1, heads, group)
        return jnp.concatenate([b3[:, :, :d_kq].reshape(1, Hq),
                                b3[:, :, d_kq:2 * d_kq].reshape(1, Hq),
                                b3[:, :, 2 * d_kq:].reshape(1, Hv)], axis=1)

    stack = lambda name: jnp.stack([blk[name] for blk in blocks])
    return dict(
        embed=params['embed'], pos=params['pos'],
        ln0_w=stack('ln0_w'), ln0_b=stack('ln0_b'),
        wqkv=jnp.stack([repack_w(blk['wqkv']) for blk in blocks]).astype(bf),
        bqkv=jnp.stack([repack_b(blk['bqkv']) for blk in blocks]),
        wout=stack('wout').astype(bf), bout=stack('bout'),
        ln1_w=stack('ln1_w'), ln1_b=stack('ln1_b'),
        wff1=stack('wff1').astype(bf), bff1=stack('bff1'),
        wff2=stack('wff2').astype(bf), bff2=stack('bff2'),
        wun=params['wun'].astype(bf), bun=params['bun'],
    )


# ----------------------------------------------------------------------------
# Model wrapper (glue in plain JAX)
# ----------------------------------------------------------------------------
def token_transformer_forward(x, mask, kp, *, heads, d_kq, d_v):
    """x: (seq, batch) int32; mask: (seq, seq) f32 additive; returns (seq, batch, tokens)."""
    N, B = x.shape
    emb = kp['embed'][x]                                        # (N, B, D) gather (glue)
    stream = emb + kp['pos'][:N, None, :]                       # (N, B, D)
    stream = jnp.transpose(stream, (1, 0, 2)).astype(jnp.float32)   # -> (B, N, D)
    mask = mask.astype(jnp.float32)
    stream = run_transformer_stack(stream, mask, kp,
                                   heads=heads, d_kq=d_kq, d_v=d_v)
    logits = run_unembed(stream, kp['wun'], kp['bun'])          # (B, N, V)
    return jnp.transpose(logits, (1, 0, 2))                     # -> (N, B, tokens)


# ----------------------------------------------------------------------------
# Deterministic parameter construction (mirrors the PyTorch __init__ shapes)
# ----------------------------------------------------------------------------
def generate_fourier_embedding(key, seq_len, size_stream):
    assert size_stream % 2 == 0
    freq = jnp.linspace(1.0, seq_len / 2, size_stream // 2)
    index = jnp.arange(seq_len, dtype=jnp.float32)
    t = freq[None, :] * index[:, None] * 2.0 * jnp.pi / seq_len
    pos = jnp.stack([jnp.sin(t), jnp.cos(t)], axis=2).reshape(seq_len, size_stream)
    pos = pos + jax.random.normal(key, (seq_len, size_stream)) / (size_stream ** 0.5)
    return pos


def init_params(key, *, depth, d, ff, heads, tokens, max_seq_len, padding_idx):
    d_kq = d // heads
    d_v = d // heads
    group = 2 * d_kq + d_v
    keys = jax.random.split(key, 3 + depth)

    embed = jax.random.normal(keys[0], (tokens, d), jnp.float32)
    if padding_idx is not None:
        embed = embed.at[padding_idx].set(0.0)

    pos = generate_fourier_embedding(keys[1], max_seq_len, d).astype(jnp.float32)

    blocks = []
    for li in range(depth):
        bk = jax.random.split(keys[3 + li], 4)
        blocks.append(dict(
            ln0_w=jnp.ones((1, d), jnp.float32),
            ln0_b=jnp.zeros((1, d), jnp.float32),
            wqkv=jax.random.normal(bk[0], (d, heads * group), jnp.float32) / (d ** 0.5),
            bqkv=jnp.zeros((1, heads * group), jnp.float32),
            wout=jax.random.normal(bk[1], (heads * d_v, d), jnp.float32) / ((heads * d_v) ** 0.5),
            bout=jnp.zeros((1, d), jnp.float32),
            ln1_w=jnp.ones((1, d), jnp.float32),
            ln1_b=jnp.zeros((1, d), jnp.float32),
            wff1=jax.random.normal(bk[2], (d, ff), jnp.float32) / (d ** 0.5),
            bff1=jnp.zeros((1, ff), jnp.float32),
            wff2=jax.random.normal(bk[3], (ff, d), jnp.float32) / (ff ** 0.5),
            bff2=jnp.zeros((1, d), jnp.float32),
        ))

    # un_embed: weight scaled by 0.001, bias zeroed (as in the PyTorch __init__)
    wun = 0.001 * jax.random.normal(keys[2], (d, tokens), jnp.float32) / (d ** 0.5)
    bun = jnp.zeros((1, tokens), jnp.float32)

    return dict(embed=embed, pos=pos, blocks=blocks, wun=wun, bun=bun), d_kq, d_v


# ----------------------------------------------------------------------------
# Pure-JAX f32 reference that follows the PyTorch code's (seq, batch, d) layout
# ----------------------------------------------------------------------------
def reference_forward(x, mask, params, *, heads, d_kq, d_v):
    N, B = x.shape
    D = params['embed'].shape[1]
    group = 2 * d_kq + d_v
    stream = params['embed'][x] + params['pos'][:N, None, :]      # (N, B, D)

    def ln(v, w, b):
        mu = jnp.mean(v, axis=-1, keepdims=True)
        var = jnp.mean((v - mu) ** 2, axis=-1, keepdims=True)
        return (v - mu) / jnp.sqrt(var + 1e-5) * w.reshape(-1) + b.reshape(-1)

    for blk in params['blocks']:
        h = ln(stream, blk['ln0_w'], blk['ln0_b'])
        qkv = (h.reshape(N * B, D) @ blk['wqkv'] + blk['bqkv'][0]).reshape(N, B * heads, group)
        q, k, v = qkv[:, :, :d_kq], qkv[:, :, d_kq:2 * d_kq], qkv[:, :, 2 * d_kq:]
        logits = jnp.einsum('nbd,mbd->bnm', q, k) / (d_kq ** 0.5) + mask[None]
        w = jax.nn.softmax(logits, axis=-1)
        vals = jnp.einsum('bnm,mbd->nbd', w, v).reshape(N * B, heads * d_v)
        stream = stream + (vals @ blk['wout'] + blk['bout'][0]).reshape(N, B, D)

        h = ln(stream, blk['ln1_w'], blk['ln1_b'])
        ffo = jnp.maximum(h.reshape(N * B, D) @ blk['wff1'] + blk['bff1'][0], 0.0)
        ffo = ffo @ blk['wff2'] + blk['bff2'][0]
        stream = stream + ffo.reshape(N, B, D)

    logits = stream.reshape(N * B, D) @ params['wun'] + params['bun'][0]
    return logits.reshape(N, B, -1)


# ----------------------------------------------------------------------------
if __name__ == "__main__":
    DEPTH, D, FF, HEADS = 2, 128, 256, 4
    TOKENS, MAX_SEQ = 128, 16
    N, B = 16, 2
    PADDING_IDX = 0

    key = jax.random.PRNGKey(0)
    k_param, k_tok = jax.random.split(key)

    params, d_kq, d_v = init_params(
        k_param, depth=DEPTH, d=D, ff=FF, heads=HEADS,
        tokens=TOKENS, max_seq_len=MAX_SEQ, padding_idx=PADDING_IDX)

    # one-time kernel-ready weight prep (stacked by layer, repacked QKV, bf16)
    kparams = prepare_kernel_params(params, heads=HEADS, d_kq=d_kq, d_v=d_v)

    x = jax.random.randint(k_tok, (N, B), 0, TOKENS, dtype=jnp.int32)
    # additive causal mask (any additive mask works, matching the PyTorch API)
    row = jnp.arange(N)
    mask = jnp.where(row[None, :] <= row[:, None], 0.0, -1e9).astype(jnp.float32)

    out = token_transformer_forward(x, mask, kparams, heads=HEADS, d_kq=d_kq, d_v=d_v)
    out = jax.block_until_ready(out)

    ref = reference_forward(x, mask, params, heads=HEADS, d_kq=d_kq, d_v=d_v)
    ref = jax.block_until_ready(ref)

    assert out.shape == (N, B, TOKENS), out.shape
    # bf16 matmuls (f32 accumulation) + approx softmax reciprocal vs. pure-f32
    # reference -> loosened tolerance.
    np.testing.assert_allclose(np.asarray(out), np.asarray(ref), rtol=5e-2, atol=1e-3)

    print("KERNEL_OK")
</pallas_src>

<mosaic_0001>
module attributes {stable_mosaic.version = 11 : i64} {
  func.func @fused_transformer_kernel(%arg0: i32, %arg1: i32, %arg2: memref<2x16x128xf32, #tpu.memory_space<vmem>>, %arg3: memref<16x16xf32, #tpu.memory_space<vmem>>, %arg4: memref<1x1x128xf32, #tpu.memory_space<vmem>>, %arg5: memref<1x1x128xf32, #tpu.memory_space<vmem>>, %arg6: memref<1x128x384xbf16, #tpu.memory_space<vmem>>, %arg7: memref<1x1x384xf32, #tpu.memory_space<vmem>>, %arg8: memref<1x128x128xbf16, #tpu.memory_space<vmem>>, %arg9: memref<1x1x128xf32, #tpu.memory_space<vmem>>, %arg10: memref<1x1x128xf32, #tpu.memory_space<vmem>>, %arg11: memref<1x1x128xf32, #tpu.memory_space<vmem>>, %arg12: memref<1x128x256xbf16, #tpu.memory_space<vmem>>, %arg13: memref<1x1x256xf32, #tpu.memory_space<vmem>>, %arg14: memref<1x256x128xbf16, #tpu.memory_space<vmem>>, %arg15: memref<1x1x128xf32, #tpu.memory_space<vmem>>, %arg16: memref<2x16x128xf32, #tpu.memory_space<vmem>>) attributes {dimension_semantics = [#tpu.dimension_semantics<parallel>, #tpu.dimension_semantics<arbitrary>], iteration_bounds = array<i64: 1, 2>, scalar_prefetch = 0 : i64, scratch_operands = 0 : i64, tpu.core_type = #tpu.core_type<tc>, window_params = [{transform_indices = @transform_0, window_bounds = array<i64: 2, 16, 128>}, {pipeline_mode = #tpu.pipeline_mode<synchronous>, transform_indices = @transform_1, window_bounds = array<i64: 16, 16>}, {transform_indices = @transform_2, window_bounds = array<i64: 1, 1, 128>}, {transform_indices = @transform_3, window_bounds = array<i64: 1, 1, 128>}, {transform_indices = @transform_4, window_bounds = array<i64: 1, 128, 384>}, {transform_indices = @transform_5, window_bounds = array<i64: 1, 1, 384>}, {transform_indices = @transform_6, window_bounds = array<i64: 1, 128, 128>}, {transform_indices = @transform_7, window_bounds = array<i64: 1, 1, 128>}, {transform_indices = @transform_8, window_bounds = array<i64: 1, 1, 128>}, {transform_indices = @transform_9, window_bounds = array<i64: 1, 1, 128>}, {transform_indices = @transform_10, window_bounds = array<i64: 1, 128, 256>}, {transform_indices = @transform_11, window_bounds = array<i64: 1, 1, 256>}, {transform_indices = @transform_12, window_bounds = array<i64: 1, 256, 128>}, {transform_indices = @transform_13, window_bounds = array<i64: 1, 1, 128>}, {transform_indices = @transform_14, window_bounds = array<i64: 2, 16, 128>}]} {
    %c0_i32 = arith.constant 0 : i32
    %0 = arith.cmpi eq, %arg1, %c0_i32 : i32
    %1 = arith.extui %0 : i1 to i32
    %c0_i32_0 = arith.constant 0 : i32
    %2 = arith.cmpi ne, %1, %c0_i32_0 : i32
    scf.if %2 {
      %c0_63 = arith.constant 0 : index
      %c0_64 = arith.constant 0 : index
      %c0_65 = arith.constant 0 : index
      %132 = vector.load %arg2[%c0_63, %c0_64, %c0_65] : memref<2x16x128xf32, #tpu.memory_space<vmem>>, vector<2x16x128xf32>
      %c0_66 = arith.constant 0 : index
      %c0_67 = arith.constant 0 : index
      %c0_68 = arith.constant 0 : index
      %133 = vector.load %arg16[%c0_66, %c0_67, %c0_68] : memref<2x16x128xf32, #tpu.memory_space<vmem>>, vector<2x16x128xf32>
      tpu.vector_store %arg16[%c0_66, %c0_67, %c0_68], %132 {strides = array<i32>} : memref<2x16x128xf32, #tpu.memory_space<vmem>>, vector<2x16x128xf32>,
    } else {
    }
    %c0 = arith.constant 0 : index
    %c0_1 = arith.constant 0 : index
    %c0_2 = arith.constant 0 : index
    %3 = vector.load %arg16[%c0, %c0_1, %c0_2] : memref<2x16x128xf32, #tpu.memory_space<vmem>>, vector<2x16x128xf32>
    %c0_3 = arith.constant 0 : index
    %c0_4 = arith.constant 0 : index
    %4 = vector.load %arg3[%c0_3, %c0_4] : memref<16x16xf32, #tpu.memory_space<vmem>>, vector<16x16xf32>
    %5 = vector.shape_cast %3 : vector<2x16x128xf32> to vector<32x128xf32>
    %c0_5 = arith.constant 0 : index
    %c0_6 = arith.constant 0 : index
    %c0_7 = arith.constant 0 : index
    %6 = vector.load %arg4[%c0_5, %c0_6, %c0_7] : memref<1x1x128xf32, #tpu.memory_space<vmem>>, vector<1x1x128xf32>
    %7 = vector.shape_cast %6 : vector<1x1x128xf32> to vector<1x128xf32>
    %c0_8 = arith.constant 0 : index
    %c0_9 = arith.constant 0 : index
    %c0_10 = arith.constant 0 : index
    %8 = vector.load %arg5[%c0_8, %c0_9, %c0_10] : memref<1x1x128xf32, #tpu.memory_space<vmem>>, vector<1x1x128xf32>
    %9 = vector.shape_cast %8 : vector<1x1x128xf32> to vector<1x128xf32>
    %cst = arith.constant dense<0.000000e+00> : vector<32xf32>
    %10 = vector.multi_reduction <add>, %5, %cst [1] : vector<32x128xf32> to vector<32xf32>
    %11 = vector.shape_cast %10 : vector<32xf32> to vector<32x1xf32>
    %cst_11 = arith.constant 1.280000e+02 : f32
    %12 = vector.broadcast %cst_11 : f32 to vector<32x1xf32>
    %13 = arith.divf %11, %12 : vector<32x1xf32>
    %14 = vector.broadcast %13 : vector<32x1xf32> to vector<32x128xf32>
    %15 = arith.subf %5, %14 : vector<32x128xf32>
    %16 = arith.mulf %15, %15 : vector<32x128xf32>
    %cst_12 = arith.constant dense<0.000000e+00> : vector<32xf32>
    %17 = vector.multi_reduction <add>, %16, %cst_12 [1] : vector<32x128xf32> to vector<32xf32>
    %18 = vector.shape_cast %17 : vector<32xf32> to vector<32x1xf32>
    %cst_13 = arith.constant 1.280000e+02 : f32
    %19 = vector.broadcast %cst_13 : f32 to vector<32x1xf32>
    %20 = arith.divf %18, %19 : vector<32x1xf32>
    %21 = vector.broadcast %13 : vector<32x1xf32> to vector<32x128xf32>
    %22 = arith.subf %5, %21 : vector<32x128xf32>
    %cst_14 = arith.constant 9.99999974E-6 : f32
    %23 = vector.broadcast %cst_14 : f32 to vector<32x1xf32>
    %24 = arith.addf %20, %23 : vector<32x1xf32>
    %25 = math.rsqrt %24 : vector<32x1xf32>
    %26 = vector.broadcast %25 : vector<32x1xf32> to vector<32x128xf32>
    %27 = arith.mulf %22, %26 : vector<32x128xf32>
    %28 = vector.broadcast %7 : vector<1x128xf32> to vector<32x128xf32>
    %29 = arith.mulf %27, %28 : vector<32x128xf32>
    %30 = vector.broadcast %9 : vector<1x128xf32> to vector<32x128xf32>
    %31 = arith.addf %29, %30 : vector<32x128xf32>
    %32 = arith.truncf %31 : vector<32x128xf32> to vector<32x128xbf16>
    %c0_15 = arith.constant 0 : index
    %c0_16 = arith.constant 0 : index
    %c0_17 = arith.constant 0 : index
    %33 = vector.load %arg6[%c0_15, %c0_16, %c0_17] : memref<1x128x384xbf16, #tpu.memory_space<vmem>>, vector<1x128x384xbf16>
    %34 = vector.shape_cast %33 : vector<1x128x384xbf16> to vector<128x384xbf16>
    %cst_18 = arith.constant dense<0.000000e+00> : vector<32x384xf32>
    %35 = tpu.matmul %32, %34, %cst_18 {dimension_numbers = #tpu.dot_dimension_numbers<[1], [0], [0], [1], [0, 0, 1, 1], [], []>} : vector<32x128xbf16>, vector<128x384xbf16>, vector<32x384xf32> -> vector<32x384xf32>
    %c0_19 = arith.constant 0 : index
    %c0_20 = arith.constant 0 : index
    %c0_21 = arith.constant 0 : index
    %36 = vector.load %arg7[%c0_19, %c0_20, %c0_21] : memref<1x1x384xf32, #tpu.memory_space<vmem>>, vector<1x1x384xf32>
    %37 = vector.shape_cast %36 : vector<1x1x384xf32> to vector<1x384xf32>
    %38 = vector.broadcast %37 : vector<1x384xf32> to vector<32x384xf32>
    %39 = arith.addf %35, %38 : vector<32x384xf32>
    %40 = vector.extract_strided_slice %39 {offsets = [0, 0], sizes = [32, 128], strides = [1, 1]} : vector<32x384xf32> to vector<32x128xf32>
    %41 = vector.extract_strided_slice %39 {offsets = [0, 128], sizes = [32, 128], strides = [1, 1]} : vector<32x384xf32> to vector<32x128xf32>
    %42 = vector.extract_strided_slice %39 {offsets = [0, 256], sizes = [32, 128], strides = [1, 1]} : vector<32x384xf32> to vector<32x128xf32>
    %43 = vector.shape_cast %40 : vector<32x128xf32> to vector<2x16x4x32xf32>
    %44 = tpu.transpose %43, [0, 2, 1, 3] : vector<2x16x4x32xf32> -> vector<2x4x16x32xf32>
    %45 = vector.shape_cast %44 : vector<2x4x16x32xf32> to vector<8x16x32xf32>
    %46 = arith.truncf %45 : vector<8x16x32xf32> to vector<8x16x32xbf16>
    %47 = vector.shape_cast %41 : vector<32x128xf32> to vector<2x16x4x32xf32>
    %48 = tpu.transpose %47, [0, 2, 1, 3] : vector<2x16x4x32xf32> -> vector<2x4x16x32xf32>
    %49 = vector.shape_cast %48 : vector<2x4x16x32xf32> to vector<8x16x32xf32>
    %50 = arith.truncf %49 : vector<8x16x32xf32> to vector<8x16x32xbf16>
    %51 = vector.shape_cast %42 : vector<32x128xf32> to vector<2x16x4x32xf32>
    %52 = tpu.transpose %51, [0, 2, 1, 3] : vector<2x16x4x32xf32> -> vector<2x4x16x32xf32>
    %53 = vector.shape_cast %52 : vector<2x4x16x32xf32> to vector<8x16x32xf32>
    %54 = arith.truncf %53 : vector<8x16x32xf32> to vector<8x16x32xbf16>
    "tpu.trace_start"() <{level = 10 : i32, message = "gnd,gmd->gnm"}> : () -> ()
    %cst_22 = arith.constant dense<0.000000e+00> : vector<8x16x16xf32>
    %55 = tpu.matmul %46, %50, %cst_22 {dimension_numbers = #tpu.dot_dimension_numbers<[2], [2], [1], [1], [0, 0, 0, 1, 1, 1], [0], [0]>} : vector<8x16x32xbf16>, vector<8x16x32xbf16>, vector<8x16x16xf32> -> vector<8x16x16xf32>
    "tpu.trace_stop"() : () -> ()
    %cst_23 = arith.constant 0.176776692 : f32
    %56 = vector.broadcast %cst_23 : f32 to vector<8x16x16xf32>
    %57 = arith.mulf %55, %56 : vector<8x16x16xf32>
    %58 = vector.shape_cast %4 : vector<16x16xf32> to vector<1x16x16xf32>
    %59 = vector.broadcast %58 : vector<1x16x16xf32> to vector<8x16x16xf32>
    %60 = arith.addf %57, %59 : vector<8x16x16xf32>
    %cst_24 = arith.constant dense<0xFF800000> : vector<8x16xf32>
    %61 = vector.multi_reduction <maximumf>, %60, %cst_24 [2] : vector<8x16x16xf32> to vector<8x16xf32>
    %62 = vector.shape_cast %61 : vector<8x16xf32> to vector<8x16x1xf32>
    %63 = vector.broadcast %62 : vector<8x16x1xf32> to vector<8x16x16xf32>
    %64 = arith.subf %60, %63 : vector<8x16x16xf32>
    %65 = math.exp %64 : vector<8x16x16xf32>
    %cst_25 = arith.constant dense<0.000000e+00> : vector<8x16xf32>
    %66 = vector.multi_reduction <add>, %65, %cst_25 [2] : vector<8x16x16xf32> to vector<8x16xf32>
    %67 = vector.shape_cast %66 : vector<8x16xf32> to vector<8x16x1xf32>
    %68 = tpu.reciprocal %67 {approx = true} : vector<8x16x1xf32> -> vector<8x16x1xf32>
    %69 = vector.broadcast %68 : vector<8x16x1xf32> to vector<8x16x16xf32>
    %70 = arith.mulf %65, %69 : vector<8x16x16xf32>
    %71 = arith.truncf %70 : vector<8x16x16xf32> to vector<8x16x16xbf16>
    "tpu.trace_start"() <{level = 10 : i32, message = "gnm,gmd->gnd"}> : () -> ()
    %cst_26 = arith.constant dense<0.000000e+00> : vector<8x16x32xf32>
    %72 = tpu.matmul %71, %54, %cst_26 {dimension_numbers = #tpu.dot_dimension_numbers<[2], [1], [1], [2], [0, 0, 0, 1, 1, 2], [0], [0]>} : vector<8x16x16xbf16>, vector<8x16x32xbf16>, vector<8x16x32xf32> -> vector<8x16x32xf32>
    "tpu.trace_stop"() : () -> ()
    %73 = vector.shape_cast %72 : vector<8x16x32xf32> to vector<2x4x16x32xf32>
    %74 = tpu.transpose %73, [0, 2, 1, 3] : vector<2x4x16x32xf32> -> vector<2x16x4x32xf32>
    %75 = vector.shape_cast %74 : vector<2x16x4x32xf32> to vector<32x128xf32>
    %76 = arith.truncf %75 : vector<32x128xf32> to vector<32x128xbf16>
    %c0_27 = arith.constant 0 : index
    %c0_28 = arith.constant 0 : index
    %c0_29 = arith.constant 0 : index
    %77 = vector.load %arg8[%c0_27, %c0_28, %c0_29] : memref<1x128x128xbf16, #tpu.memory_space<vmem>>, vector<1x128x128xbf16>
    %78 = vector.shape_cast %77 : vector<1x128x128xbf16> to vector<128x128xbf16>
    %cst_30 = arith.constant dense<0.000000e+00> : vector<32x128xf32>
    %79 = tpu.matmul %76, %78, %cst_30 {dimension_numbers = #tpu.dot_dimension_numbers<[1], [0], [0], [1], [0, 0, 1, 1], [], []>} : vector<32x128xbf16>, vector<128x128xbf16>, vector<32x128xf32> -> vector<32x128xf32>
    %c0_31 = arith.constant 0 : index
    %c0_32 = arith.constant 0 : index
    %c0_33 = arith.constant 0 : index
    %80 = vector.load %arg9[%c0_31, %c0_32, %c0_33] : memref<1x1x128xf32, #tpu.memory_space<vmem>>, vector<1x1x128xf32>
    %81 = vector.shape_cast %80 : vector<1x1x128xf32> to vector<1x128xf32>
    %82 = vector.broadcast %81 : vector<1x128xf32> to vector<32x128xf32>
    %83 = arith.addf %79, %82 : vector<32x128xf32>
    %84 = arith.addf %5, %83 : vector<32x128xf32>
    %c0_34 = arith.constant 0 : index
    %c0_35 = arith.constant 0 : index
    %c0_36 = arith.constant 0 : index
    %85 = vector.load %arg10[%c0_34, %c0_35, %c0_36] : memref<1x1x128xf32, #tpu.memory_space<vmem>>, vector<1x1x128xf32>
    %86 = vector.shape_cast %85 : vector<1x1x128xf32> to vector<1x128xf32>
    %c0_37 = arith.constant 0 : index
    %c0_38 = arith.constant 0 : index
    %c0_39 = arith.constant 0 : index
    %87 = vector.load %arg11[%c0_37, %c0_38, %c0_39] : memref<1x1x128xf32, #tpu.memory_space<vmem>>, vector<1x1x128xf32>
    %88 = vector.shape_cast %87 : vector<1x1x128xf32> to vector<1x128xf32>
    %cst_40 = arith.constant dense<0.000000e+00> : vector<32xf32>
    %89 = vector.multi_reduction <add>, %84, %cst_40 [1] : vector<32x128xf32> to vector<32xf32>
    %90 = vector.shape_cast %89 : vector<32xf32> to vector<32x1xf32>
    %cst_41 = arith.constant 1.280000e+02 : f32
    %91 = vector.broadcast %cst_41 : f32 to vector<32x1xf32>
    %92 = arith.divf %90, %91 : vector<32x1xf32>
    %93 = vector.broadcast %92 : vector<32x1xf32> to vector<32x128xf32>
    %94 = arith.subf %84, %93 : vector<32x128xf32>
    %95 = arith.mulf %94, %94 : vector<32x128xf32>
    %cst_42 = arith.constant dense<0.000000e+00> : vector<32xf32>
    %96 = vector.multi_reduction <add>, %95, %cst_42 [1] : vector<32x128xf32> to vector<32xf32>
    %97 = vector.shape_cast %96 : vector<32xf32> to vector<32x1xf32>
    %cst_43 = arith.constant 1.280000e+02 : f32
    %98 = vector.broadcast %cst_43 : f32 to vector<32x1xf32>
    %99 = arith.divf %97, %98 : vector<32x1xf32>
    %100 = vector.broadcast %92 : vector<32x1xf32> to vector<32x128xf32>
    %101 = arith.subf %84, %100 : vector<32x128xf32>
    %cst_44 = arith.constant 9.99999974E-6 : f32
    %102 = vector.broadcast %cst_44 : f32 to vector<32x1xf32>
    %103 = arith.addf %99, %102 : vector<32x1xf32>
    %104 = math.rsqrt %103 : vector<32x1xf32>
    %105 = vector.broadcast %104 : vector<32x1xf32> to vector<32x128xf32>
    %106 = arith.mulf %101, %105 : vector<32x128xf32>
    %107 = vector.broadcast %86 : vector<1x128xf32> to vector<32x128xf32>
    %108 = arith.mulf %106, %107 : vector<32x128xf32>
    %109 = vector.broadcast %88 : vector<1x128xf32> to vector<32x128xf32>
    %110 = arith.addf %108, %109 : vector<32x128xf32>
    %111 = arith.truncf %110 : vector<32x128xf32> to vector<32x128xbf16>
    %c0_45 = arith.constant 0 : index
    %c0_46 = arith.constant 0 : index
    %c0_47 = arith.constant 0 : index
    %112 = vector.load %arg12[%c0_45, %c0_46, %c0_47] : memref<1x128x256xbf16, #tpu.memory_space<vmem>>, vector<1x128x256xbf16>
    %113 = vector.shape_cast %112 : vector<1x128x256xbf16> to vector<128x256xbf16>
    %cst_48 = arith.constant dense<0.000000e+00> : vector<32x256xf32>
    %114 = tpu.matmul %111, %113, %cst_48 {dimension_numbers = #tpu.dot_dimension_numbers<[1], [0], [0], [1], [0, 0, 1, 1], [], []>} : vector<32x128xbf16>, vector<128x256xbf16>, vector<32x256xf32> -> vector<32x256xf32>
    %c0_49 = arith.constant 0 : index
    %c0_50 = arith.constant 0 : index
    %c0_51 = arith.constant 0 : index
    %115 = vector.load %arg13[%c0_49, %c0_50, %c0_51] : memref<1x1x256xf32, #tpu.memory_space<vmem>>, vector<1x1x256xf32>
    %116 = vector.shape_cast %115 : vector<1x1x256xf32> to vector<1x256xf32>
    %117 = vector.broadcast %116 : vector<1x256xf32> to vector<32x256xf32>
    %118 = arith.addf %114, %117 : vector<32x256xf32>
    %cst_52 = arith.constant 0.000000e+00 : f32
    %119 = vector.broadcast %cst_52 : f32 to vector<32x256xf32>
    %120 = arith.maximumf %118, %119 : vector<32x256xf32>
    %121 = arith.truncf %120 : vector<32x256xf32> to vector<32x256xbf16>
    %c0_53 = arith.constant 0 : index
    %c0_54 = arith.constant 0 : index
    %c0_55 = arith.constant 0 : index
    %122 = vector.load %arg14[%c0_53, %c0_54, %c0_55] : memref<1x256x128xbf16, #tpu.memory_space<vmem>>, vector<1x256x128xbf16>
    %123 = vector.shape_cast %122 : vector<1x256x128xbf16> to vector<256x128xbf16>
    %cst_56 = arith.constant dense<0.000000e+00> : vector<32x128xf32>
    %124 = tpu.matmul %121, %123, %cst_56 {dimension_numbers = #tpu.dot_dimension_numbers<[1], [0], [0], [1], [0, 0, 1, 1], [], []>} : vector<32x256xbf16>, vector<256x128xbf16>, vector<32x128xf32> -> vector<32x128xf32>
    %c0_57 = arith.constant 0 : index
    %c0_58 = arith.constant 0 : index
    %c0_59 = arith.constant 0 : index
    %125 = vector.load %arg15[%c0_57, %c0_58, %c0_59] : memref<1x1x128xf32, #tpu.memory_space<vmem>>, vector<1x1x128xf32>
    %126 = vector.shape_cast %125 : vector<1x1x128xf32> to vector<1x128xf32>
    %127 = vector.broadcast %126 : vector<1x128xf32> to vector<32x128xf32>
    %128 = arith.addf %124, %127 : vector<32x128xf32>
    %129 = arith.addf %84, %128 : vector<32x128xf32>
    %130 = vector.shape_cast %129 : vector<32x128xf32> to vector<2x16x128xf32>
    %c0_60 = arith.constant 0 : index
    %c0_61 = arith.constant 0 : index
    %c0_62 = arith.constant 0 : index
    %131 = vector.load %arg16[%c0_60, %c0_61, %c0_62] : memref<2x16x128xf32, #tpu.memory_space<vmem>>, vector<2x16x128xf32>
    tpu.vector_store %arg16[%c0_60, %c0_61, %c0_62], %130 {strides = array<i32>} : memref<2x16x128xf32, #tpu.memory_space<vmem>>, vector<2x16x128xf32>,
    return
  }
  func.func @transform_0(%arg0: i32, %arg1: i32) -> (i32, i32, i32) {
    %c0_i32 = arith.constant 0 : i32
    %c0_i32_0 = arith.constant 0 : i32
    %c0_i32_1 = arith.constant 0 : i32
    return %arg0, %c0_i32, %c0_i32_0 : i32, i32, i32
  }
  func.func @transform_1(%arg0: i32, %arg1: i32) -> (i32, i32) {
    %c0_i32 = arith.constant 0 : i32
    %c0_i32_0 = arith.constant 0 : i32
    %c0_i32_1 = arith.constant 0 : i32
    return %c0_i32, %c0_i32_0 : i32, i32
  }
  func.func @transform_2(%arg0: i32, %arg1: i32) -> (i32, i32, i32) {
    %c0_i32 = arith.constant 0 : i32
    %c0_i32_0 = arith.constant 0 : i32
    %c0_i32_1 = arith.constant 0 : i32
    return %arg1, %c0_i32, %c0_i32_0 : i32, i32, i32
  }
  func.func @transform_3(%arg0: i32, %arg1: i32) -> (i32, i32, i32) {
    %c0_i32 = arith.constant 0 : i32
    %c0_i32_0 = arith.constant 0 : i32
    %c0_i32_1 = arith.constant 0 : i32
    return %arg1, %c0_i32, %c0_i32_0 : i32, i32, i32
  }
  func.func @transform_4(%arg0: i32, %arg1: i32) -> (i32, i32, i32) {
    %c0_i32 = arith.constant 0 : i32
    %c0_i32_0 = arith.constant 0 : i32
    %c0_i32_1 = arith.constant 0 : i32
    return %arg1, %c0_i32, %c0_i32_0 : i32, i32, i32
  }
  func.func @transform_5(%arg0: i32, %arg1: i32) -> (i32, i32, i32) {
    %c0_i32 = arith.constant 0 : i32
    %c0_i32_0 = arith.constant 0 : i32
    %c0_i32_1 = arith.constant 0 : i32
    return %arg1, %c0_i32, %c0_i32_0 : i32, i32, i32
  }
  func.func @transform_6(%arg0: i32, %arg1: i32) -> (i32, i32, i32) {
    %c0_i32 = arith.constant 0 : i32
    %c0_i32_0 = arith.constant 0 : i32
    %c0_i32_1 = arith.constant 0 : i32
    return %arg1, %c0_i32, %c0_i32_0 : i32, i32, i32
  }
  func.func @transform_7(%arg0: i32, %arg1: i32) -> (i32, i32, i32) {
    %c0_i32 = arith.constant 0 : i32
    %c0_i32_0 = arith.constant 0 : i32
    %c0_i32_1 = arith.constant 0 : i32
    return %arg1, %c0_i32, %c0_i32_0 : i32, i32, i32
  }
  func.func @transform_8(%arg0: i32, %arg1: i32) -> (i32, i32, i32) {
    %c0_i32 = arith.constant 0 : i32
    %c0_i32_0 = arith.constant 0 : i32
    %c0_i32_1 = arith.constant 0 : i32
    return %arg1, %c0_i32, %c0_i32_0 : i32, i32, i32
  }
  func.func @transform_9(%arg0: i32, %arg1: i32) -> (i32, i32, i32) {
    %c0_i32 = arith.constant 0 : i32
    %c0_i32_0 = arith.constant 0 : i32
    %c0_i32_1 = arith.constant 0 : i32
    return %arg1, %c0_i32, %c0_i32_0 : i32, i32, i32
  }
  func.func @transform_10(%arg0: i32, %arg1: i32) -> (i32, i32, i32) {
    %c0_i32 = arith.constant 0 : i32
    %c0_i32_0 = arith.constant 0 : i32
    %c0_i32_1 = arith.constant 0 : i32
    return %arg1, %c0_i32, %c0_i32_0 : i32, i32, i32
  }
  func.func @transform_11(%arg0: i32, %arg1: i32) -> (i32, i32, i32) {
    %c0_i32 = arith.constant 0 : i32
    %c0_i32_0 = arith.constant 0 : i32
    %c0_i32_1 = arith.constant 0 : i32
    return %arg1, %c0_i32, %c0_i32_0 : i32, i32, i32
  }
  func.func @transform_12(%arg0: i32, %arg1: i32) -> (i32, i32, i32) {
    %c0_i32 = arith.constant 0 : i32
    %c0_i32_0 = arith.constant 0 : i32
    %c0_i32_1 = arith.constant 0 : i32
    return %arg1, %c0_i32, %c0_i32_0 : i32, i32, i32
  }
  func.func @transform_13(%arg0: i32, %arg1: i32) -> (i32, i32, i32) {
    %c0_i32 = arith.constant 0 : i32
    %c0_i32_0 = arith.constant 0 : i32
    %c0_i32_1 = arith.constant 0 : i32
    return %arg1, %c0_i32, %c0_i32_0 : i32, i32, i32
  }
  func.func @transform_14(%arg0: i32, %arg1: i32) -> (i32, i32, i32) {
    %c0_i32 = arith.constant 0 : i32
    %c0_i32_0 = arith.constant 0 : i32
    %c0_i32_1 = arith.constant 0 : i32
    return %arg0, %c0_i32, %c0_i32_0 : i32, i32, i32
  }
}

</mosaic_0001>

<bundles_post_ra>
// kernel: tpu_custom_call.1
= control target key start
LH: loop header
LB: loop body
LE: loop exit
PB: predicated region body
PF: predicated region fallthrough
CT: control target
= control target key end

     0   :  { %s7869_s0 = inlined_call_operand.hbm [shape: f32[2,16,128], index: 0, kind: input, shape index: {}]   ;;  %s7870_s1 = inlined_call_operand.hbm [shape: f32[16,16], index: 1, kind: input, shape index: {}]   ;;  %s7871_s2 = inlined_call_operand.hbm [shape: f32[2,1,128], index: 2, kind: input, shape index: {}]   ;;  %s7872_s3 = inlined_call_operand.hbm [shape: f32[2,1,128], index: 3, kind: input, shape index: {}]   ;;  %s7873_s4 = inlined_call_operand.hbm [shape: bf16[2,128,384], index: 4, kind: input, shape index: {}]   ;;  %s7874_s5 = inlined_call_operand.vmem [shape: f32[2,1,384], index: 5, kind: input, shape index: {}]   ;;  %s7875_s6 = inlined_call_operand.hbm [shape: bf16[2,128,128], index: 6, kind: input, shape index: {}]   ;;  %s7876_s7 = inlined_call_operand.vmem [shape: f32[2,1,128], index: 7, kind: input, shape index: {}]   ;;  %s7877_s8 = inlined_call_operand.vmem [shape: f32[2,1,128], index: 8, kind: input, shape index: {}]   ;;  %s7878_s9 = inlined_call_operand.vmem [shape: f32[2,1,128], index: 9, kind: input, shape index: {}]   ;;  %s7879_s10 = inlined_call_operand.hbm [shape: bf16[2,128,256], index: 10, kind: input, shape index: {}]   ;;  %s7880_s11 = inlined_call_operand.vmem [shape: f32[2,1,256], index: 11, kind: input, shape index: {}]   ;;  %s7881_s12 = inlined_call_operand.hbm [shape: bf16[2,256,128], index: 12, kind: input, shape index: {}]   ;;  %s7882_s13 = inlined_call_operand.vmem [shape: f32[2,1,128], index: 13, kind: input, shape index: {}]   ;;  %s7883_s14 = inlined_call_operand.hbm [shape: f32[2,16,128], index: 14, kind: output, shape index: {}]  }
   0x1   :  { %7901 = sst [smem:[#allocation24_spill]] %s7869_s0 }
   0x2   :  { %7902 = sst [smem:[#allocation25_spill]] %s7870_s1 }
   0x3   :  { %7903 = sst [smem:[#allocation26_spill]] %s7871_s2 }
   0x4   :  { %7904 = sst [smem:[#allocation27_spill]] %s7872_s3 }
   0x5   :  { %7905 = sst [smem:[#allocation28_spill]] %s7873_s4 }
   0x6   :  { %7906 = sst [smem:[#allocation29_spill]] %s7874_s5 }
   0x7   :  { %7907 = sst [smem:[#allocation30_spill]] %s7875_s6 }
   0x8   :  { %7908 = sst [smem:[#allocation31_spill]] %s7876_s7 }
   0x9   :  { %7909 = sst [smem:[#allocation32_spill]] %s7877_s8 }
   0xa   :  { %7910 = sst [smem:[#allocation33_spill]] %s7878_s9 }
   0xb   :  { %7911 = sst [smem:[#allocation34_spill]] %s7879_s10 }
   0xc   :  { %7912 = sst [smem:[#allocation35_spill]] %s7880_s11 }
   0xd   :  { %7913 = sst [smem:[#allocation36_spill]] %s7881_s12 }
   0xe   :  { %7914 = sst [smem:[#allocation37_spill]] %s7882_s13 }
   0xf   :  { %7915 = sst [smem:[#allocation38_spill]] %s7883_s14 }
  0x10   :  { %19 = vsyncpa [#allocation3], 0 }
  0x11   :  { %20 = vsyncpa [#allocation6], 0 }
  0x12   :  { %21 = vsyncpa [#allocation4], 0  ;;  %s6391_s29 = smov 0   ;;  %s6393_s30 = smov 0  }
  0x13   :  { %s6395_s15 = smov 0   ;;  %s6397_s16 = smov 0  }
  0x14   :  { %s6399_s17 = smov 0   ;;  %s6401_s18 = smov 0  }
  0x15 LB: > { %7916 = sst [smem:[#allocation18_spill]] %s6277_s15  ;;  %s6420_s19 = sadd.s32 4294967295, %s6289_s18   ;;  %s6289_s18 = sphi %s6401_s18, %s27_s18   ;;  %s6285_s17 = sphi %s6399_s17, %s7966_s17   ;;  %s6281_s16 = sphi %s6397_s16, %s7965_s16   ;;  %s6277_s15 = sphi %s6395_s15, %s7964_s15   ;;  %s6273_s30 = sphi %s6393_s30, %s7968_s30   ;;  %s6269_s29 = sphi %s6391_s29, %s7967_s29  }
  0x16   : > { %7917 = sst [smem:[#allocation19_spill]] %s6281_s16  ;;  %p100_p0 = scmp.ne.s32.totalorder %s6277_s15, %s6273_s30 }
  0x17   : > { %7918 = sst [smem:[#allocation20_spill]] %s6285_s17  ;;  %p101_p1 = scmp.eq.s32.totalorder %s6289_s18, 0 }
  0x18   : > { %p106_p2 = scmp.ne.s32.totalorder %s6273_s30, %s6269_s29  ;;  %p7884_p3 = scmp.eq.s32.totalorder %s6420_s19, 0 }
  0x19   : > { %p102_p4 = por %p101_p1, %p100_p0  ;;  %p5296_p5 = scmp.ge.s32.totalorder %s6289_s18, 1 }
  0x1a   : > { %p6431_p6 = por %p7884_p3, %p106_p2  ;;  %p429_p7 = scmp.lt.s32.totalorder %s6289_s18, 3 }
  0x1b   : > { %s6291_s23 = smov [#allocation2]   ;;  %p5717_p10 = scmp.lt.s32.totalorder %s6289_s18, 2 }
  0x1c   : > { %s7919_s21 = scalar_select %p6431_p6, 1, 0 }
  0x1d   : > { %p6436_p8 = pnand %p5296_p5, %p429_p7  ;;  %s445_s24 = sshll.u32 %s6291_s23, 4  ;;  %s446_s24 = int_to_ptr.vmem [resolvable:$true] %s445_s24 }
  0x1e   : > { %7920 = sst [smem:[#allocation21_spill]] %s7919_s21  ;;  %p6449_p12 = pnand %p5717_p10, %p102_p4 }
  0x1f   : > { %s7921_s22 = scalar_select %p6436_p8, 1, 0 }
  0x20   : > { %p5689_p9 = pneg %p6436_p8  ;;  %s36_s27 = sadd.s32 1, %s6285_s17 }
  0x21   : > { %s5994_s28 = scalar_lea.vmem %s446_s24, 512  ;;  %p6002_p5 = scmp.lt.s32.totalorder %s446_s24, %s446_s24 }
  0x22   : > { %p6445_p11 = pnand %p5689_p9, %p7884_p3  ;;  %p5995_p0 = scmp.ne.s32.totalorder %s446_s24, %s5994_s28 }
  0x23   : > { %p6003_p7 = scmp.lt.s32.totalorder %s5994_s28, %s5994_s28 }
  0x24   : > { %p5985_p13 = pneg %p6445_p11 }
  0x25   : > { %p6004_p9 = por %p6003_p7, %p6002_p5 }
  0x26   : > { %p5997_p1 = pnand %p5995_p0, %p5985_p13 }
  0x28   : > { %p5998_p2 = pneg %p5997_p1 }
  0x2a   : > { %p6005_p3 = pnand %p6004_p9, %p5998_p2 }
  0x2c   : > { %6008 = shalt.err (!%p6005_p3)
}
  0x2d   : > { %s7888_s29 = smov 128   ;;  %s7890_s23 = smov 8  }
  0x2e   : > { %s7924_s0 = sld [smem:[#allocation24_spill]]  ;;  %p37_p4 = scmp.ge.s32.totalorder %s36_s27, 2 }
  0x2f   : > { %s472_s28 = sand.u32 1, %s6289_s18   ;;  %s6469_s13 = sand.u32 1, %s6277_s15  }
  0x30   : > { %s7970_s27 = smov (%p37_p4, %s36_s27), 0  ;;  %s5300_s5 = sshll.u32 %s6285_s17, 4 }
  0x31   : > { %7925 = sst [smem:[#allocation22_spill]] %s7970_s27  ;;  %s90_s11 = ssub.s32 %s6285_s17, %s7970_s27 }
  0x32   : > { %p91_p3 = scmp.eq.s32.totalorder %s90_s11, 0  ;;  %s7926_s2 = sld [smem:[#allocation26_spill]] }
  0x33   : > { %s475_s16 = scalar_lea.vmem [#allocation7], %s6469_s13  ;;  %s7927_s14 = sadd.s32 1, %s6277_s15 }
  0x34   : > { %5692 = dma.hbm_to_vmem [thread:$0]  (!%p6445_p11), %s7924_s0, 512, %s446_s24, [#allocation3], %s7888_s29, %s7888_s29, %s7890_s23  }
  0x35   : > { %s482_s21 = sshll.u32 %s475_s16, 4  ;;  %s7929_s3 = sld [smem:[#allocation27_spill]]  ;;  %s483_s21 = int_to_ptr.vmem [resolvable:$true] %s482_s21 }
  0x36   : > { %s6483_s20 = scalar_select %p91_p3, %s6277_s15, %s7927_s14  }
  0x37   : > { %s6490_s0 = scalar_lea.sflag [#allocation3], %s472_s28  ;;  %p6494_p10 = pneg %p6449_p12 }
  0x38   : > { %s480_s7 = scalar_lea.hbm %s7926_s2, %s5300_s5  ;;  %7928 = sst [smem:[#allocation23_spill]] %s6483_s20 }
  0x39   : > { %s6022_s8 = scalar_lea.vmem %s483_s21, 16  ;;  %s6294_s9 = smov [#allocation7]  }
  0x3a   : > { %p6023_p0 = scmp.ne.s32.totalorder %s483_s21, %s6022_s8  ;;  %s6027_s16 = sshll.u32 %s6294_s9, 4  ;;  %s6028_s16 = int_to_ptr.vmem [resolvable:$false] %s6027_s16 }
  0x3b   : > { %s6488_s23 = scalar_lea.hbm %s7929_s3, %s5300_s5  ;;  %s6029_s14 = scalar_lea.vmem %s6028_s16, 32 }
  0x3c   : > { %p6025_p1 = pnand %p6023_p0, %p6494_p10  ;;  %p6030_p5 = scmp.lt.s32.totalorder %s483_s21, %s6028_s16 }
  0x3d   : > { %p6031_p7 = scmp.lt.s32.totalorder %s6029_s14, %s6022_s8 }
  0x3e   : > { %p6026_p2 = pneg %p6025_p1 }
  0x3f   : > { %p6032_p9 = por %p6031_p7, %p6030_p5 }
  0x41   : > { %p6033_p4 = pnand %p6032_p9, %p6026_p2 }
  0x43   : > { %6036 = shalt.err (!%p6033_p4)
}
  0x44   : > { %5699 = dma.hbm_to_vmem [thread:$0]  (!%p6449_p12), %s480_s7, 16, %s483_s21, %s6490_s0  }
  0x45   : > { %s492_s5 = scalar_lea.vmem [#allocation8], %s6469_s13  ;;  %s5661_s28 = smul.u32 192, %s6469_s13 }
  0x46   : > { %s499_s29 = sshll.u32 %s492_s5, 4  ;;  %s5662_s24 = smul.u32 3072, %s6285_s17  ;;  %s500_s29 = int_to_ptr.vmem [resolvable:$true] %s499_s29 }
  0x47   : > { %s6050_s9 = scalar_lea.vmem %s500_s29, 16  ;;  %s6295_s8 = smov [#allocation8]  }
  0x48   : > { %p6051_p3 = scmp.ne.s32.totalorder %s500_s29, %s6050_s9  ;;  %s6055_s16 = sshll.u32 %s6295_s8, 4  ;;  %s6056_s16 = int_to_ptr.vmem [resolvable:$false] %s6055_s16 }
  0x49   : > { %s6057_s14 = scalar_lea.vmem %s6056_s16, 32  ;;  %p6058_p2 = scmp.lt.s32.totalorder %s500_s29, %s6056_s16 }
  0x4a   : > { %p6053_p0 = pnand %p6051_p3, %p6494_p10  ;;  %p6059_p5 = scmp.lt.s32.totalorder %s6057_s14, %s6050_s9 }
  0x4c   : > { %p6054_p1 = pneg %p6053_p0  ;;  %p6060_p7 = por %p6059_p5, %p6058_p2 }
  0x4e   : > { %p6061_p9 = pnand %p6060_p7, %p6054_p1 }
  0x50   : > { %6064 = shalt.err (!%p6061_p9)
}
  0x51   : > { %5702 = dma.hbm_to_vmem [thread:$0]  (!%p6449_p12), %s6488_s23, 16, %s500_s29, %s6490_s0  }
  0x52   : > { %s7931_s4 = sld [smem:[#allocation28_spill]]  ;;  %s510_s2 = scalar_lea.vmem [#allocation9], %s5661_s28 }
  0x53   : > { %s517_s3 = sshll.u32 %s510_s2, 4  ;;  %s6296_s9 = smov [#allocation9]   ;;  %s518_s3 = int_to_ptr.vmem [resolvable:$true] %s517_s3 }
  0x54   : > { %s6078_s8 = scalar_lea.vmem %s518_s3, 3072  ;;  %s6083_s16 = sshll.u32 %s6296_s9, 4  ;;  %s6084_s16 = int_to_ptr.vmem [resolvable:$false] %s6083_s16 }
  0x55   : > { %p6079_p4 = scmp.ne.s32.totalorder %s518_s3, %s6078_s8  ;;  %s6085_s14 = scalar_lea.vmem %s6084_s16, 6144 }
  0x56   : > { %p6086_p1 = scmp.lt.s32.totalorder %s518_s3, %s6084_s16  ;;  %p6087_p2 = scmp.lt.s32.totalorder %s6085_s14, %s6078_s8 }
  0x57   : > { %p6081_p3 = pnand %p6079_p4, %p6494_p10 }
  0x58   : > { %s516_s5 = scalar_lea.hbm %s7931_s4, %s5662_s24  ;;  %p6088_p5 = por %p6087_p2, %p6086_p1 }
  0x59   : > { %p6082_p0 = pneg %p6081_p3 }
  0x5b   : > { %p6089_p7 = pnand %p6088_p5, %p6082_p0 }
  0x5d   : > { %6092 = shalt.err (!%p6089_p7)
}
  0x5e   : > { %s6297_s23 = smov 192   ;;  %s6298_s2 = smov 12  }
  0x5f   : > { %5705 = dma.hbm_to_vmem [thread:$0]  (!%p6449_p12), %s516_s5, 3072, %s518_s3, %s6490_s0, %s6297_s23, %s6297_s23, %s6298_s2  }
  0x60   : > { %s5303_s29 = sshll.u32 %s6469_s13, 6  ;;  %s5442_s28 = sshll.u32 %s6285_s17, 10 }
  0x61   : > { %s7932_s6 = sld [smem:[#allocation30_spill]]  ;;  %s538_s9 = scalar_lea.vmem [#allocation10], %s5303_s29 }
  0x62   : > { %s545_s8 = sshll.u32 %s538_s9, 4  ;;  %s6299_s14 = smov [#allocation10]   ;;  %s546_s8 = int_to_ptr.vmem [resolvable:$true] %s545_s8 }
  0x63   : > { %s6106_s16 = scalar_lea.vmem %s546_s8, 1024  ;;  %s6111_s4 = sshll.u32 %s6299_s14, 4  ;;  %s6112_s4 = int_to_ptr.vmem [resolvable:$false] %s6111_s4 }
  0x64   : > { %p6107_p9 = scmp.ne.s32.totalorder %s546_s8, %s6106_s16  ;;  %s6113_s27 = scalar_lea.vmem %s6112_s4, 2048 }
  0x65   : > { %p6114_p0 = scmp.lt.s32.totalorder %s546_s8, %s6112_s4  ;;  %p6115_p1 = scmp.lt.s32.totalorder %s6113_s27, %s6106_s16 }
  0x66   : > { %p6109_p4 = pnand %p6107_p9, %p6494_p10 }
  0x67   : > { %s544_s21 = scalar_lea.hbm %s7932_s6, %s5442_s28  ;;  %p6116_p2 = por %p6115_p1, %p6114_p0 }
  0x68   : > { %p6110_p3 = pneg %p6109_p4 }
  0x6a   : > { %p6117_p5 = pnand %p6116_p2, %p6110_p3 }
  0x6c   : > { %6120 = shalt.err (!%p6117_p5)
}
  0x6d   : > { %s6300_s3 = smov 64   ;;  %s6301_s5 = smov 4  }
  0x6e   : > { %5708 = dma.hbm_to_vmem [thread:$0]  (!%p6449_p12), %s544_s21, 1024, %s546_s8, %s6490_s0, %s6300_s3, %s6300_s3, %s6301_s5  }
  0x6f   : > { %s5306_s23 = sshll.u32 %s6469_s13, 7  ;;  %s5443_s4 = sshll.u32 %s6285_s17, 11 }
  0x70   : > { %s7933_s10 = sld [smem:[#allocation34_spill]]  ;;  %s577_s28 = scalar_lea.vmem [#allocation11], %s5306_s23 }
  0x71   : > { %s584_s24 = sshll.u32 %s577_s28, 4  ;;  %s6302_s7 = smov [#allocation5]   ;;  %s585_s24 = int_to_ptr.vmem [resolvable:$true] %s584_s24 }
  0x72   : > { %s458_s9 = sshll.u32 %s6302_s7, 4  ;;  %s6134_s16 = scalar_lea.vmem %s585_s24, 2048  ;;  %s459_s9 = int_to_ptr.vmem [resolvable:$true] %s458_s9 }
  0x73   : > { %p6135_p7 = scmp.ne.s32.totalorder %s585_s24, %s6134_s16  ;;  %s6303_s14 = smov [#allocation11]  }
  0x74   : > { %s6139_s21 = sshll.u32 %s6303_s14, 4  ;;  %s6140_s21 = int_to_ptr.vmem [resolvable:$false] %s6139_s21 }
  0x75   : > { %p6137_p9 = pnand %p6135_p7, %p6494_p10  ;;  %s6141_s8 = scalar_lea.vmem %s6140_s21, 4096 }
  0x76   : > { %s583_s29 = scalar_lea.hbm %s7933_s10, %s5443_s4  ;;  %p6142_p3 = scmp.lt.s32.totalorder %s585_s24, %s6140_s21 }
  0x77   : > { %p6138_p4 = pneg %p6137_p9  ;;  %p6143_p0 = scmp.lt.s32.totalorder %s6141_s8, %s6134_s16 }
  0x79   : > { %p6144_p1 = por %p6143_p0, %p6142_p3 }
  0x7b   : > { %p6145_p2 = pnand %p6144_p1, %p6138_p4 }
  0x7d   : > { %6148 = shalt.err (!%p6145_p2)
}
  0x7e   : > { %s7934_s27 = smov 8   ;;  %s7935_s2 = smov 128  }
  0x7f   : > { %5711 = dma.hbm_to_vmem [thread:$0]  (!%p6449_p12), %s583_s29, 2048, %s585_s24, %s6490_s0, %s7935_s2, %s7935_s2, %s7934_s27  }
  0x80   : > { %s6160_s28 = scalar_lea.vmem %s459_s9, 256  ;;  %p6168_p6 = scmp.lt.s32.totalorder %s459_s9, %s459_s9 }
  0x81   : > { %p6161_p5 = scmp.ne.s32.totalorder %s459_s9, %s6160_s28  ;;  %p6169_p8 = scmp.lt.s32.totalorder %s6160_s28, %s6160_s28 }
  0x83   : > { %p6163_p7 = pnand %p6161_p5, %p5985_p13  ;;  %p6170_p3 = por %p6169_p8, %p6168_p6 }
  0x85   : > { %p6164_p9 = pneg %p6163_p7 }
  0x87   : > { %p6171_p4 = pnand %p6170_p3, %p6164_p9 }
  0x89   : > { %6174 = shalt.err (!%p6171_p4)
}
  0x8a   : > { %s7936_s1 = sld [smem:[#allocation25_spill]]  ;;  %s605_s21 = scalar_lea.vmem [#allocation12], %s5306_s23 }
  0x8b   : > { %s7937_s12 = sld [smem:[#allocation36_spill]]  ;;  %s612_s8 = sshll.u32 %s605_s21, 4  ;;  %s613_s8 = int_to_ptr.vmem [resolvable:$true] %s612_s8 }
  0x8c   : > { %s6188_s25 = scalar_lea.vmem %s613_s8, 2048  ;;  %s6304_s28 = smov [#allocation12]  }
  0x8d   : > { %p6189_p6 = scmp.ne.s32.totalorder %s613_s8, %s6188_s25  ;;  %s6193_s7 = sshll.u32 %s6304_s28, 4  ;;  %s6194_s7 = int_to_ptr.vmem [resolvable:$false] %s6193_s7 }
  0x8e   : > { %s6195_s16 = scalar_lea.vmem %s6194_s7, 4096  ;;  %p6196_p0 = scmp.lt.s32.totalorder %s613_s8, %s6194_s7 }
  0x8f   : > { %p6191_p8 = pnand %p6189_p6, %p6494_p10 }
  0x90   : > { %5695 = dma.hbm_to_vmem [thread:$0]  (!%p6445_p11), %s7936_s1, 256, %s459_s9, [#allocation6], %s7935_s2, %s7935_s2, %s7934_s27  }
  0x91   : > { %s611_s14 = scalar_lea.hbm %s7937_s12, %s5443_s4  ;;  %p6192_p13 = pneg %p6191_p8 }
  0x92   : > { %p6197_p11 = scmp.lt.s32.totalorder %s6195_s16, %s6188_s25 }
  0x94   : > { %p6198_p1 = por %p6197_p11, %p6196_p0 }
  0x96   : > { %p6199_p2 = pnand %p6198_p1, %p6192_p13 }
  0x98   : > { %6202 = shalt.err (!%p6199_p2)
}
  0x99   : > { %5714 = dma.hbm_to_vmem [thread:$0]  (!%p6449_p12), %s611_s14, 2048, %s613_s8, %s6490_s0, %s6300_s3, %s6300_s3, %s6301_s5  }
  0x9a   : > { %p7938_p5 = scmp.ne.s32.totalorder %s7921_s22, 0 }
  0x9b   : > { %p7939_p10 = scmp.eq.s32.totalorder (!%p7938_p5), %s6420_s19, 0 }
  0x9c   : > { %630 = sbr.rel (%p7938_p5) target bundleno = 2850 (0xb22), region = 76 }
  0xa1   : > { %6252 = dma.done.wait (%p7939_p10), [#allocation3], 512   ;;  %p7940_p7 = pmov %p7939_p10 }
  0xa3   : > { %6254 = vsyncadd (%p7940_p7), [#allocation3], 4294966784  ;;  %p7941_p9 = pmov %p7940_p7 }
  0xa4   : > { %p7942_p3 = pmov %p7940_p7 }
  0xa5   : > { %6256 = dma.done.wait (%p7941_p9), [#allocation6], 256  }
  0xa6   : > { %6258 = vsyncadd (%p7942_p3), [#allocation6], 4294967040  ;;  %s7943_s13 = sld [smem:[#allocation21_spill]]  ;;  %s640_s26 = sand.u32 1, %s6420_s19  }
  0xa7   : > { %s6588_s0 = sand.u32 1, %s6273_s30   ;;  %s641_s22 = scalar_lea.sflag [#allocation3], %s640_s26 }
  0xac   : > { %p7944_p12 = scmp.ne.s32.totalorder %s7943_s13, 0 }
  0xae   : > { %6260 = dma.done.wait (%p7944_p12), %s641_s22, 8224  }
  0xaf   : > { %6262 = vsyncadd (%p7944_p12), %s641_s22, 4294959072  ;;  %s7945_s3 = sld [smem:[#allocation19_spill]]  ;;  %s5663_s5 = smul.u32 192, %s6588_s0 }
  0xb0   : > { %s5315_s23 = sshll.u32 %s6588_s0, 6  ;;  %s5316_s4 = sshll.u32 %s6588_s0, 7 }
  0xb1   : > { %s7946_s24 = sld [smem:[#allocation31_spill]]  ;;  %s651_s8 = scalar_lea.vmem [#allocation8], %s6588_s0 }
  0xb2   : > { %s7947_s25 = sld [smem:[#allocation32_spill]]  ;;  %s6633_s7 = scalar_lea.vmem [#allocation10], %s5315_s23 }
  0xb3   : > { %s7948_s13 = sld [smem:[#allocation33_spill]]  ;;  %s6635_s16 = scalar_lea.vmem [#allocation11], %s5316_s4 }
  0xb4   : > { %s7949_s1 = sld [smem:[#allocation29_spill]]  ;;  %s6637_s11 = scalar_lea.vmem [#allocation12], %s5316_s4 }
  0xb5   : > { %p771_p4 = scmp.lt.s32.totalorder %s7945_s3, 1  ;;  %s7950_s20 = sld [smem:[#allocation35_spill]] }
  0xb6   : > { %p5319_p6 = scmp.ne.s32.totalorder %s7945_s3, 0 }
  0xb7   : > { %s6600_s9 = scalar_select %p771_p4, %s7945_s3, 1 }
  0xb9   : > { %s5664_s27 = smul.u32 3, %s6600_s9  ;;  %s777_s14 = scalar_lea.vmem %s7946_s24, %s6600_s9 }
  0xba   : > { %s780_s28 = scalar_lea.vmem %s7947_s25, %s6600_s9  ;;  %s783_s26 = scalar_lea.vmem %s7948_s13, %s6600_s9 }
  0xbb   : > { %s6618_s6 = scalar_lea.vmem %s7949_s1, %s5664_s27  ;;  %s5318_s10 = sshll.u32 %s6600_s9, 1 }
  0xbc   : > { %s6624_s15 = scalar_lea.vmem %s7950_s20, %s5318_s10  ;;  %s7951_s24 = sld [smem:[#allocation37_spill]] }
  0xbd   : > { %s6631_s25 = scalar_lea.vmem [#allocation9], %s5663_s5 }
  0xbe   : > { %796 = sbr.rel (%p5319_p6) target bundleno = 198 (0xc6), region = 112 }
  0xc2   : > { %s790_s21 = scalar_lea.vmem %s7951_s24, %s6600_s9 }
  0xc3   : > { %v797_v0 = vld [vmem:[#allocation2] sm:$0xff]  ;;  %v798_v1 = vld [vmem:[#allocation2 + $0x8] sm:$0xff]  ;;  %v799_v2 = vld [vmem:[#allocation2 + $0x10] sm:$0xff] }
  0xc4   : > { %801 = vst [vmem:[#allocation13] sm:$0xff] %v797_v0  ;;  %802 = vst [vmem:[#allocation13 + $0x8] sm:$0xff] %v798_v1  ;;  %v800_v3 = vld [vmem:[#allocation2 + $0x18] sm:$0xff] }
  0xc5   : > { %803 = vst [vmem:[#allocation13 + $0x10] sm:$0xff] %v799_v2  ;;  %804 = vst [vmem:[#allocation13 + $0x18] sm:$0xff] %v800_v3 }
  0xc6 PF: > { %v5819_v8 = vld [vmem:[%s6631_s25 + $0xac] ss:$12 sps:$4 sm:$0xff]   ;;  %v5821_v9 = vld [vmem:[%s6631_s25 + $0xa8] ss:$12 sps:$4 sm:$0xff]   ;;  %v5824_v27 = vld [vmem:[%s6631_s25 + $0xb0] ss:$12 sps:$4 sm:$0xff]  }
  0xc7   : > { %1057 = vmatprep.subr.bf16.mxu0 %v5819_v8  ;;  %v5822_v26 = vld [vmem:[%s6631_s25 + $0x94] ss:$12 sps:$4 sm:$0xff]   ;;  %v5825_v28 = vld [vmem:[%s6631_s25 + $0x90] ss:$12 sps:$4 sm:$0xff]   ;;  %5525 = vmatprep.subr.bf16.mxu1 %v5824_v27  ;;  %v5828_v30 = vld [vmem:[%s6631_s25 + $0x98] ss:$12 sps:$4 sm:$0xff]  }
  0xc8   : > { %1058 = vmatpush1.bf16.msra.mxu0 %v5821_v9  ;;  %5526 = vmatpush3.bf16.msra.mxu1 %v5824_v27  ;;  %v5826_v29 = vld [vmem:[%s6631_s25 + $0x7c] ss:$12 sps:$4 sm:$0xff]   ;;  %v5829_v31 = vld [vmem:[%s6631_s25 + $0x78] ss:$12 sps:$4 sm:$0xff]   ;;  %v5832_v33 = vld [vmem:[%s6631_s25 + $0x80] ss:$12 sps:$4 sm:$0xff]  }
  0xc9   : > { %1059 = vmatprep.subr.bf16.mxu0 %v5822_v26  ;;  %5527 = vmatprep.subr.bf16.mxu1 %v5828_v30  ;;  %v5830_v32 = vld [vmem:[%s6631_s25 + $0x64] ss:$12 sps:$4 sm:$0xff]   ;;  %v5833_v34 = vld [vmem:[%s6631_s25 + $0x60] ss:$12 sps:$4 sm:$0xff]   ;;  %v5836_v36 = vld [vmem:[%s6631_s25 + $0x68] ss:$12 sps:$4 sm:$0xff]  }
  0xca   : > { %v5834_v35 = vld [vmem:[%s6631_s25 + $0x4c] ss:$12 sps:$4 sm:$0xff]   ;;  %v5837_v37 = vld [vmem:[%s6631_s25 + $0x48] ss:$12 sps:$4 sm:$0xff]   ;;  %v5840_v39 = vld [vmem:[%s6631_s25 + $0x50] ss:$12 sps:$4 sm:$0xff]  }
  0xcb   : > { %v805_v4 = vld [vmem:[#allocation13] sm:$0xff]  ;;  %v806_v6 = vld [vmem:[#allocation13 + $0x8] sm:$0xff]  ;;  %v5841_v40 = vld [vmem:[%s6631_s25 + $0x30] ss:$12 sps:$4 sm:$0xff]   ;;  %v7899_v43 = vmov 0   ;;  %s7952_s1 = scalar_lea.vmem [#allocation7], %s6588_s0 }
  0xcc   : > { %v807_v5 = vld [vmem:[#allocation13 + $0x10] sm:$0xff]  ;;  %813 = vadd.xlane.f32.xlu0 %v805_v4  ;;  %v808_v7 = vld [vmem:[#allocation13 + $0x18] sm:$0xff]  ;;  %1060 = vmatpush1.bf16.msra.mxu0 %v5825_v28  ;;  %v5848_v46 = vld [vmem:[%s6631_s25 + $0x20] ss:$12 sps:$4 sm:$0xff]   ;;  %s6306_s10 = smov 96   ;;  %s6308_s12 = smov 32  }
  0xcd   : > { %817 = vadd.xlane.f32.xlu1 %v807_v5  ;;  %1061 = vmatprep.subr.bf16.mxu0 %v5826_v29  ;;  %v5838_v38 = vld [vmem:[%s6631_s25 + $0x34] ss:$12 sps:$4 sm:$0xff]   ;;  %v5842_v41 = vld [vmem:[%s6631_s25 + $0x1c] ss:$12 sps:$4 sm:$0xff]   ;;  %v5844_v42 = vld [vmem:[%s6631_s25 + $0x38] ss:$12 sps:$4 sm:$0xff]  }
  0xce   : > { %5528 = vmatpush3.bf16.msra.mxu1 %v5828_v30  ;;  %1089 = vmatprep.mubr.bf16.mxu0 %v7899_v43  ;;  %v5845_v44 = vld [vmem:[%s6631_s25 + $0x18] ss:$12 sps:$4 sm:$0xff]   ;;  %v5849_v47 = vld [vmem:[%s6631_s25] ss:$12 sps:$4 sm:$0xff]   ;;  %v5850_v48 = vld [vmem:[%s6631_s25 + $0x8] ss:$12 sps:$4 sm:$0xff]  }
  0xcf   : > { %5529 = vmatprep.subr.bf16.mxu1 %v5832_v33  ;;  %v5846_v45 = vld [vmem:[%s6631_s25 + $0x4] ss:$12 sps:$4 sm:$0xff]   ;;  %v5320_v63 = vld [vmem:[%s7952_s1] ss:$0 sm:$0xff]  ;;  %vm6310_vm0 = vmmov 0   ;;  %vm2935_vm1 = vcmask 261120  }
  0xd0   : > { %815 = vadd.xlane.f32.xlu0 %v806_v6  ;;  %1062 = vmatpush1.bf16.msra.mxu0 %v5829_v31  ;;  %vm3344_vm2 = vcmask 130048   ;;  %vm4477_vm3 = vcmask 523264   ;;  %vm4482_vm4 = vcmask 785408   ;;  %s6313_s9 = smov [#allocation13]   ;;  %p5720_p8 = scmp.eq.s32.totalorder %s6420_s19, 1 }
  0xd1   : > { %819 = vadd.xlane.f32.xlu1 %v808_v7  ;;  %1063 = vmatprep.subr.bf16.mxu0 %v5830_v32 }
  0xd2   : > { %5530 = vmatpush3.bf16.msra.mxu1 %v5832_v33 }
  0xd3   : > { %5531 = vmatprep.subr.bf16.mxu1 %v5836_v36 }
  0xd4   : > { %1064 = vmatpush1.bf16.msra.mxu0 %v5833_v34 }
  0xd5   : > { %1065 = vmatprep.subr.bf16.mxu0 %v5834_v35 }
  0xd6   : > { %5532 = vmatpush3.bf16.msra.mxu1 %v5836_v36 }
  0xd7   : > { %5533 = vmatprep.subr.bf16.mxu1 %v5840_v39 }
  0xd8   : > { %1066 = vmatpush1.bf16.msra.mxu0 %v5837_v37 }
  0xd9   : > { %1067 = vmatprep.subr.bf16.mxu0 %v5838_v38 }
  0xda   : > { %5534 = vmatpush3.bf16.msra.mxu1 %v5840_v39 }
  0xdb   : > { %5535 = vmatprep.subr.bf16.mxu1 %v5844_v42 }
  0xdc   : > { %1068 = vmatpush1.bf16.msra.mxu0 %v5841_v40 }
  0xdd   : > { %1069 = vmatprep.subr.bf16.mxu0 %v5842_v41 }
  0xde   : > { %5536 = vmatpush3.bf16.msra.mxu1 %v5844_v42 }
  0xdf   : > { %5537 = vmatprep.subr.bf16.mxu1 %v5848_v46 }
  0xe0   : > { %1070 = vmatpush1.bf16.msra.mxu0 %v5845_v44 }
  0xe1   : > { %1071 = vmatprep.subr.bf16.mxu0 %v5846_v45 }
  0xe2   : > { %5538 = vmatpush3.bf16.msra.mxu1 %v5848_v46 }
  0xe3   : > { %5539 = vmatprep.subr.bf16.mxu1 %v5850_v48 }
  0xe4   : > { %1072 = vmatpush1.bf16.msra.mxu0 %v5849_v47 }
  0xe6   : > { %5540 = vmatpush3.bf16.msra.mxu1 %v5850_v48  ;;  %v6309_v48 = vmov 0.0  }
  0xe7   : > { %5545 = vmatprep.subr.bf16.mxu0 %v6309_v48  ;;  %5557 = vmatprep.subr.bf16.mxu1 %v6309_v48 }
 0x155   : > { %v814_v10 = vpop.xlane.xlu0 %813 }
 0x156   : > { %v818_v11 = vpop.xlane.xlu1 %817  ;;  %v822_v12 = vmul.f32 0.0078125, %v814_v10 }
 0x157   : > { %v824_v13 = vmul.f32 0.0078125, %v818_v11 }
 0x158   : > { %v6642_v14 = vsub.f32 %v805_v4, %v822_v12  ;;  %v5321_v4 = vld [vmem:[%s651_s8] ss:$0 sm:$0xff] }
 0x159   : > { %v6644_v15 = vsub.f32 %v807_v5, %v824_v13  ;;  %v816_v16 = vpop.xlane.xlu0 %815 }
 0x15a   : > { %v820_v17 = vpop.xlane.xlu1 %819  ;;  %v823_v18 = vmul.f32 0.0078125, %v816_v16  ;;  %v830_v19 = vmul.f32 %v6642_v14, %v6642_v14 }
 0x15b   : > { %v825_v20 = vmul.f32 0.0078125, %v820_v17  ;;  %v832_v23 = vmul.f32 %v6644_v15, %v6644_v15 }
 0x15c   : > { %v6648_v21 = vsub.f32 %v806_v6, %v823_v18  ;;  %834 = vadd.xlane.f32.xlu0 %v830_v19 }
 0x15d   : > { %v6650_v22 = vsub.f32 %v808_v7, %v825_v20  ;;  %v912_v20 = vld [vmem:[%s6618_s6] sm:$0x7]  ;;  %s6307_s6 = smov 64  }
 0x15e   : > { %v831_v24 = vmul.f32 %v6648_v21, %v6648_v21 }
 0x15f   : > { %v833_v25 = vmul.f32 %v6650_v22, %v6650_v22 }
 0x160   : > { %838 = vadd.xlane.f32.xlu0 %v832_v23  ;;  %836 = vadd.xlane.f32.xlu1 %v831_v24 }
 0x164   : > { %840 = vadd.xlane.f32.xlu1 %v833_v25 }
 0x1e5   : > { %v835_v49 = vpop.xlane.xlu0 %834 }
 0x1e6   : > { %v842_v50 = vmul.f32 0.0078125, %v835_v49 }
 0x1e8   : > { %v846_v51 = vadd.f32 1e-05, %v842_v50 }
 0x1e9   : > { %v837_v52 = vpop.xlane.xlu1 %836  ;;  %v839_v53 = vpop.xlane.xlu0 %838 }
 0x1ea   : > { %5899 = vrsqrt.f32 %v846_v51  ;;  %v843_v54 = vmul.f32 0.0078125, %v837_v52  ;;  %v844_v55 = vmul.f32 0.0078125, %v839_v53  ;;  %v6311_v52 = vmov 1983009808  }
 0x1eb   : > { %v1202_v53 = vunpack.c.l.s4 %v6311_v52 }
 0x1ec   : > { %v847_v56 = vadd.f32 1e-05, %v843_v54  ;;  %v848_v57 = vadd.f32 1e-05, %v844_v55  ;;  %v6312_v55 = vmov 1934713408  }
 0x1ed   : > { %v841_v58 = vpop.xlane.xlu1 %840 }
 0x1ee   : > { %5901 = vrsqrt.f32 %v847_v56  ;;  %v845_v59 = vmul.f32 0.0078125, %v841_v58  ;;  %v1234_v56 = vunpack.c.l.s4 %v6312_v55  ;;  %v1203_v58 = vunpack.c.0.s8 %v1202_v53 }
 0x1ef   : > { %5903 = vrsqrt.f32 %v848_v57 }
 0x1f0   : > { %v849_v60 = vadd.f32 1e-05, %v845_v59 }
 0x1f2   : > { %5905 = vrsqrt.f32 %v849_v60  ;;  %v1235_v60 = vunpack.c.0.s8 %v1234_v56 }
 0x1f7   : > { %v5900_v61 = vpop.eup %5899 }
 0x1f8   : > { %v854_v62 = vmul.f32 %v5900_v61, %v6642_v14 }
 0x1fa   : > { %v864_v3 = vmul.f32 %v5320_v63, %v854_v62 }
 0x1fb   : > { %v5902_v0 = vpop.eup %5901 }
 0x1fc   : > { %v5904_v1 = vpop.eup %5903  ;;  %v855_v2 = vmul.f32 %v5902_v0, %v6648_v21  ;;  %v874_v8 = vadd.f32 %v5321_v4, %v864_v3 }
 0x1fd   : > { %v856_v5 = vmul.f32 %v5904_v1, %v6644_v15  ;;  %v914_v15 = vlaneseq }
 0x1fe   : > { %v865_v6 = vmul.f32 %v5320_v63, %v855_v2 }
 0x1ff   : > { %v5906_v7 = vpop.eup %5905  ;;  %v866_v11 = vmul.f32 %v5320_v63, %v856_v5  ;;  %v6690_v18 = vshrl.u32 %v914_v15, 7 }
 0x200   : > { %v875_v9 = vadd.f32 %v5321_v4, %v865_v6  ;;  %v857_v10 = vmul.f32 %v5906_v7, %v6650_v22 }
 0x201   : > { %v876_v14 = vadd.f32 %v5321_v4, %v866_v11  ;;  %v7897_v19 = vsub.s32 0, %v6690_v18  ;;  %v7898_v21 = vsub.s32 1, %v6690_v18  ;;  %v924_v23 = vsub.s32 2, %v6690_v18 }
 0x202   : > { %v878_v12 = vpack.c.bf16 %v875_v9, %v874_v8  ;;  %v867_v13 = vmul.f32 %v5320_v63, %v857_v10  ;;  %v6793_v62 = vsub.s32 %v1203_v58, %v6690_v18 }
 0x203   : > { %v917_v22 = vrot.slane %v912_v20, %v7897_v19  ;;  %v921_v24 = vrot.slane %v912_v20, %v7898_v21  ;;  %v925_v27 = vrot.slane %v912_v20, %v924_v23 }
 0x204   : > { %1090 = vmatmul.mubr.bf16.vlgmr.msra.gmra.mxu0 %v878_v12  ;;  %5541 = vmatprep.mubr.bf16.mxu1 %v878_v12  ;;  %v877_v16 = vadd.f32 %v5321_v4, %v867_v13  ;;  %v6798_v4 = vsub.s32 %v1235_v60, %v6690_v18 }
 0x205   : > { %1099 = vmatprep.mubr.bf16.mxu0 %v7899_v43 }
 0x206   : > { %v879_v17 = vpack.c.bf16 %v877_v16, %v876_v14 }
 0x208   : > { %5542 = vmatmul.mubr.bf16.vlgmr.msra.gmra.mxu1 %v879_v17 }
 0x209   : > { %5559 = vmatprep.mubr.msk.bf16.mxu1 %vm6310_vm0, %v6309_v48 }
 0x20c   : > { %1100 = vmatmul.mubr.bf16.gmra.mxu0 %v879_v17 }
 0x20d   : > { %5547 = vmatprep.mubr.msk.bf16.mxu0 %vm6310_vm0, %v6309_v48 }
 0x2c4   : > { %v1091_v25 = vpop.f32.mrf.mxu0 }
 0x2c5   : > { %v6700_v26 = vadd.f32 %v1091_v25, %v917_v22 }
 0x2c6   : > { %v1093_v28 = vpop.f32.mrf.mxu0 }
 0x2c7   : > { %v6702_v29 = vadd.f32 %v1093_v28, %v921_v24  ;;  %1163 = vrot.lane.b32.xlu0 %v6700_v26, %s6306_s10 }
 0x2c8   : > { %v1095_v30 = vpop.f32.mrf.mxu0  ;;  %v5543_v31 = vpop.f32.mrf.mxu1 }
 0x2c9   : > { %v6706_v32 = vadd.f32 %v5543_v31, %v925_v27  ;;  %1767 = vrot.lane.b32.xlu1 %v6702_v29, %s6307_s6  ;;  %v6710_v34 = vadd.f32 %v1095_v30, %v917_v22 }
 0x2ca   : > { %v1144_v33 = vpop.f32.mrf.mxu1  ;;  %v1097_v35 = vpop.f32.mrf.mxu0 }
 0x2cb   : > { %1755 = vrot.lane.b32.xlu0 %v6702_v29, %s6306_s10  ;;  %v6718_v38 = vadd.f32 %v1097_v35, %v921_v24  ;;  %v6764_v49 = vadd.f32 %v1144_v33, %v925_v27 }
 0x2cc   : > { %v5544_v36 = vpop.f32.mrf.mxu1  ;;  %v1101_v39 = vpop.f32.mrf.mxu0 }
 0x2cd   : > { %v6714_v37 = vadd.f32 %v5544_v36, %v925_v27  ;;  %1165 = vrot.lane.b32.xlu1 %v6710_v34, %s6306_s10  ;;  %v6730_v40 = vadd.f32 %v1101_v39, %v917_v22 }
 0x2ce   : > { %v1103_v41 = vpop.f32.mrf.mxu0  ;;  %v1147_v50 = vpop.f32.mrf.mxu1 }
 0x2cf   : > { %1779 = vrot.lane.b32.xlu0 %v6702_v29, %s6308_s12  ;;  %v6736_v42 = vadd.f32 %v1103_v41, %v921_v24  ;;  %v6776_v51 = vadd.f32 %v1147_v50, %v925_v27 }
 0x2d0   : > { %v1105_v44 = vpop.f32.mrf.mxu0 }
 0x2d1   : > { %1757 = vrot.lane.b32.xlu1 %v6718_v38, %s6306_s10  ;;  %v6744_v45 = vadd.f32 %v1105_v44, %v917_v22 }
 0x2d2   : > { %v1107_v46 = vpop.f32.mrf.mxu0 }
 0x2d3   : > { %1175 = vrot.lane.b32.xlu0 %v6700_v26, %s6307_s6  ;;  %v6750_v47 = vadd.f32 %v1107_v46, %v921_v24 }
 0x2d5   : > { %1769 = vrot.lane.b32.xlu1 %v6718_v38, %s6307_s6 }
 0x2d7   : > { %1187 = vrot.lane.b32.xlu0 %v6700_v26, %s6308_s12 }
 0x2d9   : > { %1781 = vrot.lane.b32.xlu1 %v6718_v38, %s6308_s12 }
 0x2db   : > { %1167 = vrot.lane.b32.xlu0 %v6730_v40, %s6306_s10 }
 0x2dd   : > { %1177 = vrot.lane.b32.xlu1 %v6710_v34, %s6307_s6 }
 0x2df   : > { %1759 = vrot.lane.b32.xlu0 %v6736_v42, %s6306_s10 }
 0x2e1   : > { %1189 = vrot.lane.b32.xlu1 %v6710_v34, %s6308_s12 }
 0x2e3   : > { %1771 = vrot.lane.b32.xlu0 %v6736_v42, %s6307_s6 }
 0x2e5   : > { %1169 = vrot.lane.b32.xlu1 %v6744_v45, %s6306_s10 }
 0x2e7   : > { %1783 = vrot.lane.b32.xlu0 %v6736_v42, %s6308_s12 }
 0x2e9   : > { %1761 = vrot.lane.b32.xlu1 %v6750_v47, %s6306_s10 }
 0x2eb   : > { %1179 = vrot.lane.b32.xlu0 %v6730_v40, %s6307_s6 }
 0x2ed   : > { %1773 = vrot.lane.b32.xlu1 %v6750_v47, %s6307_s6 }
 0x2ef   : > { %1191 = vrot.lane.b32.xlu0 %v6730_v40, %s6308_s12 }
 0x2f1   : > { %1785 = vrot.lane.b32.xlu1 %v6750_v47, %s6308_s12 }
 0x2f3   : > { %2347 = vrot.lane.b32.xlu0 %v6764_v49, %s6306_s10 }
 0x2f5   : > { %1181 = vrot.lane.b32.xlu1 %v6744_v45, %s6307_s6 }
 0x2f7   : > { %2371 = vrot.lane.b32.xlu0 %v6764_v49, %s6308_s12 }
 0x2f9   : > { %1193 = vrot.lane.b32.xlu1 %v6744_v45, %s6308_s12 }
 0x2fd   : > { %2349 = vrot.lane.b32.xlu1 %v6776_v51, %s6306_s10 }
 0x301   : > { %2359 = vrot.lane.b32.xlu1 %v6764_v49, %s6307_s6 }
 0x305   : > { %2361 = vrot.lane.b32.xlu1 %v6776_v51, %s6307_s6 }
 0x309   : > { %2373 = vrot.lane.b32.xlu1 %v6776_v51, %s6308_s12 }
 0x339   : > { %v1164_v54 = vpop.permute.xlu0 %1163 }
 0x33b   : > { %v1768_v57 = vpop.permute.xlu1 %1767 }
 0x33c   : > { %v1791_v63 = vcombine.low %v6702_v29, %v1768_v57  ;;  %v1792_v0 = vcombine.high %v6702_v29, %v1768_v57 }
 0x33d   : > { %v1756_v59 = vpop.permute.xlu0 %1755 }
 0x33e   : > { %v1799_v6 = vrot.slane %v1791_v63, %v6793_v62  ;;  %v1806_v7 = vrot.slane %v1792_v0, %v6793_v62 }
 0x33f   : > { %v6790_v61 = vpop.permute.xlu1 %1165 }
 0x341   : > { %v1780_v1 = vpop.permute.xlu0 %1779 }
 0x342   : > { %v1807_v2 = vcombine.low %v1756_v59, %v1780_v1  ;;  %v1808_v3 = vcombine.high %v1756_v59, %v1780_v1 }
 0x343   : > { %v1758_v5 = vpop.permute.xlu1 %1757 }
 0x344   : > { %v1815_v8 = vrot.slane %v1807_v2, %v6793_v62  ;;  %v1822_v9 = vrot.slane %v1808_v3, %v6793_v62 }
 0x345   : > { %v1176_v10 = vpop.permute.xlu0 %1175 }
 0x346   : > { %v1823_v11 = vcombine.low %v1799_v6, %v1815_v8  ;;  %v1824_v12 = vcombine.high %v1799_v6, %v1815_v8  ;;  %v1839_v13 = vcombine.low %v1806_v7, %v1822_v9  ;;  %v1840_v14 = vcombine.high %v1806_v7, %v1822_v9 }
 0x347   : > { %v1199_v16 = vcombine.low %v6700_v26, %v1176_v10  ;;  %v1200_v17 = vcombine.high %v6700_v26, %v1176_v10  ;;  %v1770_v15 = vpop.permute.xlu1 %1769 }
 0x348   : > { %v1831_v20 = vrot.slane %v1823_v11, %v6798_v4  ;;  %v1838_v22 = vrot.slane %v1824_v12, %v6798_v4  ;;  %v1847_v23 = vrot.slane %v1839_v13, %v6798_v4  ;;  %v1854_v24 = vrot.slane %v1840_v14, %v6798_v4 }
 0x349   : > { %v1188_v25 = vpop.permute.xlu0 %1187  ;;  %v1859_v29 = vcombine.low %v6718_v38, %v1770_v15  ;;  %v1860_v30 = vcombine.high %v6718_v38, %v1770_v15  ;;  %v1207_v39 = vrot.slane %v1199_v16, %v6793_v62  ;;  %v1214_v41 = vrot.slane %v1200_v17, %v6793_v62 }
 0x34a   : > { %v2063_v27 = vcombine.low %v1831_v20, %v1838_v22  ;;  %v5354_v28 = vcombine.high %v1831_v20, %v1838_v22  ;;  %v1215_v31 = vcombine.low %v1164_v54, %v1188_v25  ;;  %v1216_v33 = vcombine.high %v1164_v54, %v1188_v25 }
 0x34b   : > { %v1782_v35 = vpop.permute.xlu1 %1781  ;;  %v2079_v26 = vcombine.low %v1847_v23, %v1854_v24  ;;  %v5355_v36 = vcombine.high %v1847_v23, %v1854_v24  ;;  %v1867_v54 = vrot.slane %v1859_v29, %v6793_v62  ;;  %v1874_v56 = vrot.slane %v1860_v30, %v6793_v62 }
 0x34c   : > { %v1223_v44 = vrot.slane %v1215_v31, %v6793_v62  ;;  %v1230_v46 = vrot.slane %v1216_v33, %v6793_v62  ;;  %v1875_v50 = vcombine.low %v1758_v5, %v1782_v35  ;;  %v1876_v52 = vcombine.high %v1758_v5, %v1782_v35 }
 0x34d   : > { %v6816_v53 = vpop.permute.xlu0 %1167  ;;  %v6819_v55 = vrot.slane %v2063_v27, %v6793_v62  ;;  %v6822_v38 = vrot.slane %v5354_v28, %v6793_v62  ;;  %v6827_v0 = vrot.slane %v2079_v26, %v6793_v62  ;;  %v6830_v1 = vrot.slane %v5355_v36, %v6793_v62 }
 0x34e   : > { %v1231_v57 = vcombine.low %v1207_v39, %v1223_v44  ;;  %v1232_v58 = vcombine.high %v1207_v39, %v1223_v44  ;;  %v1247_v59 = vcombine.low %v1214_v41, %v1230_v46  ;;  %v1248_v60 = vcombine.high %v1214_v41, %v1230_v46 }
 0x34f   : > { %v1178_v63 = vpop.permute.xlu1 %1177  ;;  %v1883_v2 = vrot.slane %v1875_v50, %v6793_v62  ;;  %v1890_v3 = vrot.slane %v1876_v52, %v6793_v62  ;;  %v2095_v44 = vcombine.low %v6819_v55, %v6822_v38  ;;  %v2111_v46 = vcombine.low %v6827_v0, %v6830_v1 }
 0x350   : > { %v1239_v5 = vrot.slane %v1231_v57, %v6798_v4  ;;  %v1246_v6 = vrot.slane %v1232_v58, %v6798_v4  ;;  %v1255_v7 = vrot.slane %v1247_v59, %v6798_v4  ;;  %v1262_v8 = vrot.slane %v1248_v60, %v6798_v4 }
 0x351   : > { %v1760_v9 = vpop.permute.xlu0 %1759  ;;  %v1891_v10 = vcombine.low %v1867_v54, %v1883_v2  ;;  %v1892_v11 = vcombine.high %v1867_v54, %v1883_v2  ;;  %v1907_v12 = vcombine.low %v1874_v56, %v1890_v3  ;;  %v1908_v13 = vcombine.high %v1874_v56, %v1890_v3 }
 0x352   : > { %v1471_v14 = vcombine.low %v1239_v5, %v1246_v6  ;;  %v5346_v16 = vcombine.high %v1239_v5, %v1246_v6  ;;  %v1487_v17 = vcombine.low %v1255_v7, %v1262_v8  ;;  %v5347_v15 = vcombine.high %v1255_v7, %v1262_v8 }
 0x353   : > { %v1190_v20 = vpop.permute.xlu1 %1189  ;;  %v1899_v22 = vrot.slane %v1891_v10, %v6798_v4  ;;  %v1906_v23 = vrot.slane %v1892_v11, %v6798_v4  ;;  %v1915_v24 = vrot.slane %v1907_v12, %v6798_v4  ;;  %v1922_v25 = vrot.slane %v1908_v13, %v6798_v4 }
 0x354   : > { %v6843_v27 = vrot.slane %v1471_v14, %v6793_v62  ;;  %v1486_v28 = vrot.slane %v5346_v16, %v6793_v62  ;;  %v6847_v29 = vrot.slane %v1487_v17, %v6793_v62  ;;  %v6850_v30 = vrot.slane %v5347_v15, %v6793_v62 }
 0x355   : > { %v1772_v31 = vpop.permute.xlu0 %1771  ;;  %v2131_v33 = vcombine.low %v1899_v22, %v1906_v23  ;;  %v5356_v35 = vcombine.high %v1899_v22, %v1906_v23  ;;  %v2147_v26 = vcombine.low %v1915_v24, %v1922_v25  ;;  %v5357_v36 = vcombine.high %v1915_v24, %v1922_v25 }
 0x356   : > { %v1267_v39 = vcombine.low %v6710_v34, %v1178_v63  ;;  %v2096_v50 = vcombine.high %v6819_v55, %v6822_v38  ;;  %v1503_v52 = vcombine.low %v6843_v27, %v1486_v28  ;;  %v1504_v54 = vcombine.high %v6843_v27, %v1486_v28 }
 0x357   : > { %v6853_v41 = vpop.permute.xlu1 %1169  ;;  %v1268_v56 = vcombine.high %v6710_v34, %v1178_v63  ;;  %v2112_v57 = vcombine.high %v6827_v0, %v6830_v1  ;;  %v1519_v58 = vcombine.low %v6847_v29, %v6850_v30  ;;  %v1520_v59 = vcombine.high %v6847_v29, %v6850_v30 }
 0x358   : > { %v6871_v60 = vrot.slane %v2131_v33, %v6793_v62  ;;  %v6874_v2 = vrot.slane %v5356_v35, %v6793_v62  ;;  %v6877_v5 = vrot.slane %v2147_v26, %v6793_v62  ;;  %v6880_v34 = vrot.slane %v5357_v36, %v6793_v62 }
 0x359   : > { %v1784_v3 = vpop.permute.xlu0 %1783  ;;  %v1283_v63 = vcombine.low %v6790_v61, %v1190_v20  ;;  %v1284_v6 = vcombine.high %v6790_v61, %v1190_v20  ;;  %v1275_v7 = vrot.slane %v1267_v39, %v6793_v62  ;;  %v1927_v8 = vcombine.low %v6736_v42, %v1772_v31 }
 0x35a   : > { %v1928_v10 = vcombine.high %v6736_v42, %v1772_v31  ;;  %v1943_v11 = vcombine.low %v1760_v9, %v1784_v3  ;;  %v1282_v13 = vrot.slane %v1268_v56, %v6793_v62  ;;  %v1944_v17 = vcombine.high %v1760_v9, %v1784_v3 }
 0x35b   : > { %v6887_v12 = vpop.permute.xlu1 %1761  ;;  %v1291_v14 = vrot.slane %v1283_v63, %v6793_v62  ;;  %v1298_v16 = vrot.slane %v1284_v6, %v6793_v62  ;;  %v6893_v15 = vrot.slane %v1503_v52, %v6798_v4  ;;  %v6896_v61 = vrot.slane %v1519_v58, %v6798_v4 }
 0x35c   : > { %v1935_v20 = vrot.slane %v1927_v8, %v6793_v62  ;;  %v1951_v42 = vrot.slane %v1943_v11, %v6793_v62  ;;  %v1942_v27 = vrot.slane %v1928_v10, %v6793_v62  ;;  %v1958_v28 = vrot.slane %v1944_v17, %v6793_v62 }
 0x35d   : > { %v1299_v22 = vcombine.low %v1275_v7, %v1291_v14  ;;  %v1300_v23 = vcombine.high %v1275_v7, %v1291_v14  ;;  %v1315_v24 = vcombine.low %v1282_v13, %v1298_v16  ;;  %v1316_v25 = vcombine.high %v1282_v13, %v1298_v16  ;;  %v1180_v7 = vpop.permute.xlu0 %1179 }
 0x35e   : > { %v1959_v29 = vcombine.low %v1935_v20, %v1951_v42  ;;  %v1960_v9 = vcombine.high %v1935_v20, %v1951_v42  ;;  %v1975_v52 = vcombine.low %v1942_v27, %v1958_v28  ;;  %v1976_v56 = vcombine.high %v1942_v27, %v1958_v28 }
 0x35f   : > { %v1307_v30 = vrot.slane %v1299_v22, %v6798_v4  ;;  %v1314_v31 = vrot.slane %v1300_v23, %v6798_v4  ;;  %v1323_v33 = vrot.slane %v1315_v24, %v6798_v4  ;;  %v1330_v35 = vrot.slane %v1316_v25, %v6798_v4  ;;  %v1774_v26 = vpop.permute.xlu1 %1773 }
 0x360   : > { %v6907_v36 = vrot.slane %v1959_v29, %v6798_v4  ;;  %v6910_v39 = vrot.slane %v1960_v9, %v6798_v4  ;;  %v6913_v8 = vrot.slane %v1504_v54, %v6798_v4  ;;  %v6916_v10 = vrot.slane %v1975_v52, %v6798_v4 }
 0x361   : > { %v1539_v58 = vcombine.low %v1307_v30, %v1314_v31  ;;  %v5348_v3 = vcombine.high %v1307_v30, %v1314_v31  ;;  %v1555_v63 = vcombine.low %v1323_v33, %v1330_v35  ;;  %v5349_v6 = vcombine.high %v1323_v33, %v1330_v35 }
 0x362   : > { %v6919_v11 = vrot.slane %v1976_v56, %v6798_v4  ;;  %v2199_v13 = vcombine.low %v6907_v36, %v6910_v39  ;;  %v6936_v20 = vrot.slane %v1520_v59, %v6798_v4  ;;  %v1335_v22 = vcombine.low %v6730_v40, %v1180_v7 }
 0x363   : > { %v6924_v14 = vrot.slane %v1539_v58, %v6793_v62  ;;  %v6927_v16 = vrot.slane %v5348_v3, %v6793_v62  ;;  %v6930_v17 = vrot.slane %v1555_v63, %v6793_v62  ;;  %v6933_v54 = vrot.slane %v5349_v6, %v6793_v62  ;;  %v1786_v28 = vpop.permute.xlu1 %1785  ;;  %v1192_v3 = vpop.permute.xlu0 %1191 }
 0x364   : > { %v6942_v23 = vrot.slane %v2095_v44, %v6798_v4  ;;  %v5358_v27 = vcombine.high %v6907_v36, %v6910_v39  ;;  %v6954_v59 = vrot.slane %v2111_v46, %v6798_v4  ;;  %v6957_v29 = vrot.slane %v2199_v13, %v6793_v62 }
 0x365   : > { %v1571_v24 = vcombine.low %v6924_v14, %v6927_v16  ;;  %v1587_v25 = vcombine.low %v6930_v17, %v6933_v54  ;;  %v2215_v44 = vcombine.low %v6916_v10, %v6919_v11  ;;  %v5359_v9 = vcombine.high %v6916_v10, %v6919_v11 }
 0x366   : > { %v1336_v30 = vcombine.high %v6730_v40, %v1180_v7  ;;  %v1572_v31 = vcombine.high %v6924_v14, %v6927_v16  ;;  %v1588_v46 = vcombine.high %v6930_v17, %v6933_v54  ;;  %v1343_v52 = vrot.slane %v1335_v22, %v6793_v62 }
 0x367   : > { %v6967_v33 = vrot.slane %v1571_v24, %v6798_v4  ;;  %v6972_v35 = vrot.slane %v1587_v25, %v6798_v4  ;;  %v1995_v58 = vcombine.low %v6750_v47, %v1774_v26  ;;  %v1996_v40 = vcombine.high %v6750_v47, %v1774_v26 }
 0x368   : > { %v1350_v56 = vrot.slane %v1336_v30, %v6793_v62  ;;  %v2127_v6 = vcombine.low %v6942_v23, %v6954_v59  ;;  %v2163_v7 = vcombine.low %v6871_v60, %v6874_v2  ;;  %v2179_v13 = vcombine.low %v6877_v5, %v6880_v34 }
 0x369   : > { %v2003_v22 = vrot.slane %v1995_v58, %v6793_v62  ;;  %v6991_v47 = vrot.slane %v2096_v50, %v6798_v4  ;;  %v6997_v26 = vrot.slane %v2112_v57, %v6798_v4  ;;  %v2164_v24 = vcombine.high %v6871_v60, %v6874_v2  ;;  %v7010_v50 = vpop.permute.xlu1 %1181 }
 0x36a   : > { %v7002_v25 = vrot.slane %v2163_v7, %v6798_v4  ;;  %v7005_v30 = vrot.slane %v2179_v13, %v6798_v4  ;;  %v2180_v55 = vcombine.high %v6877_v5, %v6880_v34  ;;  %v1351_v38 = vcombine.low %v6816_v53, %v1192_v3 }
 0x36b   : > { %v2010_v0 = vrot.slane %v1996_v40, %v6793_v62  ;;  %v7014_v1 = vrot.slane %v2164_v24, %v6798_v4  ;;  %v1352_v57 = vcombine.high %v6816_v53, %v1192_v3  ;;  %v2011_v60 = vcombine.low %v6887_v12, %v1786_v28 }
 0x36c   : > { %v2195_v2 = vcombine.low %v7002_v25, %v7005_v30  ;;  %v7021_v58 = vrot.slane %v2180_v55, %v6798_v4  ;;  %v1359_v5 = vrot.slane %v1351_v38, %v6793_v62  ;;  %v2012_v34 = vcombine.high %v6887_v12, %v1786_v28 }
 0x36d   : > { %v2129_v40 = vcombine.low %v6991_v47, %v6997_v26  ;;  %v1366_v7 = vrot.slane %v1352_v57, %v6793_v62  ;;  %v2019_v13 = vrot.slane %v2011_v60, %v6793_v62  ;;  %v1403_v53 = vcombine.low %v6744_v45, %v7010_v50  ;;  %v7037_v42 = vpop.permute.xlu1 %1193 }
 0x36e   : > { %v2335_v3 = vpack.c.bf16 %v2195_v2, %v2127_v6  ;;  %v2197_v24 = vcombine.low %v7014_v1, %v7021_v58  ;;  %v1367_v55 = vcombine.low %v1343_v52, %v1359_v5  ;;  %v1368_v19 = vcombine.high %v1343_v52, %v1359_v5 }
 0x36f   : > { %v1383_v21 = vcombine.low %v1350_v56, %v1366_v7  ;;  %v1384_v38 = vcombine.high %v1350_v56, %v1366_v7  ;;  %v2026_v12 = vrot.slane %v2012_v34, %v6793_v62  ;;  %v2027_v28 = vcombine.low %v2003_v22, %v2019_v13 }
 0x370   : > { %v2940_v43 = vsel %vm2935_vm1, %v2335_v3, 0  ;;  %v2337_v63 = vpack.c.bf16 %v2197_v24, %v2129_v40  ;;  %v1375_v57 = vrot.slane %v1367_v55, %v6798_v4  ;;  %v1382_v60 = vrot.slane %v1368_v19, %v6798_v4  ;;  %v2348_v40 = vpop.permute.xlu0 %2347 }
 0x371   : > { %5546 = vmatpush3.bf16.xpose.msra.mxu0 %v2940_v43  ;;  %v1391_v6 = vrot.slane %v1383_v21, %v6798_v4  ;;  %v1398_v2 = vrot.slane %v1384_v38, %v6798_v4  ;;  %v2028_v52 = vcombine.high %v2003_v22, %v2019_v13  ;;  %v2035_v56 = vrot.slane %v2027_v28, %v6798_v4 }
 0x372   : > { %v3034_v5 = vsel %vm2935_vm1, %v2337_v63, 0  ;;  %v1607_v34 = vcombine.low %v1375_v57, %v1382_v60  ;;  %v5350_v7 = vcombine.high %v1375_v57, %v1382_v60  ;;  %v2043_v3 = vcombine.low %v2010_v0, %v2026_v12  ;;  %5551 = vmatprep.subr.bf16.mxu0 %v6309_v48 }
 0x373   : > { %5558 = vmatpush3.bf16.xpose.msra.mxu1 %v3034_v5  ;;  %v1623_v19 = vcombine.low %v1391_v6, %v1398_v2  ;;  %v5351_v24 = vcombine.high %v1391_v6, %v1398_v2  ;;  %v2042_v43 = vrot.slane %v2028_v52, %v6798_v4  ;;  %v2044_v55 = vcombine.high %v2010_v0, %v2026_v12  ;;  %v7080_v6 = vpop.permute.xlu1 %2349 }
 0x374   : > { %v7046_v21 = vrot.slane %v1607_v34, %v6793_v62  ;;  %v7049_v22 = vrot.slane %v5350_v7, %v6793_v62  ;;  %v7052_v63 = vrot.slane %v2043_v3, %v6798_v4  ;;  %v1404_v13 = vcombine.high %v6744_v45, %v7010_v50  ;;  %5569 = vmatprep.subr.bf16.mxu1 %v6309_v48 }
 0x375   : > { %v7058_v38 = vrot.slane %v1623_v19, %v6793_v62  ;;  %v7061_v28 = vrot.slane %v5351_v24, %v6793_v62  ;;  %v7064_v0 = vrot.slane %v2044_v55, %v6798_v4  ;;  %v2267_v12 = vcombine.low %v2035_v56, %v2042_v43 }
 0x376   : > { %v7070_v57 = vrot.slane %v1572_v31, %v6798_v4  ;;  %v7076_v45 = vrot.slane %v1588_v46, %v6798_v4  ;;  %v1639_v50 = vcombine.low %v7046_v21, %v7049_v22  ;;  %v5360_v60 = vcombine.high %v2035_v56, %v2042_v43 }
 0x377   : > { %v7086_v2 = vrot.slane %v5358_v27, %v6793_v62  ;;  %v7092_v14 = vrot.slane %v2215_v44, %v6793_v62  ;;  %v7098_v16 = vrot.slane %v5359_v9, %v6793_v62  ;;  %v1411_v17 = vrot.slane %v1403_v53, %v6793_v62  ;;  %v2372_v44 = vpop.permute.xlu0 %2371 }
 0x378   : > { %v1640_v54 = vcombine.high %v7046_v21, %v7049_v22  ;;  %v1655_v36 = vcombine.low %v7058_v38, %v7061_v28  ;;  %v1656_v39 = vcombine.high %v7058_v38, %v7061_v28  ;;  %v1418_v27 = vrot.slane %v1404_v13, %v6793_v62 }
 0x379   : > { %v7109_v31 = vrot.slane %v1639_v50, %v6798_v4  ;;  %v7112_v10 = vrot.slane %v2267_v12, %v6793_v62  ;;  %v2283_v11 = vcombine.low %v7052_v63, %v7064_v0  ;;  %v7953_v9 = vcombine.low %v6893_v15, %v6896_v61 }
 0x37a   : > { %v7954_v46 = vcombine.low %v6967_v33, %v6972_v35  ;;  %v7123_v52 = vrot.slane %v5360_v60, %v6793_v62  ;;  %v1537_v56 = vcombine.low %v6913_v8, %v6936_v20  ;;  %v1605_v5 = vcombine.low %v7070_v57, %v7076_v45 }
 0x37b   : > { %v2128_v34 = vcombine.high %v6942_v23, %v6954_v59  ;;  %v2196_v7 = vcombine.high %v7002_v25, %v7005_v30  ;;  %v2399_v3 = vcombine.low %v2348_v40, %v2372_v44  ;;  %v2400_v19 = vcombine.high %v2348_v40, %v2372_v44  ;;  %v2360_v59 = vpop.permute.xlu1 %2359 }
 0x37c   : > { %v1743_v53 = vpack.c.bf16 %v7954_v46, %v7953_v9  ;;  %v1419_v24 = vcombine.low %v6853_v41, %v7037_v42  ;;  %v5361_v43 = vcombine.high %v7052_v63, %v7064_v0  ;;  %v1745_v55 = vpack.c.bf16 %v1605_v5, %v1537_v56 }
 0x37d   : > { %v1420_v13 = vcombine.high %v6853_v41, %v7037_v42  ;;  %v1536_v23 = vcombine.high %v6893_v15, %v6896_v61  ;;  %v2336_v25 = vpack.c.bf16 %v2196_v7, %v2128_v34  ;;  %v2407_v30 = vrot.slane %v2399_v3, %v6793_v62 }
 0x37e   : > { %5548 = vmatmul.mubr.msk.bf16.vlgmr.msra.gmra.mxu0 %vm2935_vm1, %v1743_v53  ;;  %v1427_v40 = vrot.slane %v1419_v24, %v6793_v62  ;;  %v1604_v12 = vcombine.high %v6967_v33, %v6972_v35  ;;  %5560 = vmatmul.mubr.msk.bf16.vlgmr.msra.gmra.mxu1 %vm2935_vm1, %v1745_v55  ;;  %v2414_v50 = vrot.slane %v2400_v19, %v6793_v62 }
 0x37f   : > { %5553 = vmatprep.mubr.msk.bf16.mxu0 %vm6310_vm0, %v6309_v48  ;;  %v1434_v41 = vrot.slane %v1420_v13, %v6793_v62  ;;  %v2130_v42 = vcombine.high %v6991_v47, %v6997_v26  ;;  %v2198_v15 = vcombine.high %v7014_v1, %v7021_v58  ;;  %v2987_v61 = vsel %vm2935_vm1, %v2336_v25, 0  ;;  %5571 = vmatprep.mubr.msk.bf16.mxu1 %vm6310_vm0, %v6309_v48 }
 0x380   : > { %v1435_v60 = vcombine.low %v1411_v17, %v1427_v40  ;;  %v1436_v44 = vcombine.high %v1411_v17, %v1427_v40  ;;  %v2383_v9 = vcombine.low %v6764_v49, %v2360_v59  ;;  %5552 = vmatpush3.bf16.xpose.msra.mxu0 %v2987_v61  ;;  %v2384_v53 = vcombine.high %v6764_v49, %v2360_v59 }
 0x381   : > { %v1451_v33 = vcombine.low %v1418_v27, %v1434_v41  ;;  %v1452_v35 = vcombine.high %v1418_v27, %v1434_v41  ;;  %v2338_v46 = vpack.c.bf16 %v2198_v15, %v2130_v42  ;;  %v1744_v1 = vpack.c.bf16 %v1604_v12, %v1536_v23  ;;  %5563 = vmatprep.subr.bf16.mxu0 %v6309_v48  ;;  %v2362_v23 = vpop.permute.xlu1 %2361 }
 0x382   : > { %v1443_v47 = vrot.slane %v1435_v60, %v6798_v4  ;;  %v1450_v26 = vrot.slane %v1436_v44, %v6798_v4  ;;  %v2391_v58 = vrot.slane %v2383_v9, %v6793_v62  ;;  %v2398_v27 = vrot.slane %v2384_v53, %v6793_v62 }
 0x383   : > { %v1459_v17 = vrot.slane %v1451_v33, %v6798_v4  ;;  %v1466_v56 = vrot.slane %v1452_v35, %v6798_v4  ;;  %v3081_v5 = vsel %vm2935_vm1, %v2338_v46, 0  ;;  %v7185_v9 = vrot.slane %v1655_v36, %v6798_v4 }
 0x384   : > { %v1675_v34 = vcombine.low %v1443_v47, %v1450_v26  ;;  %v5352_v7 = vcombine.high %v1443_v47, %v1450_v26  ;;  %v2415_v49 = vcombine.low %v2391_v58, %v2407_v30  ;;  %v2416_v3 = vcombine.high %v2391_v58, %v2407_v30 }
 0x385   : > { %v1691_v19 = vcombine.low %v1459_v17, %v1466_v56  ;;  %v5353_v24 = vcombine.high %v1459_v17, %v1466_v56  ;;  %v2431_v55 = vcombine.low %v2398_v27, %v2414_v50  ;;  %v2432_v13 = vcombine.high %v2398_v27, %v2414_v50 }
 0x386   : > { %v1682_v59 = vrot.slane %v1675_v34, %v6793_v62  ;;  %v1690_v25 = vrot.slane %v5352_v7, %v6793_v62  ;;  %v2423_v40 = vrot.slane %v2415_v49, %v6798_v4  ;;  %v2430_v12 = vrot.slane %v2416_v3, %v6798_v4 }
 0x387   : > { %v1698_v41 = vrot.slane %v1691_v19, %v6793_v62  ;;  %v1706_v42 = vrot.slane %v5353_v24, %v6793_v62  ;;  %v7175_v15 = vrot.slane %v2431_v55, %v6798_v4  ;;  %v7178_v30 = vrot.slane %v2432_v13, %v6798_v4  ;;  %5554 = vmatmul.mubr.msk.bf16.vlgmr.msra.gmra.mxu0 %vm2935_vm1, %v1744_v1  ;;  %v2374_v1 = vpop.permute.xlu1 %2373 }
 0x388   : > { %v1707_v50 = vcombine.low %v1682_v59, %v1690_v25  ;;  %v1708_v61 = vcombine.high %v1682_v59, %v1690_v25  ;;  %v2655_v60 = vcombine.low %v2423_v40, %v2430_v12  ;;  %v5362_v44 = vcombine.high %v2423_v40, %v2430_v12  ;;  %5564 = vmatpush3.bf16.xpose.msra.mxu0 %v3081_v5 }
 0x389   : > { %v7191_v33 = vrot.slane %v2283_v11, %v6793_v62  ;;  %v7194_v35 = vrot.slane %v5361_v43, %v6793_v62  ;;  %v1723_v46 = vcombine.low %v1698_v41, %v1706_v42  ;;  %v1724_v53 = vcombine.high %v1698_v41, %v1706_v42  ;;  %5565 = vmatprep.mubr.msk.bf16.mxu0 %vm6310_vm0, %v6309_v48 }
 0x38a   : > { %v2671_v47 = vcombine.low %v7175_v15, %v7178_v30  ;;  %v5363_v26 = vcombine.high %v7175_v15, %v7178_v30  ;;  %v2451_v36 = vcombine.low %v6776_v51, %v2362_v23  ;;  %v7204_v63 = vrot.slane %v1707_v50, %v6798_v4  ;;  %5575 = vmatprep.subr.bf16.mxu0 %v6309_v48 }
 0x38b   : > { %v7207_v0 = vrot.slane %v1708_v61, %v6798_v4  ;;  %v7210_v11 = vrot.slane %v2655_v60, %v6793_v62  ;;  %v7213_v43 = vrot.slane %v5362_v44, %v6793_v62  ;;  %v1731_v58 = vrot.slane %v1723_v46, %v6798_v4 }
 0x38c   : > { %v2452_v17 = vcombine.high %v6776_v51, %v2362_v23  ;;  %v1538_v56 = vcombine.high %v6913_v8, %v6936_v20  ;;  %v1606_v5 = vcombine.high %v7070_v57, %v7076_v45  ;;  %v2231_v27 = vcombine.low %v6957_v29, %v7086_v2 }
 0x38d   : > { %v2247_v34 = vcombine.low %v7092_v14, %v7098_v16  ;;  %v2299_v7 = vcombine.low %v7112_v10, %v7123_v52  ;;  %v2315_v49 = vcombine.low %v7191_v33, %v7194_v35  ;;  %v7231_v51 = vrot.slane %v1724_v53, %v6798_v4 }
 0x38e   : > { %v1746_v3 = vpack.c.bf16 %v1606_v5, %v1538_v56  ;;  %v2467_v8 = vcombine.low %v7080_v6, %v2374_v1  ;;  %v2468_v20 = vcombine.high %v7080_v6, %v2374_v1  ;;  %v2239_v57 = vrot.slane %v2231_v27, %v6798_v4 }
 0x38f   : > { %v2255_v45 = vrot.slane %v2247_v34, %v6798_v4  ;;  %v2307_v19 = vrot.slane %v2299_v7, %v6798_v4  ;;  %v2323_v24 = vrot.slane %v2315_v49, %v6798_v4  ;;  %v2459_v55 = vrot.slane %v2451_v36, %v6793_v62 }
 0x390   : > { %v2466_v13 = vrot.slane %v2452_v17, %v6793_v62  ;;  %5566 = vmatmul.mubr.msk.bf16.vlgmr.msra.gmra.mxu0 %vm2935_vm1, %v1746_v3  ;;  %v2475_v23 = vrot.slane %v2467_v8, %v6793_v62  ;;  %v2482_v59 = vrot.slane %v2468_v20, %v6793_v62  ;;  %v1671_v60 = vcombine.low %v7109_v31, %v7185_v9 }
 0x391   : > { %v2263_v25 = vcombine.low %v2239_v57, %v2255_v45  ;;  %v2331_v6 = vcombine.low %v2307_v19, %v2323_v24  ;;  %v2264_v40 = vcombine.high %v2239_v57, %v2255_v45  ;;  %v2332_v12 = vcombine.high %v2307_v19, %v2323_v24  ;;  %5577 = vmatprep.mubr.msk.bf16.mxu0 %vm6310_vm0, %v6309_v48 }
 0x392   : > { %v2483_v41 = vcombine.low %v2459_v55, %v2475_v23  ;;  %v2484_v42 = vcombine.high %v2459_v55, %v2475_v23  ;;  %v2499_v15 = vcombine.low %v2466_v13, %v2482_v59  ;;  %v2500_v30 = vcombine.high %v2466_v13, %v2482_v59 }
 0x393   : > { %v2339_v50 = vpack.c.bf16 %v2331_v6, %v2263_v25  ;;  %v2340_v61 = vpack.c.bf16 %v2332_v12, %v2264_v40  ;;  %v1739_v44 = vcombine.low %v7204_v63, %v1731_v58  ;;  %v1740_v5 = vcombine.high %v7204_v63, %v1731_v58 }
 0x394   : > { %v2491_v46 = vrot.slane %v2483_v41, %v6798_v4  ;;  %v2498_v53 = vrot.slane %v2484_v42, %v6798_v4  ;;  %v2507_v36 = vrot.slane %v2499_v15, %v6798_v4  ;;  %v2514_v1 = vrot.slane %v2500_v30, %v6798_v4 }
 0x395   : > { %v3128_v17 = vsel %vm2935_vm1, %v2339_v50, 0  ;;  %v3175_v56 = vsel %vm2935_vm1, %v2340_v61, 0  ;;  %v2232_v27 = vcombine.high %v6957_v29, %v7086_v2  ;;  %v2678_v3 = vrot.slane %v2671_v47, %v6793_v62 }
 0x396   : > { %5570 = vmatpush3.bf16.xpose.msra.mxu1 %v3128_v17  ;;  %5576 = vmatpush3.bf16.xpose.msra.mxu0 %v3175_v56  ;;  %v2723_v34 = vcombine.low %v2491_v46, %v2498_v53  ;;  %v5364_v7 = vcombine.high %v2491_v46, %v2498_v53  ;;  %v2739_v49 = vcombine.low %v2507_v36, %v2514_v1 }
 0x397   : > { %v5365_v8 = vcombine.high %v2507_v36, %v2514_v1  ;;  %v1672_v20 = vcombine.high %v7109_v31, %v7185_v9  ;;  %5581 = vmatprep.subr.bf16.mxu1 %v6309_v48  ;;  %5587 = vmatprep.subr.bf16.mxu0 %v6309_v48  ;;  %v2686_v63 = vrot.slane %v5363_v26, %v6793_v62 }
 0x398   : > { %v1747_v58 = vpack.c.bf16 %v1739_v44, %v1671_v60  ;;  %v2246_v29 = vrot.slane %v2232_v27, %v6798_v4  ;;  %v2248_v2 = vcombine.high %v7092_v14, %v7098_v16  ;;  %v2730_v57 = vrot.slane %v2723_v34, %v6793_v62 }
 0x399   : > { %v1748_v45 = vpack.c.bf16 %v1740_v5, %v1672_v20  ;;  %v2300_v47 = vcombine.high %v7112_v10, %v7123_v52  ;;  %v2316_v31 = vcombine.high %v7191_v33, %v7194_v35  ;;  %v2738_v9 = vrot.slane %v5364_v7, %v6793_v62 }
 0x39a   : > { %v2746_v19 = vrot.slane %v2739_v49, %v6793_v62  ;;  %v2754_v26 = vrot.slane %v5365_v8, %v6793_v62  ;;  %v2262_v24 = vrot.slane %v2248_v2, %v6798_v4  ;;  %v1654_v14 = vrot.slane %v1640_v54, %v6798_v4 }
 0x39b   : > { %v1670_v16 = vrot.slane %v1656_v39, %v6798_v4  ;;  %v2314_v10 = vrot.slane %v2300_v47, %v6798_v4  ;;  %v2330_v52 = vrot.slane %v2316_v31, %v6798_v4  ;;  %v1741_v35 = vcombine.low %v7207_v0, %v7231_v51 }
 0x39c   : > { %v2265_v33 = vcombine.low %v2246_v29, %v2262_v24  ;;  %v2687_v55 = vcombine.low %v7210_v11, %v7213_v43  ;;  %v2703_v13 = vcombine.low %v2678_v3, %v2686_v63  ;;  %v2266_v22 = vcombine.high %v2246_v29, %v2262_v24 }
 0x39d   : > { %5572 = vmatmul.mubr.msk.bf16.vlgmr.msra.gmra.mxu1 %vm2935_vm1, %v1747_v58  ;;  %5578 = vmatmul.mubr.msk.bf16.vlgmr.msra.gmra.mxu0 %vm2935_vm1, %v1748_v45  ;;  %v2333_v21 = vcombine.low %v2314_v10, %v2330_v52  ;;  %v2334_v38 = vcombine.high %v2314_v10, %v2330_v52  ;;  %v1742_v28 = vcombine.high %v7207_v0, %v7231_v51  ;;  %v7324_v58 = vld [vmem:[#allocation5] sm:$0xff] }
 0x39e   : > { %5583 = vmatprep.mubr.msk.bf16.mxu1 %vm6310_vm0, %v6309_v48  ;;  %5589 = vmatprep.mubr.msk.bf16.mxu0 %vm6310_vm0, %v6309_v48  ;;  %v2755_v54 = vcombine.low %v2730_v57, %v2738_v9  ;;  %v2771_v39 = vcombine.low %v2746_v19, %v2754_v26  ;;  %v2688_v25 = vcombine.high %v7210_v11, %v7213_v43 }
 0x39f   : > { %v2341_v23 = vpack.c.bf16 %v2333_v21, %v2265_v33  ;;  %v2342_v59 = vpack.c.bf16 %v2334_v38, %v2266_v22  ;;  %v2704_v6 = vcombine.high %v2678_v3, %v2686_v63  ;;  %v2695_v40 = vrot.slane %v2687_v55, %v6798_v4 }
 0x3a0   : > { %v2711_v12 = vrot.slane %v2703_v13, %v6798_v4  ;;  %v2763_v41 = vrot.slane %v2755_v54, %v6798_v4  ;;  %v2779_v42 = vrot.slane %v2771_v39, %v6798_v4  ;;  %v2702_v51 = vrot.slane %v2688_v25, %v6798_v4 }
 0x3a1   : > { %v3222_v15 = vsel %vm2935_vm1, %v2341_v23, 0  ;;  %v3269_v0 = vsel %vm2935_vm1, %v2342_v59, 0  ;;  %v2718_v30 = vrot.slane %v2704_v6, %v6798_v4  ;;  %v2756_v50 = vcombine.high %v2730_v57, %v2738_v9  ;;  %v7329_v9 = vld [vmem:[#allocation5 + $0x8] sm:$0xff] }
 0x3a2   : > { %5582 = vmatpush3.bf16.xpose.msra.mxu1 %v3222_v15  ;;  %5588 = vmatpush3.bf16.xpose.msra.mxu0 %v3269_v0  ;;  %v2787_v11 = vcombine.low %v2763_v41, %v2779_v42  ;;  %v2788_v43 = vcombine.high %v2763_v41, %v2779_v42  ;;  %v2772_v60 = vcombine.high %v2746_v19, %v2754_v26 }
 0x3a3   : > { %5593 = vmatprep.subr.bf16.mxu1 %v6309_v48  ;;  %5599 = vmatprep.subr.bf16.mxu0 %v6309_v48  ;;  %v2721_v61 = vcombine.low %v2702_v51, %v2718_v30  ;;  %v2722_v44 = vcombine.high %v2702_v51, %v2718_v30  ;;  %v2719_v46 = vcombine.low %v2695_v40, %v2711_v12 }
 0x3a4   : > { %v2720_v53 = vcombine.high %v2695_v40, %v2711_v12  ;;  %v2770_v36 = vrot.slane %v2756_v50, %v6798_v4  ;;  %v1673_v1 = vcombine.low %v1654_v14, %v1670_v16  ;;  %v1674_v17 = vcombine.high %v1654_v14, %v1670_v16 }
 0x3a5   : > { %v2786_v56 = vrot.slane %v2772_v60, %v6798_v4  ;;  %v2927_v5 = vpack.c.bf16 %v2787_v11, %v2719_v46 }
 0x3a6   : > { %v2928_v27 = vpack.c.bf16 %v2788_v43, %v2720_v53  ;;  %v1749_v34 = vpack.c.bf16 %v1741_v35, %v1673_v1  ;;  %v1750_v7 = vpack.c.bf16 %v1742_v28, %v1674_v17 }
 0x3a7   : > { %v2789_v49 = vcombine.low %v2770_v36, %v2786_v56  ;;  %v2790_v3 = vcombine.high %v2770_v36, %v2786_v56 }
 0x3a9   : > { %5584 = vmatmul.mubr.msk.bf16.vlgmr.msra.gmra.mxu1 %vm2935_vm1, %v1749_v34  ;;  %5590 = vmatmul.mubr.msk.bf16.vlgmr.msra.gmra.mxu0 %vm2935_vm1, %v1750_v7  ;;  %v7314_v8 = vpack.c.bf16 %v2789_v49, %v2721_v61  ;;  %v7316_v20 = vpack.c.bf16 %v2790_v3, %v2722_v44 }
 0x3aa   : > { %5594 = vmatpush3.bf16.msra.mxu1 %v2927_v5  ;;  %5600 = vmatpush3.bf16.msra.mxu0 %v2928_v27 }
 0x3ab   : > { %5595 = vmatprep.mubr.msk.bf16.mxu1 %vm6310_vm0, %v6309_v48  ;;  %5605 = vmatprep.subr.bf16.mxu1 %v6309_v48 }
 0x3ac   : > { %5601 = vmatprep.mubr.msk.bf16.mxu0 %vm6310_vm0, %v6309_v48  ;;  %5611 = vmatprep.subr.bf16.mxu0 %v6309_v48 }
 0x43e   : > { %v2976_v63 = vpop.f32.mrf.mxu0  ;;  %v3070_v57 = vpop.f32.mrf.mxu1 }
 0x43f   : > { %v3312_v29 = vmul.f32 0.17677669, %v2976_v63  ;;  %v3316_v47 = vmul.f32 0.17677669, %v3070_v57 }
 0x440   : > { %v5549_v2 = vpop.f32.mrf.mxu0  ;;  %v5561_v19 = vpop.f32.mrf.mxu1 }
 0x441   : > { %v7327_v45 = vadd.f32 %v3312_v29, %v7324_v58  ;;  %v7334_v16 = vadd.f32 %v3316_v47, %v7324_v58 }
 0x442   : > { %v2979_v31 = vpop.f32.mrf.mxu0  ;;  %v3073_v10 = vpop.f32.mrf.mxu1 }
 0x443   : > { %v3313_v26 = vmul.f32 0.17677669, %v2979_v31  ;;  %v3345_v24 = vsel %vm3344_vm2, %v7327_v45, -inf  ;;  %v3317_v33 = vmul.f32 0.17677669, %v3073_v10  ;;  %v3357_v55 = vsel %vm3344_vm2, %v7334_v16, -inf }
 0x444   : > { %3346 = vmax.xlane.f32.xlu0 %v3345_v24  ;;  %v5550_v14 = vpop.f32.mrf.mxu0  ;;  %v5562_v35 = vpop.f32.mrf.mxu1 }
 0x445   : > { %v7337_v52 = vadd.f32 %v3313_v26, %v7329_v9  ;;  %v7344_v21 = vadd.f32 %v3317_v33, %v7329_v9 }
 0x447   : > { %v3348_v13 = vsel %vm3344_vm2, %v7337_v52, -inf  ;;  %v3023_v22 = vpop.f32.mrf.mxu0  ;;  %v3360_v28 = vsel %vm3344_vm2, %v7344_v21, -inf }
 0x448   : > { %3358 = vmax.xlane.f32.xlu0 %v3357_v55  ;;  %3349 = vmax.xlane.f32.xlu1 %v3348_v13  ;;  %v3314_v38 = vmul.f32 0.17677669, %v3023_v22 }
 0x449   : > { %v5555_v54 = vpop.f32.mrf.mxu0 }
 0x44a   : > { %v7349_v39 = vadd.f32 %v3314_v38, %v7324_v58 }
 0x44b   : > { %v3026_v23 = vpop.f32.mrf.mxu0 }
 0x44c   : > { %3361 = vmax.xlane.f32.xlu1 %v3360_v28  ;;  %v3351_v59 = vsel %vm3344_vm2, %v7349_v39, -inf  ;;  %v3315_v0 = vmul.f32 0.17677669, %v3026_v23 }
 0x44d   : > { %3352 = vmax.xlane.f32.xlu0 %v3351_v59  ;;  %v5556_v25 = vpop.f32.mrf.mxu0 }
 0x44e   : > { %v7359_v1 = vadd.f32 %v3315_v0, %v7329_v9 }
 0x450   : > { %v3117_v6 = vpop.f32.mrf.mxu0  ;;  %v3354_v34 = vsel %vm3344_vm2, %v7359_v1, -inf }
 0x451   : > { %v3318_v50 = vmul.f32 0.17677669, %v3117_v6 }
 0x452   : > { %v5567_v40 = vpop.f32.mrf.mxu0 }
 0x453   : > { %v7372_v49 = vadd.f32 %v3318_v50, %v7324_v58 }
 0x454   : > { %v3120_v12 = vpop.f32.mrf.mxu0 }
 0x455   : > { %v3319_v61 = vmul.f32 0.17677669, %v3120_v12  ;;  %v3363_v47 = vsel %vm3344_vm2, %v7372_v49, -inf }
 0x456   : > { %v5568_v41 = vpop.f32.mrf.mxu0 }
 0x457   : > { %v7375_v3 = vadd.f32 %v3319_v61, %v7329_v9 }
 0x459   : > { %v3366_v31 = vsel %vm3344_vm2, %v7375_v3, -inf }
 0x45d   : > { %v3164_v42 = vpop.f32.mrf.mxu1  ;;  %v3211_v15 = vpop.f32.mrf.mxu0 }
 0x45e   : > { %v3320_v51 = vmul.f32 0.17677669, %v3164_v42  ;;  %v3322_v2 = vmul.f32 0.17677669, %v3211_v15 }
 0x45f   : > { %v5573_v30 = vpop.f32.mrf.mxu1  ;;  %v5579_v11 = vpop.f32.mrf.mxu0 }
 0x460   : > { %v7354_v43 = vadd.f32 %v3320_v51, %v7324_v58  ;;  %v7387_v55 = vadd.f32 %v3322_v2, %v7324_v58 }
 0x461   : > { %v3167_v60 = vpop.f32.mrf.mxu1  ;;  %v3214_v44 = vpop.f32.mrf.mxu0 }
 0x462   : > { %v3321_v46 = vmul.f32 0.17677669, %v3167_v60  ;;  %v3323_v53 = vmul.f32 0.17677669, %v3214_v44  ;;  %v3369_v36 = vsel %vm3344_vm2, %v7354_v43, -inf  ;;  %v3375_v54 = vsel %vm3344_vm2, %v7387_v55, -inf }
 0x463   : > { %v5580_v17 = vpop.f32.mrf.mxu0  ;;  %3370 = vmax.xlane.f32.xlu0 %v3369_v36  ;;  %v5574_v56 = vpop.f32.mrf.mxu1 }
 0x464   : > { %v7362_v5 = vadd.f32 %v3321_v46, %v7329_v9  ;;  %v7365_v27 = vadd.f32 %v3323_v53, %v7329_v9 }
 0x466   : > { %v3372_v7 = vsel %vm3344_vm2, %v7362_v5, -inf  ;;  %v3378_v40 = vsel %vm3344_vm2, %v7365_v27, -inf }
 0x467   : > { %3355 = vmax.xlane.f32.xlu0 %v3354_v34  ;;  %3373 = vmax.xlane.f32.xlu1 %v3372_v7 }
 0x469   : > { %v3258_v63 = vpop.f32.mrf.mxu1  ;;  %v3305_v29 = vpop.f32.mrf.mxu0 }
 0x46a   : > { %v3324_v57 = vmul.f32 0.17677669, %v3258_v63  ;;  %v3326_v23 = vmul.f32 0.17677669, %v3305_v29 }
 0x46b   : > { %v5591_v19 = vpop.f32.mrf.mxu0  ;;  %v5585_v26 = vpop.f32.mrf.mxu1  ;;  %3364 = vmax.xlane.f32.xlu0 %v3363_v47  ;;  %3367 = vmax.xlane.f32.xlu1 %v3366_v31 }
 0x46c   : > { %v7382_v24 = vadd.f32 %v3324_v57, %v7324_v58  ;;  %v7403_v59 = vadd.f32 %v3326_v23, %v7324_v58 }
 0x46d   : > { %v3261_v14 = vpop.f32.mrf.mxu1  ;;  %v3308_v10 = vpop.f32.mrf.mxu0 }
 0x46e   : > { %v3325_v33 = vmul.f32 0.17677669, %v3261_v14  ;;  %v3381_v35 = vsel %vm3344_vm2, %v7382_v24, -inf  ;;  %v3327_v25 = vmul.f32 0.17677669, %v3308_v10  ;;  %v3387_v6 = vsel %vm3344_vm2, %v7403_v59, -inf }
 0x46f   : > { %v5592_v13 = vpop.f32.mrf.mxu0  ;;  %v5586_v22 = vpop.f32.mrf.mxu1  ;;  %3382 = vmax.xlane.f32.xlu0 %v3381_v35 }
 0x470   : > { %v7390_v38 = vadd.f32 %v3325_v33, %v7329_v9  ;;  %v7410_v12 = vadd.f32 %v3327_v25, %v7329_v9 }
 0x472   : > { %v3384_v28 = vsel %vm3344_vm2, %v7390_v38, -inf  ;;  %v3390_v41 = vsel %vm3344_vm2, %v7410_v12, -inf }
 0x473   : > { %3385 = vmax.xlane.f32.xlu1 %v3384_v28  ;;  %3376 = vmax.xlane.f32.xlu0 %v3375_v54 }
 0x484   : > { %2353 = vrot.lane.b32.xlu1 %v6714_v37, %s6306_s10 }
 0x488   : > { %2363 = vrot.lane.b32.xlu1 %v6706_v32, %s6307_s6 }
 0x489   : > { %2351 = vrot.lane.b32.xlu0 %v6706_v32, %s6306_s10 }
 0x4a8   : > { %3388 = vmax.xlane.f32.xlu0 %v3387_v6 }
 0x4ac   : > { %3379 = vmax.xlane.f32.xlu1 %v3378_v40 }
 0x4b0   : > { %3391 = vmax.xlane.f32.xlu1 %v3390_v41 }
 0x4be   : > { %2375 = vrot.lane.b32.xlu0 %v6706_v32, %s6308_s12 }
 0x4c1   : > { %2365 = vrot.lane.b32.xlu1 %v6714_v37, %s6307_s6 }
 0x4cd   : > { %v3347_v58 = vpop.xlane.xlu0 %3346 }
 0x4ce   : > { %v3393_v42 = vsub.f32 %v7327_v45, %v3347_v58 }
 0x4d0   : > { %v3409_v15 = vmul.f32 1.442695, %v3393_v42 }
 0x4d1   : > { %v3350_v0 = vpop.xlane.xlu1 %3349  ;;  %v3359_v51 = vpop.xlane.xlu0 %3358 }
 0x4d2   : > { %5907 = vpow2.f32 %v3409_v15  ;;  %v3394_v9 = vsub.f32 %v7337_v52, %v3350_v0  ;;  %v3397_v30 = vsub.f32 %v7334_v16, %v3359_v51 }
 0x4d4   : > { %v3411_v11 = vmul.f32 1.442695, %v3394_v9  ;;  %v3417_v50 = vmul.f32 1.442695, %v3397_v30 }
 0x4d5   : > { %v3362_v61 = vpop.xlane.xlu1 %3361 }
 0x4d6   : > { %5909 = vpow2.f32 %v3411_v11  ;;  %v3398_v60 = vsub.f32 %v7344_v21, %v3362_v61  ;;  %v3353_v46 = vpop.xlane.xlu0 %3352 }
 0x4d7   : > { %5911 = vpow2.f32 %v3417_v50  ;;  %v3395_v45 = vsub.f32 %v7349_v39, %v3353_v46 }
 0x4d8   : > { %v3419_v44 = vmul.f32 1.442695, %v3398_v60 }
 0x4d9   : > { %v3413_v53 = vmul.f32 1.442695, %v3395_v45 }
 0x4da   : > { %5913 = vpow2.f32 %v3419_v44 }
 0x4db   : > { %5915 = vpow2.f32 %v3413_v53 }
 0x4df   : > { %v7423_v36 = vpop.eup %5907 }
 0x4e0   : > { %v3441_v52 = vsel %vm3344_vm2, %v7423_v36, 0.0 }
 0x4e1   : > { %3442 = vadd.xlane.f32.xlu0 %v3441_v52 }
 0x4e3   : > { %v7427_v16 = vpop.eup %5909 }
 0x4e4   : > { %v7429_v17 = vpop.eup %5911  ;;  %v3444_v21 = vsel %vm3344_vm2, %v7427_v16, 0.0 }
 0x4e5   : > { %v3453_v56 = vsel %vm3344_vm2, %v7429_v17, 0.0  ;;  %3445 = vadd.xlane.f32.xlu1 %v3444_v21 }
 0x4e6   : > { %3454 = vadd.xlane.f32.xlu0 %v3453_v56 }
 0x4e7   : > { %v7435_v39 = vpop.eup %5913 }
 0x4e8   : > { %v3456_v34 = vsel %vm3344_vm2, %v7435_v39, 0.0  ;;  %v7439_v7 = vpop.eup %5915 }
 0x4e9   : > { %3457 = vadd.xlane.f32.xlu1 %v3456_v34  ;;  %v3447_v63 = vsel %vm3344_vm2, %v7439_v7, 0.0 }
 0x4ea   : > { %3448 = vadd.xlane.f32.xlu0 %v3447_v63 }
 0x4ec   : > { %v3371_v29 = vpop.xlane.xlu0 %3370 }
 0x4ed   : > { %v3401_v2 = vsub.f32 %v7354_v43, %v3371_v29 }
 0x4ef   : > { %v3425_v57 = vmul.f32 1.442695, %v3401_v2 }
 0x4f0   : > { %v3374_v47 = vpop.xlane.xlu1 %3373  ;;  %v3356_v31 = vpop.xlane.xlu0 %3355 }
 0x4f1   : > { %5917 = vpow2.f32 %v3425_v57  ;;  %v3402_v19 = vsub.f32 %v7362_v5, %v3374_v47  ;;  %v3396_v26 = vsub.f32 %v7359_v1, %v3356_v31 }
 0x4f3   : > { %v3415_v14 = vmul.f32 1.442695, %v3396_v26  ;;  %v3427_v10 = vmul.f32 1.442695, %v3402_v19 }
 0x4f4   : > { %v3368_v33 = vpop.xlane.xlu1 %3367  ;;  %v3365_v35 = vpop.xlane.xlu0 %3364 }
 0x4f5   : > { %v3400_v13 = vsub.f32 %v7375_v3, %v3368_v33  ;;  %v3399_v22 = vsub.f32 %v7372_v49, %v3365_v35  ;;  %5919 = vpow2.f32 %v3415_v14 }
 0x4f6   : > { %5921 = vpow2.f32 %v3427_v10 }
 0x4f7   : > { %v3421_v28 = vmul.f32 1.442695, %v3399_v22  ;;  %v3423_v43 = vmul.f32 1.442695, %v3400_v13 }
 0x4f8   : > { %v3383_v54 = vpop.xlane.xlu0 %3382 }
 0x4f9   : > { %5923 = vpow2.f32 %v3421_v28  ;;  %v3405_v23 = vsub.f32 %v7382_v24, %v3383_v54 }
 0x4fa   : > { %5925 = vpow2.f32 %v3423_v43 }
 0x4fb   : > { %v3433_v40 = vmul.f32 1.442695, %v3405_v23 }
 0x4fc   : > { %v3377_v5 = vpop.xlane.xlu0 %3376  ;;  %v7478_v50 = vpop.xlane.xlu1 %3385 }
 0x4fd   : > { %v3403_v1 = vsub.f32 %v7387_v55, %v3377_v5 }
 0x4fe   : > { %v7450_v25 = vpop.eup %5917 }
 0x4ff   : > { %v3429_v6 = vmul.f32 1.442695, %v3403_v1  ;;  %v3465_v3 = vsel %vm3344_vm2, %v7450_v25, 0.0 }
 0x500   : > { %3466 = vadd.xlane.f32.xlu0 %v3465_v3  ;;  %v7480_v61 = vpop.permute.xlu1 %2353  ;;  %v2352_v60 = vpop.permute.xlu0 %2351 }
 0x501   : > { %5927 = vpow2.f32 %v3429_v6 }
 0x502   : > { %v7454_v49 = vpop.eup %5919  ;;  %5929 = vpow2.f32 %v3433_v40 }
 0x503   : > { %v3450_v41 = vsel %vm3344_vm2, %v7454_v49, 0.0  ;;  %v7458_v58 = vpop.eup %5921 }
 0x504   : > { %3451 = vadd.xlane.f32.xlu1 %v3450_v41  ;;  %v3468_v55 = vsel %vm3344_vm2, %v7458_v58, 0.0  ;;  %v2364_v44 = vpop.permute.xlu1 %2363 }
 0x505   : > { %v2519_v53 = vcombine.low %v6706_v32, %v2364_v44  ;;  %v2520_v21 = vcombine.high %v6706_v32, %v2364_v44 }
 0x506   : > { %v7460_v24 = vpop.eup %5923 }
 0x507   : > { %v3459_v42 = vsel %vm3344_vm2, %v7460_v24, 0.0  ;;  %v7466_v15 = vpop.eup %5925  ;;  %v2527_v57 = vrot.slane %v2519_v53, %v6793_v62 }
 0x508   : > { %3469 = vadd.xlane.f32.xlu1 %v3468_v55  ;;  %3460 = vadd.xlane.f32.xlu0 %v3459_v42  ;;  %v3462_v0 = vsel %vm3344_vm2, %v7466_v15, 0.0 }
 0x50c   : > { %3463 = vadd.xlane.f32.xlu0 %v3462_v0 }
 0x50e   : > { %v7470_v51 = vpop.eup %5927 }
 0x50f   : > { %v3471_v9 = vsel %vm3344_vm2, %v7470_v51, 0.0  ;;  %v7474_v30 = vpop.eup %5929 }
 0x510   : > { %3472 = vadd.xlane.f32.xlu0 %v3471_v9  ;;  %v3477_v11 = vsel %vm3344_vm2, %v7474_v30, 0.0 }
 0x514   : > { %3478 = vadd.xlane.f32.xlu0 %v3477_v11 }
 0x531   : > { %v3389_v46 = vpop.xlane.xlu0 %3388 }
 0x532   : > { %v3407_v45 = vsub.f32 %v7403_v59, %v3389_v46  ;;  %v2534_v59 = vrot.slane %v2520_v21, %v6793_v62 }
 0x534   : > { %v3437_v52 = vmul.f32 1.442695, %v3407_v45 }
 0x535   : > { %v3380_v56 = vpop.xlane.xlu1 %3379  ;;  %v2376_v34 = vpop.permute.xlu0 %2375 }
 0x536   : > { %v3404_v63 = vsub.f32 %v7365_v27, %v3380_v56  ;;  %5931 = vpow2.f32 %v3437_v52  ;;  %v2535_v29 = vcombine.low %v2352_v60, %v2376_v34  ;;  %v2536_v2 = vcombine.high %v2352_v60, %v2376_v34 }
 0x538   : > { %v3431_v47 = vmul.f32 1.442695, %v3404_v63  ;;  %v2543_v31 = vrot.slane %v2535_v29, %v6793_v62  ;;  %v2550_v19 = vrot.slane %v2536_v2, %v6793_v62 }
 0x539   : > { %v3392_v26 = vpop.xlane.xlu1 %3391 }
 0x53a   : > { %5933 = vpow2.f32 %v3431_v47  ;;  %v3408_v32 = vsub.f32 %v7410_v12, %v3392_v26  ;;  %v2551_v14 = vcombine.low %v2527_v57, %v2543_v31  ;;  %v2552_v10 = vcombine.high %v2527_v57, %v2543_v31 }
 0x53b   : > { %v2567_v33 = vcombine.low %v2534_v59, %v2550_v19  ;;  %v2568_v27 = vcombine.high %v2534_v59, %v2550_v19  ;;  %v3406_v57 = vsub.f32 %v7390_v38, %v7478_v50 }
 0x53c   : > { %v3439_v35 = vmul.f32 1.442695, %v3408_v32  ;;  %v2559_v13 = vrot.slane %v2551_v14, %v6798_v4  ;;  %v2566_v22 = vrot.slane %v2552_v10, %v6798_v4 }
 0x53d   : > { %v2575_v28 = vrot.slane %v2567_v33, %v6798_v4  ;;  %v2582_v43 = vrot.slane %v2568_v27, %v6798_v4  ;;  %v3435_v47 = vmul.f32 1.442695, %v3406_v57  ;;  %v7535_v31 = vpop.permute.xlu1 %2365 }
 0x53e   : > { %5935 = vpow2.f32 %v3439_v35  ;;  %v2791_v54 = vcombine.low %v2559_v13, %v2566_v22  ;;  %v5366_v23 = vcombine.high %v2559_v13, %v2566_v22 }
 0x53f   : > { %v2807_v5 = vcombine.low %v2575_v28, %v2582_v43  ;;  %v5367_v1 = vcombine.high %v2575_v28, %v2582_v43  ;;  %5937 = vpow2.f32 %v3435_v47 }
 0x540   : > { %v2798_v12 = vrot.slane %v2791_v54, %v6793_v62  ;;  %v2806_v6 = vrot.slane %v5366_v23, %v6793_v62 }
 0x541   : > { %v2814_v3 = vrot.slane %v2807_v5, %v6793_v62  ;;  %v2822_v40 = vrot.slane %v5367_v1, %v6793_v62 }
 0x542   : > { %v2823_v41 = vcombine.low %v2798_v12, %v2806_v6  ;;  %v2824_v55 = vcombine.high %v2798_v12, %v2806_v6 }
 0x543   : > { %v7499_v42 = vpop.eup %5931  ;;  %v2839_v0 = vcombine.low %v2814_v3, %v2822_v40  ;;  %v2840_v9 = vcombine.high %v2814_v3, %v2822_v40 }
 0x544   : > { %v3483_v11 = vsel %vm3344_vm2, %v7499_v42, 0.0  ;;  %v7504_v60 = vrot.slane %v2823_v41, %v6798_v4  ;;  %v7507_v44 = vrot.slane %v2824_v55, %v6798_v4 }
 0x545   : > { %3484 = vadd.xlane.f32.xlu0 %v3483_v11  ;;  %v7510_v46 = vrot.slane %v2839_v0, %v6798_v4  ;;  %v7513_v45 = vrot.slane %v2840_v9, %v6798_v4  ;;  %v2587_v11 = vcombine.low %v6714_v37, %v7535_v31 }
 0x547   : > { %v7515_v53 = vpop.eup %5933  ;;  %v2855_v52 = vcombine.low %v7504_v60, %v7510_v46  ;;  %v2856_v21 = vcombine.high %v7504_v60, %v7510_v46  ;;  %v2857_v56 = vcombine.low %v7507_v44, %v7513_v45  ;;  %v2858_v34 = vcombine.high %v7507_v44, %v7513_v45 }
 0x548   : > { %v3474_v63 = vsel %vm3344_vm2, %v7515_v53, 0.0  ;;  %v2595_v47 = vrot.slane %v2587_v11, %v6793_v62  ;;  %v7955_v45 = vmov 0  }
 0x549   : > { %3475 = vadd.xlane.f32.xlu1 %v3474_v63  ;;  %v2588_v63 = vcombine.high %v6714_v37, %v7535_v31 }
 0x54b   : > { %v7527_v29 = vpop.eup %5935 }
 0x54c   : > { %v3486_v2 = vsel %vm3344_vm2, %v7527_v29, 0.0  ;;  %v7537_v14 = vpop.eup %5937 }
 0x54d   : > { %3487 = vadd.xlane.f32.xlu0 %v3486_v2  ;;  %v3480_v27 = vsel %vm3344_vm2, %v7537_v14, 0.0 }
 0x55a   : > { %2377 = vrot.lane.b32.xlu1 %v6714_v37, %s6308_s12 }
 0x56a   : > { %v3443_v19 = vpop.xlane.xlu0 %3442 }
 0x56b   : > { %5939 = vrcp.f32 %v3443_v19  ;;  %v2602_v19 = vrot.slane %v2588_v63, %v6793_v62 }
 0x56e   : > { %v3446_v59 = vpop.xlane.xlu1 %3445 }
 0x56f   : > { %5941 = vrcp.f32 %v3446_v59  ;;  %v3455_v26 = vpop.xlane.xlu0 %3454 }
 0x572   : > { %v3458_v32 = vpop.xlane.xlu1 %3457 }
 0x573   : > { %5943 = vrcp.f32 %v3458_v32 }
 0x574   : > { %5945 = vrcp.f32 %v3455_v26 }
 0x578   : > { %v5940_v10 = vpop.eup %5939 }
 0x579   : > { %v3505_v38 = vmul.f32 %v5940_v10, %v7423_v36 }
 0x57c   : > { %v5942_v33 = vpop.eup %5941 }
 0x57d   : > { %v3506_v50 = vmul.f32 %v5942_v33, %v7427_v16  ;;  %v3449_v16 = vpop.xlane.xlu0 %3448 }
 0x57e   : > { %3481 = vadd.xlane.f32.xlu1 %v3480_v27  ;;  %5947 = vrcp.f32 %v3449_v16 }
 0x57f   : > { %v3521_v35 = vpack.c.bf16 %v3506_v50, %v3505_v38 }
 0x580   : > { %v5944_v13 = vpop.eup %5943 }
 0x581   : > { %5596 = vmatmul.mubr.msk.bf16.vlgmr.msra.gmra.mxu1 %vm3344_vm2, %v3521_v35  ;;  %v5946_v22 = vpop.eup %5945  ;;  %v3510_v28 = vmul.f32 %v5944_v13, %v7435_v39 }
 0x582   : > { %5606 = vmatpush3.bf16.msra.mxu1 %v7314_v8  ;;  %5607 = vmatprep.mubr.msk.bf16.mxu1 %vm6310_vm0, %v6309_v48  ;;  %v3509_v43 = vmul.f32 %v5946_v22, %v7429_v17 }
 0x583   : > { %5617 = vmatprep.subr.bf16.mxu1 %v6309_v48 }
 0x584   : > { %v3523_v36 = vpack.c.bf16 %v3510_v28, %v3509_v43 }
 0x589   : > { %5608 = vmatmul.mubr.msk.bf16.vlgmr.msra.gmra.mxu1 %vm3344_vm2, %v3523_v36  ;;  %v3467_v54 = vpop.xlane.xlu0 %3466 }
 0x58a   : > { %5619 = vmatprep.mubr.msk.bf16.mxu1 %vm6310_vm0, %v6309_v48 }
 0x58b   : > { %v5948_v39 = vpop.eup %5947 }
 0x58c   : > { %v3507_v12 = vmul.f32 %v5948_v39, %v7439_v7 }
 0x58d   : > { %v3452_v23 = vpop.xlane.xlu1 %3451 }
 0x58e   : > { %5949 = vrcp.f32 %v3452_v23 }
 0x591   : > { %v3461_v8 = vpop.xlane.xlu0 %3460 }
 0x592   : > { %5951 = vrcp.f32 %v3461_v8 }
 0x595   : > { %v3464_v5 = vpop.xlane.xlu0 %3463 }
 0x596   : > { %5953 = vrcp.f32 %v3464_v5 }
 0x599   : > { %v3473_v7 = vpop.xlane.xlu0 %3472 }
 0x59b   : > { %v5950_v1 = vpop.eup %5949 }
 0x59c   : > { %v3508_v17 = vmul.f32 %v5950_v1, %v7454_v49  ;;  %v3470_v49 = vpop.xlane.xlu1 %3469 }
 0x59d   : > { %5955 = vrcp.f32 %v3470_v49 }
 0x59e   : > { %v3522_v6 = vpack.c.bf16 %v3508_v17, %v3507_v12 }
 0x59f   : > { %v5952_v3 = vpop.eup %5951 }
 0x5a0   : > { %5602 = vmatmul.mubr.msk.bf16.vlgmr.msra.gmra.mxu0 %vm3344_vm2, %v3522_v6  ;;  %v3511_v41 = vmul.f32 %v5952_v3, %v7460_v24 }
 0x5a1   : > { %5612 = vmatpush3.bf16.msra.mxu0 %v7316_v20  ;;  %5613 = vmatprep.mubr.msk.bf16.mxu0 %vm6310_vm0, %v6309_v48  ;;  %v7565_v20 = vpop.xlane.xlu0 %3478 }
 0x5a2   : > { %5623 = vmatprep.subr.bf16.mxu0 %v6309_v48 }
 0x5a3   : > { %v5954_v40 = vpop.eup %5953 }
 0x5a4   : > { %v3512_v55 = vmul.f32 %v5954_v40, %v7466_v15 }
 0x5a6   : > { %v3524_v0 = vpack.c.bf16 %v3512_v55, %v3511_v41 }
 0x5a8   : > { %5614 = vmatmul.mubr.msk.bf16.vlgmr.msra.gmra.mxu0 %vm3344_vm2, %v3524_v0 }
 0x5a9   : > { %5625 = vmatprep.mubr.msk.bf16.mxu0 %vm6310_vm0, %v6309_v48 }
 0x5aa   : > { %v5956_v1 = vpop.eup %5955 }
 0x5ab   : > { %v3514_v11 = vmul.f32 %v5956_v1, %v7458_v58 }
 0x5ce   : > { %v3485_v15 = vpop.xlane.xlu0 %3484 }
 0x5d2   : > { %v3476_v9 = vpop.xlane.xlu1 %3475 }
 0x5d3   : > { %5957 = vrcp.f32 %v3476_v9 }
 0x5d4   : > { %5959 = vrcp.f32 %v3467_v54 }
 0x5d5   : > { %5961 = vrcp.f32 %v3473_v7 }
 0x5d6   : > { %v2378_v24 = vpop.permute.xlu1 %2377  ;;  %v3488_v50 = vpop.xlane.xlu0 %3487 }
 0x5d7   : > { %v2603_v2 = vcombine.low %v7480_v61, %v2378_v24  ;;  %v2604_v57 = vcombine.high %v7480_v61, %v2378_v24  ;;  %5963 = vrcp.f32 %v3488_v50 }
 0x5d8   : > { %5965 = vrcp.f32 %v3485_v15 }
 0x5d9   : > { %v2611_v59 = vrot.slane %v2603_v2, %v6793_v62  ;;  %v2618_v26 = vrot.slane %v2604_v57, %v6793_v62  ;;  %5967 = vrcp.f32 %v7565_v20 }
 0x5db   : > { %v2619_v32 = vcombine.low %v2595_v47, %v2611_v59  ;;  %v2620_v37 = vcombine.high %v2595_v47, %v2611_v59  ;;  %v2635_v31 = vcombine.low %v2602_v19, %v2618_v26  ;;  %v2636_v10 = vcombine.high %v2602_v19, %v2618_v26 }
 0x5dd   : > { %v2627_v33 = vrot.slane %v2619_v32, %v6798_v4  ;;  %v2634_v27 = vrot.slane %v2620_v37, %v6798_v4  ;;  %v2643_v61 = vrot.slane %v2635_v31, %v6798_v4  ;;  %v2650_v38 = vrot.slane %v2636_v10, %v6798_v4 }
 0x5df   : > { %v2859_v35 = vcombine.low %v2627_v33, %v2634_v27  ;;  %v5368_v13 = vcombine.high %v2627_v33, %v2634_v27  ;;  %v2875_v22 = vcombine.low %v2643_v61, %v2650_v38  ;;  %v5369_v28 = vcombine.high %v2643_v61, %v2650_v38 }
 0x5e0   : > { %v5958_v12 = vpop.eup %5957 }
 0x5e1   : > { %v2866_v43 = vrot.slane %v2859_v35, %v6793_v62  ;;  %v2874_v36 = vrot.slane %v5368_v13, %v6793_v62  ;;  %v2882_v16 = vrot.slane %v2875_v22, %v6793_v62  ;;  %v2890_v54 = vrot.slane %v5369_v28, %v6793_v62  ;;  %v5960_v41 = vpop.eup %5959 }
 0x5e2   : > { %v5962_v55 = vpop.eup %5961  ;;  %v3516_v63 = vmul.f32 %v5958_v12, %v7515_v53  ;;  %v3513_v58 = vmul.f32 %v5960_v41, %v7450_v25 }
 0x5e3   : > { %v2891_v23 = vcombine.low %v2866_v43, %v2874_v36  ;;  %v2907_v8 = vcombine.low %v2882_v16, %v2890_v54  ;;  %v2892_v5 = vcombine.high %v2866_v43, %v2874_v36  ;;  %v2908_v39 = vcombine.high %v2882_v16, %v2890_v54 }
 0x5e4   : > { %v3515_v53 = vmul.f32 %v5962_v55, %v7470_v51  ;;  %v3525_v47 = vpack.c.bf16 %v3514_v11, %v3513_v58  ;;  %v5964_v60 = vpop.eup %5963 }
 0x5e5   : > { %v2899_v17 = vrot.slane %v2891_v23, %v6798_v4  ;;  %v2915_v6 = vrot.slane %v2907_v8, %v6798_v4  ;;  %v2906_v3 = vrot.slane %v2892_v5, %v6798_v4  ;;  %v2922_v40 = vrot.slane %v2908_v39, %v6798_v4  ;;  %v5966_v46 = vpop.eup %5965 }
 0x5e6   : > { %v3520_v25 = vmul.f32 %v5964_v60, %v7527_v29  ;;  %v3519_v51 = vmul.f32 %v5966_v46, %v7499_v42 }
 0x5e7   : > { %v2923_v0 = vcombine.low %v2899_v17, %v2915_v6  ;;  %v2924_v7 = vcombine.high %v2899_v17, %v2915_v6  ;;  %v2925_v49 = vcombine.low %v2906_v3, %v2922_v40  ;;  %v2926_v9 = vcombine.high %v2906_v3, %v2922_v40 }
 0x5e8   : > { %v3528_v44 = vpack.c.bf16 %v3520_v25, %v3519_v51 }
 0x5e9   : > { %v2931_v24 = vpack.c.bf16 %v2923_v0, %v2855_v52  ;;  %v2932_v15 = vpack.c.bf16 %v2924_v7, %v2856_v21  ;;  %v2933_v2 = vpack.c.bf16 %v2925_v49, %v2857_v56  ;;  %v2934_v57 = vpack.c.bf16 %v2926_v9, %v2858_v34  ;;  %v5968_v56 = vpop.eup %5967 }
 0x5ea   : > { %v3526_v52 = vpack.c.bf16 %v3516_v63, %v3515_v53  ;;  %v3517_v19 = vmul.f32 %v5968_v56, %v7474_v30 }
 0x5eb   : > { %5618 = vmatpush3.bf16.msra.mxu1 %v2931_v24  ;;  %5624 = vmatpush3.bf16.msra.mxu0 %v2932_v15 }
 0x5ec   : > { %5629 = vmatprep.subr.bf16.mxu1 %v6309_v48  ;;  %5635 = vmatprep.subr.bf16.mxu0 %v6309_v48 }
 0x5ee   : > { %5620 = vmatmul.mubr.msk.bf16.vlgmr.msra.gmra.mxu1 %vm3344_vm2, %v3525_v47  ;;  %5626 = vmatmul.mubr.msk.bf16.vlgmr.msra.gmra.mxu0 %vm3344_vm2, %v3526_v52 }
 0x5ef   : > { %5630 = vmatpush3.bf16.msra.mxu1 %v2933_v2  ;;  %5636 = vmatpush3.bf16.msra.mxu0 %v2934_v57 }
 0x5f0   : > { %5637 = vmatprep.mubr.msk.bf16.mxu0 %vm6310_vm0, %v6309_v48  ;;  %5631 = vmatprep.mubr.msk.bf16.mxu1 %vm6310_vm0, %v6309_v48 }
 0x5f6   : > { %5638 = vmatmul.mubr.msk.bf16.vlgmr.msra.gmra.mxu0 %vm3344_vm2, %v3528_v44 }
 0x5f7   : > { %4821 = vmatprep.mubr.bf16.mxu0 %v7955_v45 }
 0x607   : > { %v3482_v21 = vpop.xlane.xlu1 %3481 }
 0x608   : > { %5969 = vrcp.f32 %v3482_v21 }
 0x615   : > { %v5970_v34 = vpop.eup %5969 }
 0x616   : > { %v3518_v29 = vmul.f32 %v5970_v34, %v7537_v14 }
 0x618   : > { %v3527_v59 = vpack.c.bf16 %v3518_v29, %v3517_v19 }
 0x61a   : > { %5632 = vmatmul.mubr.msk.bf16.vlgmr.msra.gmra.mxu1 %vm3344_vm2, %v3527_v59 }
 0x641   : > { %v3566_v48 = vpop.f32.mrf.mxu1 }
 0x643   : > { %v5597_v42 = vpop.f32.mrf.mxu1 }
 0x645   : > { %v3569_v26 = vpop.f32.mrf.mxu1 }
 0x647   : > { %v5598_v32 = vpop.f32.mrf.mxu1 }
 0x649   : > { %v3654_v37 = vpop.f32.mrf.mxu1 }
 0x64a   : > { %v3881_v50 = vcombine.low %v3566_v48, %v3654_v37  ;;  %v3882_v35 = vcombine.high %v3566_v48, %v3654_v37 }
 0x64b   : > { %v5609_v31 = vpop.f32.mrf.mxu1 }
 0x64c   : > { %v3889_v28 = vrot.slane %v3881_v50, %v6793_v62  ;;  %v3896_v43 = vrot.slane %v3882_v35, %v6793_v62 }
 0x64d   : > { %v3657_v10 = vpop.f32.mrf.mxu1 }
 0x64e   : > { %v3949_v54 = vcombine.low %v3569_v26, %v3657_v10  ;;  %v3950_v23 = vcombine.high %v3569_v26, %v3657_v10 }
 0x64f   : > { %v5610_v33 = vpop.f32.mrf.mxu1 }
 0x650   : > { %v3957_v7 = vrot.slane %v3949_v54, %v6793_v62  ;;  %v3964_v49 = vrot.slane %v3950_v23, %v6793_v62 }
 0x660   : > { %v3610_v20 = vpop.f32.mrf.mxu0 }
 0x662   : > { %v5603_v27 = vpop.f32.mrf.mxu0 }
 0x664   : > { %v3613_v61 = vpop.f32.mrf.mxu0 }
 0x666   : > { %v5604_v38 = vpop.f32.mrf.mxu0 }
 0x668   : > { %v3698_v30 = vpop.f32.mrf.mxu0 }
 0x669   : > { %v3897_v13 = vcombine.low %v3610_v20, %v3698_v30  ;;  %v3898_v14 = vcombine.high %v3610_v20, %v3698_v30 }
 0x66a   : > { %v5615_v22 = vpop.f32.mrf.mxu0 }
 0x66b   : > { %v3905_v36 = vrot.slane %v3897_v13, %v6793_v62  ;;  %v3912_v16 = vrot.slane %v3898_v14, %v6793_v62 }
 0x66c   : > { %v3701_v8 = vpop.f32.mrf.mxu0 }
 0x66d   : > { %v3913_v5 = vcombine.low %v3889_v28, %v3905_v36  ;;  %v3914_v39 = vcombine.high %v3889_v28, %v3905_v36  ;;  %v3929_v1 = vcombine.low %v3896_v43, %v3912_v16  ;;  %v3930_v12 = vcombine.high %v3896_v43, %v3912_v16 }
 0x66e   : > { %v3965_v17 = vcombine.low %v3613_v61, %v3701_v8  ;;  %v3966_v6 = vcombine.high %v3613_v61, %v3701_v8  ;;  %v5616_v3 = vpop.f32.mrf.mxu0 }
 0x66f   : > { %v3921_v40 = vrot.slane %v3913_v5, %v6798_v4  ;;  %v3928_v41 = vrot.slane %v3914_v39, %v6798_v4  ;;  %v3937_v55 = vrot.slane %v3929_v1, %v6798_v4  ;;  %v3944_v0 = vrot.slane %v3930_v12, %v6798_v4  ;;  %v5851_v39 = vld [vmem:[%s6633_s7 + $0x38] sm:$0xff]   ;;  %v5852_v1 = vld [vmem:[%s6633_s7 + $0x30] sm:$0xff]  }
 0x670   : > { %v3973_v9 = vrot.slane %v3965_v17, %v6793_v62  ;;  %v3980_v11 = vrot.slane %v3966_v6, %v6793_v62  ;;  %5641 = vmatprep.subr.bf16.mxu1 %v5851_v39 }
 0x671   : > { %v4153_v63 = vcombine.low %v3921_v40, %v3928_v41  ;;  %v5386_v24 = vcombine.high %v3921_v40, %v3928_v41  ;;  %v4169_v15 = vcombine.low %v3937_v55, %v3944_v0  ;;  %v5387_v2 = vcombine.high %v3937_v55, %v3944_v0  ;;  %5642 = vmatpush3.bf16.msra.mxu1 %v5851_v39  ;;  %v5853_v40 = vld [vmem:[%s6633_s7 + $0x28] sm:$0xff]   ;;  %v5854_v55 = vld [vmem:[%s6633_s7 + $0x20] sm:$0xff]   ;;  %v5855_v0 = vld [vmem:[%s6633_s7 + $0x18] sm:$0xff]  }
 0x672   : > { %v3981_v57 = vcombine.low %v3957_v7, %v3973_v9  ;;  %v3982_v58 = vcombine.high %v3957_v7, %v3973_v9  ;;  %v3997_v53 = vcombine.low %v3964_v49, %v3980_v11  ;;  %v3998_v47 = vcombine.high %v3964_v49, %v3980_v11  ;;  %5643 = vmatprep.subr.bf16.mxu1 %v5852_v1 }
 0x673   : > { %v4160_v52 = vrot.slane %v4153_v63, %v6793_v62  ;;  %v4168_v60 = vrot.slane %v5386_v24, %v6793_v62  ;;  %v4176_v46 = vrot.slane %v4169_v15, %v6793_v62  ;;  %v4184_v25 = vrot.slane %v5387_v2, %v6793_v62 }
 0x674   : > { %v3989_v51 = vrot.slane %v3981_v57, %v6798_v4  ;;  %v3996_v44 = vrot.slane %v3982_v58, %v6798_v4  ;;  %v4005_v21 = vrot.slane %v3997_v53, %v6798_v4  ;;  %v4012_v56 = vrot.slane %v3998_v47, %v6798_v4 }
 0x675   : > { %v4186_v34 = vcombine.high %v4160_v52, %v4168_v60  ;;  %v4202_v19 = vcombine.high %v4176_v46, %v4184_v25  ;;  %v4185_v29 = vcombine.low %v4160_v52, %v4168_v60  ;;  %v4201_v59 = vcombine.low %v4176_v46, %v4184_v25  ;;  %5644 = vmatpush3.bf16.msra.mxu1 %v5852_v1 }
 0x676   : > { %v4221_v48 = vcombine.low %v3989_v51, %v3996_v44  ;;  %v5388_v42 = vcombine.high %v3989_v51, %v3996_v44  ;;  %v4237_v26 = vcombine.low %v4005_v21, %v4012_v56  ;;  %v5389_v32 = vcombine.high %v4005_v21, %v4012_v56  ;;  %5645 = vmatprep.subr.bf16.mxu1 %v5853_v40 }
 0x677   : > { %v7642_v37 = vrot.slane %v4185_v29, %v6798_v4  ;;  %v7645_v31 = vrot.slane %v4201_v59, %v6798_v4  ;;  %v4200_v61 = vrot.slane %v4186_v34, %v6798_v4  ;;  %v4216_v38 = vrot.slane %v4202_v19, %v6798_v4 }
 0x678   : > { %v4228_v10 = vrot.slane %v4221_v48, %v6793_v62  ;;  %v4236_v33 = vrot.slane %v5388_v42, %v6793_v62  ;;  %v4244_v20 = vrot.slane %v4237_v26, %v6793_v62  ;;  %v4252_v27 = vrot.slane %v5389_v32, %v6793_v62 }
 0x679   : > { %v4217_v50 = vcombine.low %v7642_v37, %v7645_v31  ;;  %v4219_v16 = vcombine.low %v4200_v61, %v4216_v38  ;;  %v4218_v23 = vcombine.high %v7642_v37, %v7645_v31  ;;  %v4220_v3 = vcombine.high %v4200_v61, %v4216_v38  ;;  %5646 = vmatpush3.bf16.msra.mxu1 %v5853_v40 }
 0x67a   : > { %v4254_v35 = vcombine.high %v4228_v10, %v4236_v33  ;;  %v4270_v30 = vcombine.high %v4244_v20, %v4252_v27  ;;  %v4253_v13 = vcombine.low %v4228_v10, %v4236_v33  ;;  %v4269_v14 = vcombine.low %v4244_v20, %v4252_v27  ;;  %5647 = vmatprep.subr.bf16.mxu1 %v5854_v55 }
 0x67c   : > { %v4268_v22 = vrot.slane %v4254_v35, %v6798_v4  ;;  %v4284_v28 = vrot.slane %v4270_v30, %v6798_v4  ;;  %v7658_v43 = vrot.slane %v4253_v13, %v6798_v4  ;;  %v7661_v36 = vrot.slane %v4269_v14, %v6798_v4 }
 0x67d   : > { %5648 = vmatpush3.bf16.msra.mxu1 %v5854_v55 }
 0x67e   : > { %v4287_v54 = vcombine.low %v4268_v22, %v4284_v28  ;;  %v4286_v8 = vcombine.high %v7658_v43, %v7661_v36  ;;  %v4285_v5 = vcombine.low %v7658_v43, %v7661_v36  ;;  %v4288_v6 = vcombine.high %v4268_v22, %v4284_v28  ;;  %5649 = vmatprep.subr.bf16.mxu1 %v5855_v0 }
 0x680   : > { %v5794_v12 = vpack.i.bf16 %v4287_v54, %v4219_v16  ;;  %v5789_v17 = vpack.i.bf16 %v4286_v8, %v4218_v23  ;;  %v5799_v41 = vpack.i.bf16 %v4288_v6, %v4220_v3 }
 0x681   : > { %5650 = vmatpush3.bf16.msra.mxu1 %v5855_v0 }
 0x682   : > { %5795 = vrot.lane.b32.xlu1 %v5794_v12, %s6307_s6  ;;  %5790 = vrot.lane.b32.xlu0 %v5789_v17, %s6308_s12 }
 0x686   : > { %5800 = vrot.lane.b32.xlu0 %v5799_v41, %s6306_s10 }
 0x6ae   : > { %v3742_v7 = vpop.f32.mrf.mxu1  ;;  %v3786_v49 = vpop.f32.mrf.mxu0 }
 0x6b0   : > { %v5621_v9 = vpop.f32.mrf.mxu1  ;;  %v5627_v11 = vpop.f32.mrf.mxu0 }
 0x6b2   : > { %v3745_v63 = vpop.f32.mrf.mxu1  ;;  %v3789_v24 = vpop.f32.mrf.mxu0 }
 0x6b4   : > { %v5622_v15 = vpop.f32.mrf.mxu1  ;;  %v5628_v2 = vpop.f32.mrf.mxu0 }
 0x6b6   : > { %v3874_v57 = vpop.f32.mrf.mxu0 }
 0x6b7   : > { %v4033_v52 = vcombine.low %v3786_v49, %v3874_v57  ;;  %v4034_v60 = vcombine.high %v3786_v49, %v3874_v57 }
 0x6b8   : > { %v5639_v58 = vpop.f32.mrf.mxu0 }
 0x6b9   : > { %v4041_v21 = vrot.slane %v4033_v52, %v6793_v62  ;;  %v4048_v56 = vrot.slane %v4034_v60, %v6793_v62 }
 0x6ba   : > { %v3877_v53 = vpop.f32.mrf.mxu0 }
 0x6bb   : > { %v4101_v29 = vcombine.low %v3789_v24, %v3877_v53  ;;  %v4102_v59 = vcombine.high %v3789_v24, %v3877_v53  ;;  %v5856_v53 = vld [vmem:[%s6633_s7 + $0x10] sm:$0xff]  }
 0x6bc   : > { %v5640_v47 = vpop.f32.mrf.mxu0  ;;  %5651 = vmatprep.subr.bf16.mxu1 %v5856_v53 }
 0x6bd   : > { %v4109_v13 = vrot.slane %v4101_v29, %v6793_v62  ;;  %v4116_v14 = vrot.slane %v4102_v59, %v6793_v62  ;;  %5652 = vmatpush3.bf16.msra.mxu1 %v5856_v53  ;;  %v5857_v29 = vld [vmem:[%s6633_s7 + $0x8] sm:$0xff]  }
 0x6be   : > { %5653 = vmatprep.subr.bf16.mxu1 %v5857_v29 }
 0x6c1   : > { %5654 = vmatpush3.bf16.msra.mxu1 %v5857_v29 }
 0x6da   : > { %v3830_v46 = vpop.f32.mrf.mxu1 }
 0x6db   : > { %v4017_v25 = vcombine.low %v3742_v7, %v3830_v46  ;;  %v4018_v51 = vcombine.high %v3742_v7, %v3830_v46 }
 0x6dc   : > { %v5633_v44 = vpop.f32.mrf.mxu1 }
 0x6dd   : > { %v4025_v34 = vrot.slane %v4017_v25, %v6793_v62  ;;  %v4032_v19 = vrot.slane %v4018_v51, %v6793_v62 }
 0x6de   : > { %v3833_v48 = vpop.f32.mrf.mxu1 }
 0x6df   : > { %v4049_v42 = vcombine.low %v4025_v34, %v4041_v21  ;;  %v4050_v26 = vcombine.high %v4025_v34, %v4041_v21  ;;  %v4065_v32 = vcombine.low %v4032_v19, %v4048_v56  ;;  %v4066_v10 = vcombine.high %v4032_v19, %v4048_v56 }
 0x6e0   : > { %v4085_v33 = vcombine.low %v3745_v63, %v3833_v48  ;;  %v4086_v20 = vcombine.high %v3745_v63, %v3833_v48  ;;  %v5634_v27 = vpop.f32.mrf.mxu1 }
 0x6e1   : > { %v4057_v61 = vrot.slane %v4049_v42, %v6798_v4  ;;  %v4064_v38 = vrot.slane %v4050_v26, %v6798_v4  ;;  %v4073_v35 = vrot.slane %v4065_v32, %v6798_v4  ;;  %v4080_v30 = vrot.slane %v4066_v10, %v6798_v4 }
 0x6e2   : > { %v4093_v22 = vrot.slane %v4085_v33, %v6793_v62  ;;  %v4100_v28 = vrot.slane %v4086_v20, %v6793_v62 }
 0x6e3   : > { %v4289_v16 = vcombine.low %v4057_v61, %v4064_v38  ;;  %v5390_v54 = vcombine.high %v4057_v61, %v4064_v38  ;;  %v4305_v23 = vcombine.low %v4073_v35, %v4080_v30  ;;  %v5391_v8 = vcombine.high %v4073_v35, %v4080_v30  ;;  %v5858_v38 = vld [vmem:[%s6633_s7] sm:$0xff]  }
 0x6e4   : > { %v4117_v39 = vcombine.low %v4093_v22, %v4109_v13  ;;  %v4118_v1 = vcombine.high %v4093_v22, %v4109_v13  ;;  %v4133_v12 = vcombine.low %v4100_v28, %v4116_v14  ;;  %v4134_v17 = vcombine.high %v4100_v28, %v4116_v14  ;;  %5655 = vmatprep.subr.bf16.mxu1 %v5858_v38 }
 0x6e5   : > { %v4296_v6 = vrot.slane %v4289_v16, %v6793_v62  ;;  %v4304_v3 = vrot.slane %v5390_v54, %v6793_v62  ;;  %v4312_v40 = vrot.slane %v4305_v23, %v6793_v62  ;;  %v4320_v41 = vrot.slane %v5391_v8, %v6793_v62  ;;  %5656 = vmatpush3.bf16.msra.mxu1 %v5858_v38 }
 0x6e6   : > { %v4125_v55 = vrot.slane %v4117_v39, %v6798_v4  ;;  %v4132_v0 = vrot.slane %v4118_v1, %v6798_v4  ;;  %v4141_v7 = vrot.slane %v4133_v12, %v6798_v4  ;;  %v4148_v49 = vrot.slane %v4134_v17, %v6798_v4 }
 0x6e7   : > { %v4321_v9 = vcombine.low %v4296_v6, %v4304_v3  ;;  %v4337_v11 = vcombine.low %v4312_v40, %v4320_v41  ;;  %v4322_v51 = vcombine.high %v4296_v6, %v4304_v3  ;;  %v4338_v44 = vcombine.high %v4312_v40, %v4320_v41 }
 0x6e8   : > { %v4357_v63 = vcombine.low %v4125_v55, %v4132_v0  ;;  %v5392_v24 = vcombine.high %v4125_v55, %v4132_v0  ;;  %v4373_v15 = vcombine.low %v4141_v7, %v4148_v49  ;;  %v5393_v2 = vcombine.high %v4141_v7, %v4148_v49 }
 0x6e9   : > { %v7698_v57 = vrot.slane %v4321_v9, %v6798_v4  ;;  %v7701_v58 = vrot.slane %v4337_v11, %v6798_v4  ;;  %v4336_v26 = vrot.slane %v4322_v51, %v6798_v4  ;;  %v4352_v20 = vrot.slane %v4338_v44, %v6798_v4  ;;  %v5979_v51 = vld [vmem:[#allocation13] sm:$0xff] }
 0x6ea   : > { %v4364_v47 = vrot.slane %v4357_v63, %v6793_v62  ;;  %v4372_v52 = vrot.slane %v5392_v24, %v6793_v62  ;;  %v4380_v60 = vrot.slane %v4373_v15, %v6793_v62  ;;  %v4388_v46 = vrot.slane %v5393_v2, %v6793_v62 }
 0x6eb   : > { %v4353_v25 = vcombine.low %v7698_v57, %v7701_v58  ;;  %v4354_v32 = vcombine.high %v7698_v57, %v7701_v58  ;;  %v4355_v35 = vcombine.low %v4336_v26, %v4352_v20  ;;  %v4356_v39 = vcombine.high %v4336_v26, %v4352_v20  ;;  %v5859_v26 = vld [vmem:[%s6635_s16 + $0x70] ss:$8 sps:$4 sm:$0xff]  }
 0x6ec   : > { %v4389_v21 = vcombine.low %v4364_v47, %v4372_v52  ;;  %v4405_v56 = vcombine.low %v4380_v60, %v4388_v46  ;;  %v4390_v34 = vcombine.high %v4364_v47, %v4372_v52  ;;  %v4406_v19 = vcombine.high %v4380_v60, %v4388_v46  ;;  %v5394_v47 = vld [vmem:[%s777_s14] ss:$0 sm:$0xff] }
 0x6ee   : > { %v4397_v59 = vrot.slane %v4389_v21, %v6798_v4  ;;  %v4413_v48 = vrot.slane %v4405_v56, %v6798_v4  ;;  %v4404_v42 = vrot.slane %v4390_v34, %v6798_v4  ;;  %v4420_v62 = vrot.slane %v4406_v19, %v6798_v4  ;;  %v5980_v34 = vld [vmem:[#allocation13 + $0x10] sm:$0xff] }
 0x6f0   : > { %v4422_v10 = vcombine.high %v4397_v59, %v4413_v48  ;;  %v4421_v33 = vcombine.low %v4397_v59, %v4413_v48  ;;  %v4423_v61 = vcombine.low %v4404_v42, %v4420_v62  ;;  %v4424_v16 = vcombine.high %v4404_v42, %v4420_v62  ;;  %v5981_v59 = vld [vmem:[#allocation13 + $0x8] sm:$0xff]  ;;  %v5982_v42 = vld [vmem:[#allocation13 + $0x18] sm:$0xff] }
 0x6f2   : > { %v5804_v27 = vpack.i.bf16 %v4422_v10, %v4354_v32  ;;  %v5809_v14 = vpack.i.bf16 %v4423_v61, %v4355_v35  ;;  %v5814_v12 = vpack.i.bf16 %v4424_v16, %v4356_v39  ;;  %v5861_v32 = vld [vmem:[%s6635_s16 + $0x74] ss:$8 sps:$4 sm:$0xff]   ;;  %v5864_v39 = vld [vmem:[%s6635_s16 + $0x64] ss:$8 sps:$4 sm:$0xff]  }
 0x6f3   : > { %4789 = vmatprep.subr.bf16.mxu0 %v5861_v32 }
 0x6f4   : > { %5805 = vrot.lane.b32.xlu1 %v5804_v27, %s6308_s12  ;;  %v5796_v30 = vpop.permute.xlu1 %5795  ;;  %v5791_v13 = vpop.permute.xlu0 %5790  ;;  %4790 = vmatpush1.bf16.msra.mxu0 %v5859_v26 }
 0x6f5   : > { %v5793_v22 = vunpack.i.h.bf16 %v5791_v13  ;;  %v5792_v28 = vunpack.i.l.bf16 %v5791_v13  ;;  %v5798_v54 = vunpack.i.h.bf16 %v5796_v30  ;;  %v5797_v23 = vunpack.i.l.bf16 %v5796_v30  ;;  %4791 = vmatprep.subr.bf16.mxu0 %v5864_v39  ;;  %v5894_v39 = vld [vmem:[%s6637_s11 + $0x10] sm:$0xff]  }
 0x6f7   : > { %v4474_v4 = vsel %vm2935_vm1, %v4285_v5, %v5793_v22  ;;  %v4473_v8 = vsel %vm2935_vm1, %v4217_v50, %v5792_v28 }
 0x6f8   : > { %5810 = vrot.lane.b32.xlu1 %v5809_v14, %s6307_s6  ;;  %v5801_v1 = vpop.permute.xlu0 %5800  ;;  %v4478_v3 = vsel %vm4477_vm3, %v4473_v8, %v5797_v23  ;;  %v4479_v40 = vsel %vm4477_vm3, %v4474_v4, %v5798_v54  ;;  %v5862_v8 = vld [vmem:[%s6635_s16 + $0x60] ss:$8 sps:$4 sm:$0xff]  }
 0x6f9   : > { %v5803_v17 = vunpack.i.h.bf16 %v5801_v1  ;;  %v5802_v6 = vunpack.i.l.bf16 %v5801_v1  ;;  %4792 = vmatpush1.bf16.msra.mxu0 %v5862_v8  ;;  %v5865_v1 = vld [vmem:[%s6635_s16 + $0x50] ss:$8 sps:$4 sm:$0xff]  }
 0x6fa   : > { %v5893_v8 = vld [vmem:[%s6637_s11 + $0x50] sm:$0xff]  }
 0x6fb   : > { %v4483_v43 = vsel %vm4482_vm4, %v4478_v3, %v5802_v6  ;;  %v4484_v36 = vsel %vm4482_vm4, %v4479_v40, %v5803_v17  ;;  %v5868_v17 = vld [vmem:[%s6635_s16 + $0x40] ss:$8 sps:$4 sm:$0xff]   ;;  %v5870_v6 = vld [vmem:[%s6635_s16 + $0x44] ss:$8 sps:$4 sm:$0xff]   ;;  %v5873_v3 = vld [vmem:[%s6635_s16 + $0x34] ss:$8 sps:$4 sm:$0xff]  }
 0x6fc   : > { %5815 = vrot.lane.b32.xlu1 %v5814_v12, %s6306_s10  ;;  %v4487_v37 = vpack.c.bf16 %v4484_v36, %v4483_v43  ;;  %v5867_v12 = vld [vmem:[%s6635_s16 + $0x54] ss:$8 sps:$4 sm:$0xff]   ;;  %v5871_v40 = vld [vmem:[%s6635_s16 + $0x30] ss:$8 sps:$4 sm:$0xff]   ;;  %v5876_v43 = vld [vmem:[%s6635_s16 + $0x24] ss:$8 sps:$4 sm:$0xff]  }
 0x6fd   : > { %4793 = vmatprep.subr.bf16.mxu0 %v5867_v12  ;;  %v5874_v36 = vld [vmem:[%s6635_s16 + $0x20] ss:$8 sps:$4 sm:$0xff]  }
 0x6fe   : > { %5657 = vmatprep.mubr.bf16.mxu1 %v4487_v37  ;;  %4794 = vmatpush1.bf16.msra.mxu0 %v5865_v1  ;;  %v5879_v37 = vld [vmem:[%s6635_s16 + $0x14] ss:$8 sps:$4 sm:$0xff]   ;;  %v5896_v1 = vld [vmem:[%s6637_s11 + $0x8] sm:$0xff]   ;;  %v5898_v12 = vld [vmem:[%s6637_s11] sm:$0xff]  }
 0x6ff   : > { %4795 = vmatprep.subr.bf16.mxu0 %v5870_v6 }
 0x702   : > { %4796 = vmatpush1.bf16.msra.mxu0 %v5868_v17  ;;  %v4697_v17 = vld [vmem:[%s6624_s15] sm:$0x3] }
 0x703   : > { %4797 = vmatprep.subr.bf16.mxu0 %v5873_v3 }
 0x706   : > { %4798 = vmatpush1.bf16.msra.mxu0 %v5871_v40  ;;  %v7960_v40 = vsub.s32 0, %v6690_v18 }
 0x707   : > { %4799 = vmatprep.subr.bf16.mxu0 %v5876_v43 }
 0x708   : > { %v4702_v43 = vrot.slane %v4697_v17, %v7960_v40 }
 0x70a   : > { %4800 = vmatpush1.bf16.msra.mxu0 %v5874_v36 }
 0x70b   : > { %4801 = vmatprep.subr.bf16.mxu0 %v5879_v37 }
 0x766   : > { %v5806_v31 = vpop.permute.xlu1 %5805 }
 0x767   : > { %v5808_v5 = vunpack.i.h.bf16 %v5806_v31  ;;  %v5807_v41 = vunpack.i.l.bf16 %v5806_v31  ;;  %v5877_v31 = vld [vmem:[%s6635_s16 + $0x10] ss:$8 sps:$4 sm:$0xff]  }
 0x768   : > { %4802 = vmatpush1.bf16.msra.mxu0 %v5877_v31 }
 0x769   : > { %v4475_v49 = vsel %vm2935_vm1, %v4353_v25, %v5807_v41  ;;  %v4476_v9 = vsel %vm2935_vm1, %v4421_v33, %v5808_v5  ;;  %v5880_v5 = vld [vmem:[%s6635_s16] ss:$8 sps:$4 sm:$0xff]   ;;  %v5883_v41 = vld [vmem:[%s6637_s11 + $0x78] sm:$0xff]  }
 0x76a   : > { %v5811_v50 = vpop.permute.xlu1 %5810  ;;  %5497 = vmatprep.subr.bf16.mxu1 %v5883_v41 }
 0x76b   : > { %v5813_v55 = vunpack.i.h.bf16 %v5811_v50  ;;  %v5812_v0 = vunpack.i.l.bf16 %v5811_v50  ;;  %v5882_v50 = vld [vmem:[%s6635_s16 + $0x4] ss:$8 sps:$4 sm:$0xff]  }
 0x76c   : > { %4803 = vmatprep.subr.bf16.mxu0 %v5882_v50 }
 0x76d   : > { %v4480_v24 = vsel %vm4477_vm3, %v4475_v49, %v5812_v0  ;;  %v4481_v15 = vsel %vm4477_vm3, %v4476_v9, %v5813_v55  ;;  %4804 = vmatpush1.bf16.msra.mxu0 %v5880_v5  ;;  %v5884_v55 = vld [vmem:[%s6637_s11 + $0x38] sm:$0xff]   ;;  %v5885_v0 = vld [vmem:[%s6637_s11 + $0x70] sm:$0xff]   ;;  %v5887_v49 = vld [vmem:[%s6637_s11 + $0x68] sm:$0xff]  }
 0x76e   : > { %v5816_v7 = vpop.permute.xlu1 %5815  ;;  %v5888_v9 = vld [vmem:[%s6637_s11 + $0x28] sm:$0xff]  }
 0x76f   : > { %v5818_v11 = vunpack.i.h.bf16 %v5816_v7  ;;  %v5817_v63 = vunpack.i.l.bf16 %v5816_v7  ;;  %v5886_v7 = vld [vmem:[%s6637_s11 + $0x30] sm:$0xff]  }
 0x771   : > { %v4485_v2 = vsel %vm4482_vm4, %v4480_v24, %v5817_v63  ;;  %v4486_v57 = vsel %vm4482_vm4, %v4481_v15, %v5818_v11  ;;  %v5889_v11 = vld [vmem:[%s6637_s11 + $0x60] sm:$0xff]   ;;  %v5891_v24 = vld [vmem:[%s6637_s11 + $0x58] sm:$0xff]  }
 0x772   : > { %v4488_v58 = vpack.c.bf16 %v4486_v57, %v4485_v2  ;;  %v5890_v63 = vld [vmem:[%s6637_s11 + $0x20] sm:$0xff]   ;;  %v5892_v15 = vld [vmem:[%s6637_s11 + $0x18] sm:$0xff]  }
 0x774   : > { %5658 = vmatmul.mubr.bf16.vlgmr.msra.gmra.mxu1 %v4488_v58 }
 0x775   : > { %5498 = vmatpush3.bf16.msra.mxu1 %v5884_v55 }
 0x776   : > { %5499 = vmatprep.subr.bf16.mxu1 %v5885_v0 }
 0x779   : > { %5500 = vmatpush3.bf16.msra.mxu1 %v5886_v7 }
 0x77a   : > { %5501 = vmatprep.subr.bf16.mxu1 %v5887_v49 }
 0x77d   : > { %5502 = vmatpush3.bf16.msra.mxu1 %v5888_v9 }
 0x77e   : > { %5503 = vmatprep.subr.bf16.mxu1 %v5889_v11 }
 0x781   : > { %5504 = vmatpush3.bf16.msra.mxu1 %v5890_v63 }
 0x782   : > { %5505 = vmatprep.subr.bf16.mxu1 %v5891_v24 }
 0x785   : > { %5506 = vmatpush3.bf16.msra.mxu1 %v5892_v15 }
 0x786   : > { %5507 = vmatprep.subr.bf16.mxu1 %v5893_v8 }
 0x789   : > { %5508 = vmatpush3.bf16.msra.mxu1 %v5894_v39 }
 0x834   : > { %v5659_v53 = vpop.f32.mrf.mxu1 }
 0x835   : > { %v4603_v25 = vadd.f32 %v5659_v53, %v5394_v47 }
 0x836   : > { %v4594_v52 = vpop.f32.mrf.mxu1 }
 0x837   : > { %v4595_v60 = vadd.f32 %v5394_v47, %v4594_v52  ;;  %v7749_v19 = vadd.f32 %v5980_v34, %v4603_v25 }
 0x838   : > { %v5660_v46 = vpop.f32.mrf.mxu1 }
 0x839   : > { %v7746_v44 = vadd.f32 %v5979_v51, %v4595_v60  ;;  %v4606_v29 = vadd.f32 %v5660_v46, %v5394_v47 }
 0x83a   : > { %v4597_v21 = vpop.f32.mrf.mxu1 }
 0x83b   : > { %v4598_v56 = vadd.f32 %v5394_v47, %v4597_v21  ;;  %4615 = vadd.xlane.f32.xlu0 %v7746_v44  ;;  %v7755_v62 = vadd.f32 %v5982_v42, %v4606_v29 }
 0x83d   : > { %v7751_v48 = vadd.f32 %v5981_v59, %v4598_v56  ;;  %v5403_v59 = vld [vmem:[%s780_s28] ss:$0 sm:$0xff] }
 0x83f   : > { %4617 = vadd.xlane.f32.xlu1 %v7751_v48  ;;  %4619 = vadd.xlane.f32.xlu0 %v7749_v19 }
 0x843   : > { %4621 = vadd.xlane.f32.xlu0 %v7755_v62 }
 0x8c4   : > { %v4616_v10 = vpop.xlane.xlu0 %4615 }
 0x8c5   : > { %v4623_v33 = vmul.f32 0.0078125, %v4616_v10 }
 0x8c7   : > { %v7761_v20 = vsub.f32 %v7746_v44, %v4623_v33  ;;  %v5404_v33 = vld [vmem:[%s783_s26] ss:$0 sm:$0xff]  ;;  %s5056_s26 = sshll.u32 %s6313_s9, 4  ;;  %s5057_s26 = int_to_ptr.vmem [resolvable:$true] %s5056_s26 }
 0x8c8   : > { %v4618_v27 = vpop.xlane.xlu1 %4617  ;;  %v4620_v61 = vpop.xlane.xlu0 %4619  ;;  %s6203_s22 = scalar_lea.vmem %s5057_s26, 512  ;;  %p6210_p1 = scmp.lt.s32.totalorder %s5057_s26, %s5057_s26 }
 0x8c9   : > { %v4624_v38 = vmul.f32 0.0078125, %v4618_v27  ;;  %v4625_v35 = vmul.f32 0.0078125, %v4620_v61  ;;  %v4631_v30 = vmul.f32 %v7761_v20, %v7761_v20  ;;  %p6204_p13 = scmp.ne.s32.totalorder %s5057_s26, %s6203_s22  ;;  %p6211_p2 = scmp.lt.s32.totalorder %s6203_s22, %s6203_s22 }
 0x8cb   : > { %v7766_v13 = vsub.f32 %v7751_v48, %v4624_v38  ;;  %v7769_v14 = vsub.f32 %v7749_v19, %v4625_v35  ;;  %4635 = vadd.xlane.f32.xlu0 %v4631_v30  ;;  %p6205_p0 = pnand %p6204_p13, %p5720_p8  ;;  %p6212_p5 = por %p6211_p2, %p6210_p1 }
 0x8cc   : > { %v4622_v22 = vpop.xlane.xlu0 %4621 }
 0x8cd   : > { %v4626_v28 = vmul.f32 0.0078125, %v4622_v22  ;;  %v4632_v16 = vmul.f32 %v7766_v13, %v7766_v13  ;;  %v4633_v54 = vmul.f32 %v7769_v14, %v7769_v14  ;;  %p6206_p11 = pneg %p6205_p0 }
 0x8cf   : > { %v7776_v23 = vsub.f32 %v7755_v62, %v4626_v28  ;;  %4637 = vadd.xlane.f32.xlu1 %v4632_v16  ;;  %4639 = vadd.xlane.f32.xlu0 %v4633_v54  ;;  %p6213_p10 = pnand %p6212_p5, %p6206_p11 }
 0x8d1   : > { %v4634_v4 = vmul.f32 %v7776_v23, %v7776_v23 }
 0x8d3   : > { %4641 = vadd.xlane.f32.xlu1 %v4634_v4 }
 0x954   : > { %v4636_v2 = vpop.xlane.xlu0 %4635 }
 0x955   : > { %v4643_v57 = vmul.f32 0.0078125, %v4636_v2 }
 0x957   : > { %v4647_v58 = vadd.f32 1e-05, %v4643_v57 }
 0x958   : > { %v4638_v53 = vpop.xlane.xlu1 %4637  ;;  %v4640_v47 = vpop.xlane.xlu0 %4639 }
 0x959   : > { %5971 = vrsqrt.f32 %v4647_v58  ;;  %v4644_v52 = vmul.f32 0.0078125, %v4638_v53  ;;  %v4645_v60 = vmul.f32 0.0078125, %v4640_v47 }
 0x95b   : > { %v4648_v46 = vadd.f32 1e-05, %v4644_v52  ;;  %v4649_v25 = vadd.f32 1e-05, %v4645_v60 }
 0x95c   : > { %v4642_v51 = vpop.xlane.xlu1 %4641 }
 0x95d   : > { %5973 = vrsqrt.f32 %v4648_v46  ;;  %v4646_v21 = vmul.f32 0.0078125, %v4642_v51 }
 0x95e   : > { %5975 = vrsqrt.f32 %v4649_v25 }
 0x95f   : > { %v4650_v56 = vadd.f32 1e-05, %v4646_v21 }
 0x961   : > { %5977 = vrsqrt.f32 %v4650_v56 }
 0x966   : > { %v5972_v34 = vpop.eup %5971 }
 0x967   : > { %v4655_v29 = vmul.f32 %v5972_v34, %v7761_v20  ;;  %v5421_v34 = vld [vmem:[%s790_s21] ss:$0 sm:$0xff] }
 0x969   : > { %v4665_v32 = vmul.f32 %v5403_v59, %v4655_v29 }
 0x96a   : > { %v5974_v42 = vpop.eup %5973 }
 0x96b   : > { %v4656_v26 = vmul.f32 %v5974_v42, %v7766_v13  ;;  %v5976_v10 = vpop.eup %5975  ;;  %v4675_v20 = vadd.f32 %v5404_v33, %v4665_v32 }
 0x96c   : > { %v4657_v35 = vmul.f32 %v5976_v10, %v7769_v14  ;;  %v5895_v14 = vld [vmem:[%s6637_s11 + $0x48] sm:$0xff]  }
 0x96d   : > { %v4666_v27 = vmul.f32 %v5403_v59, %v4656_v26  ;;  %5509 = vmatprep.subr.bf16.mxu1 %v5895_v14 }
 0x96e   : > { %v5978_v61 = vpop.eup %5977  ;;  %v4667_v28 = vmul.f32 %v5403_v59, %v4657_v35  ;;  %5510 = vmatpush3.bf16.msra.mxu1 %v5896_v1 }
 0x96f   : > { %v4676_v38 = vadd.f32 %v5404_v33, %v4666_v27  ;;  %v4658_v30 = vmul.f32 %v5978_v61, %v7776_v23  ;;  %v5897_v23 = vld [vmem:[%s6637_s11 + $0x40] sm:$0xff]  }
 0x970   : > { %v4677_v54 = vadd.f32 %v5404_v33, %v4667_v28  ;;  %5511 = vmatprep.subr.bf16.mxu1 %v5897_v23 }
 0x971   : > { %v4679_v13 = vpack.c.bf16 %v4676_v38, %v4675_v20  ;;  %v4668_v22 = vmul.f32 %v5403_v59, %v4658_v30 }
 0x972   : > { %5512 = vmatpush3.bf16.msra.mxu1 %v5898_v12 }
 0x973   : > { %4822 = vmatmul.mubr.bf16.vlgmr.msra.gmra.mxu0 %v4679_v13  ;;  %v4678_v16 = vadd.f32 %v5404_v33, %v4668_v22 }
 0x974   : > { %4831 = vmatprep.mubr.bf16.mxu0 %v7955_v45  ;;  %v7959_v45 = vsub.s32 1, %v6690_v18 }
 0x975   : > { %v4680_v4 = vpack.c.bf16 %v4678_v16, %v4677_v54 }
 0x976   : > { %v4706_v3 = vrot.slane %v4697_v17, %v7959_v45 }
 0x97b   : > { %4832 = vmatmul.mubr.bf16.gmra.mxu0 %v4680_v4 }
 0xa33   : > { %v4823_v6 = vpop.f32.mrf.mxu0 }
 0xa34   : > { %v4824_v5 = vadd.f32 %v4823_v6, %v4702_v43 }
 0xa35   : > { %v4825_v36 = vpop.f32.mrf.mxu0 }
 0xa36   : > { %v4826_v31 = vadd.f32 %v4825_v36, %v4706_v3  ;;  %v4842_v11 = vmax.f32 %v4824_v5, 0.0 }
 0xa37   : > { %v4827_v37 = vpop.f32.mrf.mxu0 }
 0xa38   : > { %v4828_v50 = vadd.f32 %v4827_v37, %v4702_v43  ;;  %v4843_v49 = vmax.f32 %v4826_v31, 0.0 }
 0xa39   : > { %v4829_v41 = vpop.f32.mrf.mxu0 }
 0xa3a   : > { %v4830_v55 = vadd.f32 %v4829_v41, %v4706_v3  ;;  %v4844_v0 = vmax.f32 %v4828_v50, 0.0 }
 0xa3b   : > { %v4833_v7 = vpop.f32.mrf.mxu0 }
 0xa3c   : > { %v4845_v9 = vmax.f32 %v4830_v55, 0.0  ;;  %v4850_v15 = vpack.c.bf16 %v4844_v0, %v4842_v11  ;;  %v4834_v58 = vadd.f32 %v4833_v7, %v4702_v43 }
 0xa3d   : > { %v4835_v63 = vpop.f32.mrf.mxu0 }
 0xa3e   : > { %v4851_v24 = vpack.c.bf16 %v4845_v9, %v4843_v49  ;;  %v4836_v57 = vadd.f32 %v4835_v63, %v4706_v3  ;;  %v4846_v25 = vmax.f32 %v4834_v58, 0.0 }
 0xa3f   : > { %v4837_v2 = vpop.f32.mrf.mxu0 }
 0xa40   : > { %v4838_v18 = vadd.f32 %v4837_v2, %v4702_v43  ;;  %5021 = vmatprep.mubr.bf16.mxu1 %v4851_v24  ;;  %v4847_v60 = vmax.f32 %v4836_v57, 0.0 }
 0xa41   : > { %v4839_v53 = vpop.f32.mrf.mxu0  ;;  %5022 = vmatmul.mubr.bf16.vlgmr.msra.gmra.mxu1 %v4850_v15 }
 0xa42   : > { %v4840_v47 = vadd.f32 %v4839_v53, %v4706_v3  ;;  %v4848_v52 = vmax.f32 %v4838_v18, 0.0 }
 0xa44   : > { %v4849_v46 = vmax.f32 %v4840_v47, 0.0  ;;  %v4852_v21 = vpack.c.bf16 %v4848_v52, %v4846_v25 }
 0xa46   : > { %v4853_v51 = vpack.c.bf16 %v4849_v46, %v4847_v60 }
 0xa48   : > { %5029 = vmatprep.mubr.bf16.mxu1 %v4853_v51 }
 0xa49   : > { %5030 = vmatmul.mubr.bf16.gmra.mxu1 %v4852_v21 }
 0xb01   : > { %v5513_v56 = vpop.f32.mrf.mxu1 }
 0xb03   : > { %v5514_v29 = vpop.f32.mrf.mxu1 }
 0xb04   : > { %v5515_v59 = vadd.f32 %v5514_v29, %v5513_v56 }
 0xb05   : > { %v5516_v42 = vpop.f32.mrf.mxu1 }
 0xb06   : > { %v5024_v26 = vadd.f32 %v5515_v59, %v5421_v34 }
 0xb07   : > { %v5517_v32 = vpop.f32.mrf.mxu1 }
 0xb08   : > { %v5038_v10 = vadd.f32 %v5024_v26, %v7746_v44  ;;  %v5518_v33 = vadd.f32 %v5517_v32, %v5516_v42 }
 0xb09   : > { %v5519_v27 = vpop.f32.mrf.mxu1 }
 0xb0a   : > { %5042 = vst [vmem:[#allocation13] sm:$0xff] %v5038_v10  ;;  %v5027_v61 = vadd.f32 %v5518_v33, %v5421_v34 }
 0xb0b   : > { %v5520_v20 = vpop.f32.mrf.mxu1 }
 0xb0c   : > { %v5039_v38 = vadd.f32 %v5027_v61, %v7751_v48  ;;  %v5521_v35 = vadd.f32 %v5520_v20, %v5519_v27 }
 0xb0d   : > { %v5522_v30 = vpop.f32.mrf.mxu1 }
 0xb0e   : > { %5043 = vst [vmem:[#allocation13 + $0x8] sm:$0xff] %v5039_v38  ;;  %v5032_v13 = vadd.f32 %v5521_v35, %v5421_v34 }
 0xb0f   : > { %v5523_v22 = vpop.f32.mrf.mxu1 }
 0xb10   : > { %v5040_v28 = vadd.f32 %v5032_v13, %v7749_v19  ;;  %v5524_v16 = vadd.f32 %v5523_v22, %v5522_v30 }
 0xb12   : > { %5044 = vst [vmem:[#allocation13 + $0x10] sm:$0xff] %v5040_v28  ;;  %v5035_v44 = vadd.f32 %v5524_v16, %v5421_v34 }
 0xb14   : > { %v5041_v54 = vadd.f32 %v5035_v44, %v7755_v62 }
 0xb16   : > { %5045 = vst [vmem:[#allocation13 + $0x18] sm:$0xff] %v5041_v54 }
 0xb17   : > { %6216 = shalt.err (!%p6213_p10)
}
 0xb18   : > { %s6314_s2 = smov 128   ;;  %s6315_s29 = smov 8  }
 0xb19   : > { %s7962_s8 = sld [smem:[#allocation38_spill]] }
 0xb1f   : > { %5686 = dma.vmem_to_hbm [thread:$0]  (%p5720_p8), %s5057_s26, 512, %s7962_s8, [#allocation4], %s6314_s2, %s6314_s2, %s6315_s29  }
 0xb20   : > { %6264 = dma.done.wait (%p5720_p8), [#allocation4], 512  }
 0xb21   : > { %6266 = vsyncadd (%p5720_p8), [#allocation4], 4294966784 }
 0xb22 PF: > { %s27_s18 = sadd.s32 1, %s6289_s18   ;;  %s7963_s25 = sld [smem:[#allocation18_spill]] }
 0xb23   : > { %p24_p7 = scmp.ge.s32.totalorder %s27_s18, 4   ;;  %s7964_s15 = sld [smem:[#allocation23_spill]] }
 0xb24   : > { %s7965_s16 = sld [smem:[#allocation20_spill]]  ;;  %s7967_s29 = smov %s6273_s30 }
 0xb25   : > { %s7966_s17 = sld [smem:[#allocation22_spill]]  ;;  %26 = sbr.rel (!%p24_p7) target bundleno = 21 (0x15), region = 199 }
 0xb28   : > { %s7968_s30 = smov %s7963_s25 }
 0xb2a   :  { %5072 = vsyncpa [#allocation3], 1 }
 0xb2b   :  { %5074 = vsyncpa [#allocation3 + $0x1], 1 }
 0xb2c   :  { %5075 = vsyncpa [#allocation6], 1 }
 0xb2d   :  { %5076 = vsyncpa [#allocation4], 1 }
 0xb2e   :  { %5078 = vsyncpa [#allocation4 + $0x1], 1 }

</bundles_post_ra>
